<compile_context>
chip_gen: v7x
topology: tpu7x:2x2x1
jax: 0.10.0
libtpu: 0.0.40
codegen_flags: <defaults>
</compile_context>

<pallas_src>
import numpy as np
import jax
import jax.numpy as jnp
from jax.experimental import pallas as pl
from jax.experimental.pallas import tpu as pltpu

NUM_LAYERS = 2   # blocks = [conv3x3, conv3x3]
LANES = 128      # TPU lane width: channel axis padded to a multiple of this


def _round_up(x, m):
    return (x + m - 1) // m * m


def residual_block_kernel(x_ref, w_ref, b_ref, o_ref, xpad_ref, patch_ref):
    """Fused (conv3x3 + bias + residual-add + relu) x L for ONE batch element.

    x_ref    : (1, H, W, Cp)   input tile (NHWC, channel-padded), f32, VMEM
    w_ref    : (L, 9*Cp, Cp)   per-layer im2col conv weights, f32, VMEM
    b_ref    : (L, 1, Cp)      per-layer conv bias, f32, VMEM
    o_ref    : (1, H, W, Cp)   output tile, f32, VMEM
    xpad_ref : (H+2, Wp, Cp)   scratch: zero-bordered halo buffer
    patch_ref: (H*W, 9*Cp)     scratch: im2col patch matrix
    """
    _, H, W, Cp = x_ref.shape
    L = w_ref.shape[0]
    HW = H * W

    # Zero the halo buffer once per tile (only the never-written border must be
    # zero => conv zero-padding); interior is overwritten every layer below.
    xpad_ref[...] = jnp.zeros_like(xpad_ref)

    ipt = x_ref[...].reshape(HW, Cp)      # ORIGINAL input, re-added every layer
    cur = ipt

    for l in range(L):                    # static Python loop, L is small
        # Scatter the current activation into the interior of the halo buffer.
        xpad_ref[1:H + 1, 1:W + 1, :] = cur.reshape(H, W, Cp)

        # im2col: 9 shifted views become lane-aligned column blocks of the
        # patch matrix (column offsets are multiples of 128).
        for t in range(9):
            dy, dx = divmod(t, 3)
            patch_ref[:, t * Cp:(t + 1) * Cp] = (
                xpad_ref[dy:dy + H, dx:dx + W, :].reshape(HW, Cp))

        # ONE MXU matmul per layer with K = 9*Cp, f32 accumulation.
        # TODO(synk): on v5e, casting patches/weights to bf16 (keeping
        # preferred_element_type=f32) would double MXU throughput at some
        # accuracy cost; kept f32 here to match the reference tolerance.
        y = jnp.dot(patch_ref[...], w_ref[l],
                    preferred_element_type=jnp.float32)
        y = y + b_ref[l]                   # bias: once per layer, (1,Cp) bcast
        cur = jnp.maximum(y + ipt, 0.0)    # x.add_(ipt); relu

    o_ref[...] = cur.reshape(1, H, W, Cp)  # full-128-lane store


def residual_block(x_nchw, weights, biases):
    """x_nchw: (B, C, H, W) f32; weights: (L,3,3,C,C) HWIO; biases: (L,1,C)."""
    B, C, H, W = x_nchw.shape
    L = weights.shape[0]
    Cp = _round_up(C, LANES)      # lane-dense channel padding
    Wp = _round_up(W + 2, 8)      # sublane-aligned halo width

    # NCHW -> NHWC, zero-pad channels to Cp (padded channels stay exactly 0
    # through every layer since padded weights/bias are 0 and relu(0)=0).
    x = jnp.transpose(x_nchw, (0, 2, 3, 1))
    x = jnp.pad(x, ((0, 0), (0, 0), (0, 0), (0, Cp - C)))

    # HWIO weights -> im2col matrix (L, 9*Cp, Cp); row order (dy, dx, cin)
    # matches the patch-matrix column blocks built inside the kernel.
    w = jnp.pad(weights, ((0, 0), (0, 0), (0, 0), (0, Cp - C), (0, Cp - C)))
    w = w.reshape(L, 9 * Cp, Cp)
    b = jnp.pad(biases, ((0, 0), (0, 0), (0, Cp - C)))

    out = pl.pallas_call(
        residual_block_kernel,
        out_shape=jax.ShapeDtypeStruct((B, H, W, Cp), jnp.float32),
        grid_spec=pltpu.PrefetchScalarGridSpec(
            num_scalar_prefetch=0,
            grid=(B,),                                        # one tile / batch
            in_specs=[
                pl.BlockSpec((1, H, W, Cp), lambda bi: (bi, 0, 0, 0)),
                pl.BlockSpec((L, 9 * Cp, Cp), lambda bi: (0, 0, 0)),  # resident
                pl.BlockSpec((L, 1, Cp), lambda bi: (0, 0, 0)),       # resident
            ],
            out_specs=pl.BlockSpec((1, H, W, Cp), lambda bi: (bi, 0, 0, 0)),
            scratch_shapes=[
                pltpu.VMEM((H + 2, Wp, Cp), jnp.float32),   # halo buffer
                pltpu.VMEM((H * W, 9 * Cp), jnp.float32),   # im2col patches
            ]),
        compiler_params=pltpu.CompilerParams(
            dimension_semantics=("parallel",),   # megacore-shard the grid (v7x)
            vmem_limit_bytes=64 * 1024 * 1024),
    )(x, w, b)

    out = out[..., :C]                           # drop channel padding
    return jnp.transpose(out, (0, 3, 1, 2))      # NHWC -> NCHW
    # TODO(synk): for large H, add a second grid axis over row tiles with an
    # L-row halo (re-loading ipt per tile) so the kernel scales past
    # whole-image-per-batch VMEM residency.


def residual_block_reference(x_nchw, weights, biases):
    """Pure-JAX reference (same math as the PyTorch forward)."""
    x = jnp.transpose(x_nchw, (0, 2, 3, 1))
    ipt = x
    for l in range(weights.shape[0]):
        y = jax.lax.conv_general_dilated(
            x, weights[l], window_strides=(1, 1), padding="SAME",
            dimension_numbers=("NHWC", "HWIO", "NHWC"))
        y = y + biases[l].reshape(1, 1, 1, -1)
        x = jnp.maximum(y + ipt, 0.0)
    return jnp.transpose(x, (0, 3, 1, 2))


if __name__ == "__main__":
    B, C, H, W = 2, 4, 16, 16

    key = jax.random.PRNGKey(0)
    kx, kw, kb = jax.random.split(key, 3)

    x = jax.random.normal(kx, (B, C, H, W), dtype=jnp.float32)
    # Deterministic synthetic Conv2d parameters (HWIO layout).
    weights = 0.1 * jax.random.normal(kw, (NUM_LAYERS, 3, 3, C, C), dtype=jnp.float32)
    biases = 0.1 * jax.random.normal(kb, (NUM_LAYERS, 1, C), dtype=jnp.float32)

    out = residual_block(x, weights, biases)
    out = jax.block_until_ready(out)

    ref = residual_block_reference(x, weights, biases)
    np.testing.assert_allclose(np.asarray(out), np.asarray(ref), rtol=1e-3, atol=1e-3)

    print("KERNEL_OK")
</pallas_src>

<mosaic_0001>
module attributes {stable_mosaic.version = 11 : i64} {
  func.func @residual_block_kernel(%arg0: i32, %arg1: memref<1x16x16x128xf32, #tpu.memory_space<vmem>>, %arg2: memref<2x1152x128xf32, #tpu.memory_space<vmem>>, %arg3: memref<2x1x128xf32, #tpu.memory_space<vmem>>, %arg4: memref<1x16x16x128xf32, #tpu.memory_space<vmem>>, %arg5: memref<18x24x128xf32, #tpu.memory_space<vmem>>, %arg6: memref<256x1152xf32, #tpu.memory_space<vmem>>) attributes {dimension_semantics = [#tpu.dimension_semantics<parallel>], iteration_bounds = array<i64: 2>, scalar_prefetch = 0 : i64, scratch_operands = 2 : i64, tpu.core_type = #tpu.core_type<tc>, window_params = [{transform_indices = @transform_0, window_bounds = array<i64: 1, 16, 16, 128>}, {pipeline_mode = #tpu.pipeline_mode<synchronous>, transform_indices = @transform_1, window_bounds = array<i64: 2, 1152, 128>}, {pipeline_mode = #tpu.pipeline_mode<synchronous>, transform_indices = @transform_2, window_bounds = array<i64: 2, 1, 128>}, {transform_indices = @transform_3, window_bounds = array<i64: 1, 16, 16, 128>}]} {
    %cst = arith.constant 0.000000e+00 : f32
    %0 = vector.broadcast %cst : f32 to vector<18x24x128xf32>
    %c0 = arith.constant 0 : index
    %c0_0 = arith.constant 0 : index
    %c0_1 = arith.constant 0 : index
    %1 = vector.load %arg5[%c0, %c0_0, %c0_1] : memref<18x24x128xf32, #tpu.memory_space<vmem>>, vector<18x24x128xf32>
    tpu.vector_store %arg5[%c0, %c0_0, %c0_1], %0 {strides = array<i32>} : memref<18x24x128xf32, #tpu.memory_space<vmem>>, vector<18x24x128xf32>,
    %c0_2 = arith.constant 0 : index
    %c0_3 = arith.constant 0 : index
    %c0_4 = arith.constant 0 : index
    %c0_5 = arith.constant 0 : index
    %2 = vector.load %arg1[%c0_2, %c0_3, %c0_4, %c0_5] : memref<1x16x16x128xf32, #tpu.memory_space<vmem>>, vector<1x16x16x128xf32>
    %3 = vector.shape_cast %2 : vector<1x16x16x128xf32> to vector<256x128xf32>
    %4 = vector.shape_cast %3 : vector<256x128xf32> to vector<16x16x128xf32>
    %c1 = arith.constant 1 : index
    %c1_6 = arith.constant 1 : index
    %c0_7 = arith.constant 0 : index
    %5 = vector.load %arg5[%c1, %c1_6, %c0_7] : memref<18x24x128xf32, #tpu.memory_space<vmem>>, vector<16x16x128xf32>
    tpu.vector_store %arg5[%c1, %c1_6, %c0_7], %4 {strides = array<i32>} : memref<18x24x128xf32, #tpu.memory_space<vmem>>, vector<16x16x128xf32>,
    %c0_8 = arith.constant 0 : index
    %c0_9 = arith.constant 0 : index
    %c0_10 = arith.constant 0 : index
    %6 = vector.load %arg5[%c0_8, %c0_9, %c0_10] : memref<18x24x128xf32, #tpu.memory_space<vmem>>, vector<16x16x128xf32>
    %7 = vector.shape_cast %6 : vector<16x16x128xf32> to vector<256x128xf32>
    %c0_11 = arith.constant 0 : index
    %c0_12 = arith.constant 0 : index
    %8 = vector.load %arg6[%c0_11, %c0_12] : memref<256x1152xf32, #tpu.memory_space<vmem>>, vector<256x128xf32>
    tpu.vector_store %arg6[%c0_11, %c0_12], %7 {strides = array<i32>} : memref<256x1152xf32, #tpu.memory_space<vmem>>, vector<256x128xf32>,
    %c0_13 = arith.constant 0 : index
    %c1_14 = arith.constant 1 : index
    %c0_15 = arith.constant 0 : index
    %9 = vector.load %arg5[%c0_13, %c1_14, %c0_15] : memref<18x24x128xf32, #tpu.memory_space<vmem>>, vector<16x16x128xf32>
    %10 = vector.shape_cast %9 : vector<16x16x128xf32> to vector<256x128xf32>
    %c0_16 = arith.constant 0 : index
    %c128 = arith.constant 128 : index
    %11 = vector.load %arg6[%c0_16, %c128] : memref<256x1152xf32, #tpu.memory_space<vmem>>, vector<256x128xf32>
    tpu.vector_store %arg6[%c0_16, %c128], %10 {strides = array<i32>} : memref<256x1152xf32, #tpu.memory_space<vmem>>, vector<256x128xf32>,
    %c0_17 = arith.constant 0 : index
    %c2 = arith.constant 2 : index
    %c0_18 = arith.constant 0 : index
    %12 = vector.load %arg5[%c0_17, %c2, %c0_18] : memref<18x24x128xf32, #tpu.memory_space<vmem>>, vector<16x16x128xf32>
    %13 = vector.shape_cast %12 : vector<16x16x128xf32> to vector<256x128xf32>
    %c0_19 = arith.constant 0 : index
    %c256 = arith.constant 256 : index
    %14 = vector.load %arg6[%c0_19, %c256] : memref<256x1152xf32, #tpu.memory_space<vmem>>, vector<256x128xf32>
    tpu.vector_store %arg6[%c0_19, %c256], %13 {strides = array<i32>} : memref<256x1152xf32, #tpu.memory_space<vmem>>, vector<256x128xf32>,
    %c1_20 = arith.constant 1 : index
    %c0_21 = arith.constant 0 : index
    %c0_22 = arith.constant 0 : index
    %15 = vector.load %arg5[%c1_20, %c0_21, %c0_22] : memref<18x24x128xf32, #tpu.memory_space<vmem>>, vector<16x16x128xf32>
    %16 = vector.shape_cast %15 : vector<16x16x128xf32> to vector<256x128xf32>
    %c0_23 = arith.constant 0 : index
    %c384 = arith.constant 384 : index
    %17 = vector.load %arg6[%c0_23, %c384] : memref<256x1152xf32, #tpu.memory_space<vmem>>, vector<256x128xf32>
    tpu.vector_store %arg6[%c0_23, %c384], %16 {strides = array<i32>} : memref<256x1152xf32, #tpu.memory_space<vmem>>, vector<256x128xf32>,
    %c1_24 = arith.constant 1 : index
    %c1_25 = arith.constant 1 : index
    %c0_26 = arith.constant 0 : index
    %18 = vector.load %arg5[%c1_24, %c1_25, %c0_26] : memref<18x24x128xf32, #tpu.memory_space<vmem>>, vector<16x16x128xf32>
    %19 = vector.shape_cast %18 : vector<16x16x128xf32> to vector<256x128xf32>
    %c0_27 = arith.constant 0 : index
    %c512 = arith.constant 512 : index
    %20 = vector.load %arg6[%c0_27, %c512] : memref<256x1152xf32, #tpu.memory_space<vmem>>, vector<256x128xf32>
    tpu.vector_store %arg6[%c0_27, %c512], %19 {strides = array<i32>} : memref<256x1152xf32, #tpu.memory_space<vmem>>, vector<256x128xf32>,
    %c1_28 = arith.constant 1 : index
    %c2_29 = arith.constant 2 : index
    %c0_30 = arith.constant 0 : index
    %21 = vector.load %arg5[%c1_28, %c2_29, %c0_30] : memref<18x24x128xf32, #tpu.memory_space<vmem>>, vector<16x16x128xf32>
    %22 = vector.shape_cast %21 : vector<16x16x128xf32> to vector<256x128xf32>
    %c0_31 = arith.constant 0 : index
    %c640 = arith.constant 640 : index
    %23 = vector.load %arg6[%c0_31, %c640] : memref<256x1152xf32, #tpu.memory_space<vmem>>, vector<256x128xf32>
    tpu.vector_store %arg6[%c0_31, %c640], %22 {strides = array<i32>} : memref<256x1152xf32, #tpu.memory_space<vmem>>, vector<256x128xf32>,
    %c2_32 = arith.constant 2 : index
    %c0_33 = arith.constant 0 : index
    %c0_34 = arith.constant 0 : index
    %24 = vector.load %arg5[%c2_32, %c0_33, %c0_34] : memref<18x24x128xf32, #tpu.memory_space<vmem>>, vector<16x16x128xf32>
    %25 = vector.shape_cast %24 : vector<16x16x128xf32> to vector<256x128xf32>
    %c0_35 = arith.constant 0 : index
    %c768 = arith.constant 768 : index
    %26 = vector.load %arg6[%c0_35, %c768] : memref<256x1152xf32, #tpu.memory_space<vmem>>, vector<256x128xf32>
    tpu.vector_store %arg6[%c0_35, %c768], %25 {strides = array<i32>} : memref<256x1152xf32, #tpu.memory_space<vmem>>, vector<256x128xf32>,
    %c2_36 = arith.constant 2 : index
    %c1_37 = arith.constant 1 : index
    %c0_38 = arith.constant 0 : index
    %27 = vector.load %arg5[%c2_36, %c1_37, %c0_38] : memref<18x24x128xf32, #tpu.memory_space<vmem>>, vector<16x16x128xf32>
    %28 = vector.shape_cast %27 : vector<16x16x128xf32> to vector<256x128xf32>
    %c0_39 = arith.constant 0 : index
    %c896 = arith.constant 896 : index
    %29 = vector.load %arg6[%c0_39, %c896] : memref<256x1152xf32, #tpu.memory_space<vmem>>, vector<256x128xf32>
    tpu.vector_store %arg6[%c0_39, %c896], %28 {strides = array<i32>} : memref<256x1152xf32, #tpu.memory_space<vmem>>, vector<256x128xf32>,
    %c2_40 = arith.constant 2 : index
    %c2_41 = arith.constant 2 : index
    %c0_42 = arith.constant 0 : index
    %30 = vector.load %arg5[%c2_40, %c2_41, %c0_42] : memref<18x24x128xf32, #tpu.memory_space<vmem>>, vector<16x16x128xf32>
    %31 = vector.shape_cast %30 : vector<16x16x128xf32> to vector<256x128xf32>
    %c0_43 = arith.constant 0 : index
    %c1024 = arith.constant 1024 : index
    %32 = vector.load %arg6[%c0_43, %c1024] : memref<256x1152xf32, #tpu.memory_space<vmem>>, vector<256x128xf32>
    tpu.vector_store %arg6[%c0_43, %c1024], %31 {strides = array<i32>} : memref<256x1152xf32, #tpu.memory_space<vmem>>, vector<256x128xf32>,
    %c0_44 = arith.constant 0 : index
    %c0_45 = arith.constant 0 : index
    %33 = vector.load %arg6[%c0_44, %c0_45] : memref<256x1152xf32, #tpu.memory_space<vmem>>, vector<256x1152xf32>
    %c0_46 = arith.constant 0 : index
    %c0_47 = arith.constant 0 : index
    %c0_48 = arith.constant 0 : index
    %34 = vector.load %arg2[%c0_46, %c0_47, %c0_48] : memref<2x1152x128xf32, #tpu.memory_space<vmem>>, vector<1x1152x128xf32>
    %35 = vector.shape_cast %34 : vector<1x1152x128xf32> to vector<1152x128xf32>
    %cst_49 = arith.constant dense<0.000000e+00> : vector<256x128xf32>
    %36 = tpu.matmul %33, %35, %cst_49 {dimension_numbers = #tpu.dot_dimension_numbers<[1], [0], [0], [1], [0, 0, 1, 1], [], []>} : vector<256x1152xf32>, vector<1152x128xf32>, vector<256x128xf32> -> vector<256x128xf32>
    %c0_50 = arith.constant 0 : index
    %c0_51 = arith.constant 0 : index
    %c0_52 = arith.constant 0 : index
    %37 = vector.load %arg3[%c0_50, %c0_51, %c0_52] : memref<2x1x128xf32, #tpu.memory_space<vmem>>, vector<1x1x128xf32>
    %38 = vector.shape_cast %37 : vector<1x1x128xf32> to vector<1x128xf32>
    %39 = vector.broadcast %38 : vector<1x128xf32> to vector<256x128xf32>
    %40 = arith.addf %36, %39 : vector<256x128xf32>
    %41 = arith.addf %40, %3 : vector<256x128xf32>
    %cst_53 = arith.constant 0.000000e+00 : f32
    %42 = vector.broadcast %cst_53 : f32 to vector<256x128xf32>
    %43 = arith.maximumf %41, %42 : vector<256x128xf32>
    %44 = vector.shape_cast %43 : vector<256x128xf32> to vector<16x16x128xf32>
    %c1_54 = arith.constant 1 : index
    %c1_55 = arith.constant 1 : index
    %c0_56 = arith.constant 0 : index
    %45 = vector.load %arg5[%c1_54, %c1_55, %c0_56] : memref<18x24x128xf32, #tpu.memory_space<vmem>>, vector<16x16x128xf32>
    tpu.vector_store %arg5[%c1_54, %c1_55, %c0_56], %44 {strides = array<i32>} : memref<18x24x128xf32, #tpu.memory_space<vmem>>, vector<16x16x128xf32>,
    %c0_57 = arith.constant 0 : index
    %c0_58 = arith.constant 0 : index
    %c0_59 = arith.constant 0 : index
    %46 = vector.load %arg5[%c0_57, %c0_58, %c0_59] : memref<18x24x128xf32, #tpu.memory_space<vmem>>, vector<16x16x128xf32>
    %47 = vector.shape_cast %46 : vector<16x16x128xf32> to vector<256x128xf32>
    %c0_60 = arith.constant 0 : index
    %c0_61 = arith.constant 0 : index
    %48 = vector.load %arg6[%c0_60, %c0_61] : memref<256x1152xf32, #tpu.memory_space<vmem>>, vector<256x128xf32>
    tpu.vector_store %arg6[%c0_60, %c0_61], %47 {strides = array<i32>} : memref<256x1152xf32, #tpu.memory_space<vmem>>, vector<256x128xf32>,
    %c0_62 = arith.constant 0 : index
    %c1_63 = arith.constant 1 : index
    %c0_64 = arith.constant 0 : index
    %49 = vector.load %arg5[%c0_62, %c1_63, %c0_64] : memref<18x24x128xf32, #tpu.memory_space<vmem>>, vector<16x16x128xf32>
    %50 = vector.shape_cast %49 : vector<16x16x128xf32> to vector<256x128xf32>
    %c0_65 = arith.constant 0 : index
    %c128_66 = arith.constant 128 : index
    %51 = vector.load %arg6[%c0_65, %c128_66] : memref<256x1152xf32, #tpu.memory_space<vmem>>, vector<256x128xf32>
    tpu.vector_store %arg6[%c0_65, %c128_66], %50 {strides = array<i32>} : memref<256x1152xf32, #tpu.memory_space<vmem>>, vector<256x128xf32>,
    %c0_67 = arith.constant 0 : index
    %c2_68 = arith.constant 2 : index
    %c0_69 = arith.constant 0 : index
    %52 = vector.load %arg5[%c0_67, %c2_68, %c0_69] : memref<18x24x128xf32, #tpu.memory_space<vmem>>, vector<16x16x128xf32>
    %53 = vector.shape_cast %52 : vector<16x16x128xf32> to vector<256x128xf32>
    %c0_70 = arith.constant 0 : index
    %c256_71 = arith.constant 256 : index
    %54 = vector.load %arg6[%c0_70, %c256_71] : memref<256x1152xf32, #tpu.memory_space<vmem>>, vector<256x128xf32>
    tpu.vector_store %arg6[%c0_70, %c256_71], %53 {strides = array<i32>} : memref<256x1152xf32, #tpu.memory_space<vmem>>, vector<256x128xf32>,
    %c1_72 = arith.constant 1 : index
    %c0_73 = arith.constant 0 : index
    %c0_74 = arith.constant 0 : index
    %55 = vector.load %arg5[%c1_72, %c0_73, %c0_74] : memref<18x24x128xf32, #tpu.memory_space<vmem>>, vector<16x16x128xf32>
    %56 = vector.shape_cast %55 : vector<16x16x128xf32> to vector<256x128xf32>
    %c0_75 = arith.constant 0 : index
    %c384_76 = arith.constant 384 : index
    %57 = vector.load %arg6[%c0_75, %c384_76] : memref<256x1152xf32, #tpu.memory_space<vmem>>, vector<256x128xf32>
    tpu.vector_store %arg6[%c0_75, %c384_76], %56 {strides = array<i32>} : memref<256x1152xf32, #tpu.memory_space<vmem>>, vector<256x128xf32>,
    %c1_77 = arith.constant 1 : index
    %c1_78 = arith.constant 1 : index
    %c0_79 = arith.constant 0 : index
    %58 = vector.load %arg5[%c1_77, %c1_78, %c0_79] : memref<18x24x128xf32, #tpu.memory_space<vmem>>, vector<16x16x128xf32>
    %59 = vector.shape_cast %58 : vector<16x16x128xf32> to vector<256x128xf32>
    %c0_80 = arith.constant 0 : index
    %c512_81 = arith.constant 512 : index
    %60 = vector.load %arg6[%c0_80, %c512_81] : memref<256x1152xf32, #tpu.memory_space<vmem>>, vector<256x128xf32>
    tpu.vector_store %arg6[%c0_80, %c512_81], %59 {strides = array<i32>} : memref<256x1152xf32, #tpu.memory_space<vmem>>, vector<256x128xf32>,
    %c1_82 = arith.constant 1 : index
    %c2_83 = arith.constant 2 : index
    %c0_84 = arith.constant 0 : index
    %61 = vector.load %arg5[%c1_82, %c2_83, %c0_84] : memref<18x24x128xf32, #tpu.memory_space<vmem>>, vector<16x16x128xf32>
    %62 = vector.shape_cast %61 : vector<16x16x128xf32> to vector<256x128xf32>
    %c0_85 = arith.constant 0 : index
    %c640_86 = arith.constant 640 : index
    %63 = vector.load %arg6[%c0_85, %c640_86] : memref<256x1152xf32, #tpu.memory_space<vmem>>, vector<256x128xf32>
    tpu.vector_store %arg6[%c0_85, %c640_86], %62 {strides = array<i32>} : memref<256x1152xf32, #tpu.memory_space<vmem>>, vector<256x128xf32>,
    %c2_87 = arith.constant 2 : index
    %c0_88 = arith.constant 0 : index
    %c0_89 = arith.constant 0 : index
    %64 = vector.load %arg5[%c2_87, %c0_88, %c0_89] : memref<18x24x128xf32, #tpu.memory_space<vmem>>, vector<16x16x128xf32>
    %65 = vector.shape_cast %64 : vector<16x16x128xf32> to vector<256x128xf32>
    %c0_90 = arith.constant 0 : index
    %c768_91 = arith.constant 768 : index
    %66 = vector.load %arg6[%c0_90, %c768_91] : memref<256x1152xf32, #tpu.memory_space<vmem>>, vector<256x128xf32>
    tpu.vector_store %arg6[%c0_90, %c768_91], %65 {strides = array<i32>} : memref<256x1152xf32, #tpu.memory_space<vmem>>, vector<256x128xf32>,
    %c2_92 = arith.constant 2 : index
    %c1_93 = arith.constant 1 : index
    %c0_94 = arith.constant 0 : index
    %67 = vector.load %arg5[%c2_92, %c1_93, %c0_94] : memref<18x24x128xf32, #tpu.memory_space<vmem>>, vector<16x16x128xf32>
    %68 = vector.shape_cast %67 : vector<16x16x128xf32> to vector<256x128xf32>
    %c0_95 = arith.constant 0 : index
    %c896_96 = arith.constant 896 : index
    %69 = vector.load %arg6[%c0_95, %c896_96] : memref<256x1152xf32, #tpu.memory_space<vmem>>, vector<256x128xf32>
    tpu.vector_store %arg6[%c0_95, %c896_96], %68 {strides = array<i32>} : memref<256x1152xf32, #tpu.memory_space<vmem>>, vector<256x128xf32>,
    %c2_97 = arith.constant 2 : index
    %c2_98 = arith.constant 2 : index
    %c0_99 = arith.constant 0 : index
    %70 = vector.load %arg5[%c2_97, %c2_98, %c0_99] : memref<18x24x128xf32, #tpu.memory_space<vmem>>, vector<16x16x128xf32>
    %71 = vector.shape_cast %70 : vector<16x16x128xf32> to vector<256x128xf32>
    %c0_100 = arith.constant 0 : index
    %c1024_101 = arith.constant 1024 : index
    %72 = vector.load %arg6[%c0_100, %c1024_101] : memref<256x1152xf32, #tpu.memory_space<vmem>>, vector<256x128xf32>
    tpu.vector_store %arg6[%c0_100, %c1024_101], %71 {strides = array<i32>} : memref<256x1152xf32, #tpu.memory_space<vmem>>, vector<256x128xf32>,
    %c0_102 = arith.constant 0 : index
    %c0_103 = arith.constant 0 : index
    %73 = vector.load %arg6[%c0_102, %c0_103] : memref<256x1152xf32, #tpu.memory_space<vmem>>, vector<256x1152xf32>
    %c1_104 = arith.constant 1 : index
    %c0_105 = arith.constant 0 : index
    %c0_106 = arith.constant 0 : index
    %74 = vector.load %arg2[%c1_104, %c0_105, %c0_106] : memref<2x1152x128xf32, #tpu.memory_space<vmem>>, vector<1x1152x128xf32>
    %75 = vector.shape_cast %74 : vector<1x1152x128xf32> to vector<1152x128xf32>
    %cst_107 = arith.constant dense<0.000000e+00> : vector<256x128xf32>
    %76 = tpu.matmul %73, %75, %cst_107 {dimension_numbers = #tpu.dot_dimension_numbers<[1], [0], [0], [1], [0, 0, 1, 1], [], []>} : vector<256x1152xf32>, vector<1152x128xf32>, vector<256x128xf32> -> vector<256x128xf32>
    %c1_108 = arith.constant 1 : index
    %c0_109 = arith.constant 0 : index
    %c0_110 = arith.constant 0 : index
    %77 = vector.load %arg3[%c1_108, %c0_109, %c0_110] : memref<2x1x128xf32, #tpu.memory_space<vmem>>, vector<1x1x128xf32>
    %78 = vector.shape_cast %77 : vector<1x1x128xf32> to vector<1x128xf32>
    %79 = vector.broadcast %78 : vector<1x128xf32> to vector<256x128xf32>
    %80 = arith.addf %76, %79 : vector<256x128xf32>
    %81 = arith.addf %80, %3 : vector<256x128xf32>
    %cst_111 = arith.constant 0.000000e+00 : f32
    %82 = vector.broadcast %cst_111 : f32 to vector<256x128xf32>
    %83 = arith.maximumf %81, %82 : vector<256x128xf32>
    %84 = vector.shape_cast %83 : vector<256x128xf32> to vector<1x16x16x128xf32>
    %c0_112 = arith.constant 0 : index
    %c0_113 = arith.constant 0 : index
    %c0_114 = arith.constant 0 : index
    %c0_115 = arith.constant 0 : index
    %85 = vector.load %arg4[%c0_112, %c0_113, %c0_114, %c0_115] : memref<1x16x16x128xf32, #tpu.memory_space<vmem>>, vector<1x16x16x128xf32>
    tpu.vector_store %arg4[%c0_112, %c0_113, %c0_114, %c0_115], %84 {strides = array<i32>} : memref<1x16x16x128xf32, #tpu.memory_space<vmem>>, vector<1x16x16x128xf32>,
    return
  }
  func.func @transform_0(%arg0: i32) -> (i32, i32, i32, i32) {
    %c0_i32 = arith.constant 0 : i32
    %c0_i32_0 = arith.constant 0 : i32
    %c0_i32_1 = arith.constant 0 : i32
    %c0_i32_2 = arith.constant 0 : i32
    return %arg0, %c0_i32, %c0_i32_0, %c0_i32_1 : i32, i32, i32, i32
  }
  func.func @transform_1(%arg0: i32) -> (i32, i32, i32) {
    %c0_i32 = arith.constant 0 : i32
    %c0_i32_0 = arith.constant 0 : i32
    %c0_i32_1 = arith.constant 0 : i32
    %c0_i32_2 = arith.constant 0 : i32
    return %c0_i32, %c0_i32_0, %c0_i32_1 : i32, i32, i32
  }
  func.func @transform_2(%arg0: i32) -> (i32, i32, i32) {
    %c0_i32 = arith.constant 0 : i32
    %c0_i32_0 = arith.constant 0 : i32
    %c0_i32_1 = arith.constant 0 : i32
    %c0_i32_2 = arith.constant 0 : i32
    return %c0_i32, %c0_i32_0, %c0_i32_1 : i32, i32, i32
  }
  func.func @transform_3(%arg0: i32) -> (i32, i32, i32, i32) {
    %c0_i32 = arith.constant 0 : i32
    %c0_i32_0 = arith.constant 0 : i32
    %c0_i32_1 = arith.constant 0 : i32
    %c0_i32_2 = arith.constant 0 : i32
    return %arg0, %c0_i32, %c0_i32_0, %c0_i32_1 : i32, i32, i32, i32
  }
}

</mosaic_0001>

<bundles_post_ra>
// kernel: tpu_custom_call.1
= control target key start
LH: loop header
LB: loop body
LE: loop exit
PB: predicated region body
PF: predicated region fallthrough
CT: control target
= control target key end

     0   :  { %8 = vsyncpa [#allocation5], 0  ;;  %s8156_s0 = inlined_call_operand.hbm [shape: f32[2,16,16,128], index: 0, kind: input, shape index: {}]   ;;  %s8157_s1 = inlined_call_operand.hbm [shape: f32[2,1152,128], index: 1, kind: input, shape index: {}]   ;;  %s8158_s2 = inlined_call_operand.hbm [shape: f32[2,1,128], index: 2, kind: input, shape index: {}]   ;;  %s8159_s3 = inlined_call_operand.hbm [shape: f32[2,16,16,128], index: 3, kind: output, shape index: {}]  }
   0x1   :  { %10 = vsyncpa [#allocation5 + $0x1], 0 }
   0x2   :  { %11 = vsyncpa [#allocation8], 0 }
   0x3   :  { %12 = vsyncpa [#allocation6], 0 }
   0x4   :  { %14 = vsyncpa [#allocation6 + $0x1], 0  ;;  %s6437_s12 = smov 0   ;;  %s6439_s13 = smov 0  }
   0x5   :  { %s6441_s14 = smov 0   ;;  %s6443_s15 = smov 0  }
   0x6 LB: > { %s6458_s16 = sadd.s32 4294967295, %s6403_s15   ;;  %s4918_s17 = sadd.s32 4294967294, %s6403_s15   ;;  %s6403_s15 = sphi %s6443_s15, %s8343_s15   ;;  %s6399_s14 = sphi %s6441_s14, %s8342_s14   ;;  %s6395_s13 = sphi %s6439_s13, %s8341_s13   ;;  %s6391_s12 = sphi %s6437_s12, %s8340_s12  }
   0x7   : > { %p40_p0 = scmp.ne.s32.totalorder %s6395_s13, %s6391_s12  ;;  %p8160_p1 = scmp.eq.s32.totalorder %s6458_s16, 0 }
   0x8   : > { %p112_p3 = scmp.eq.s32.totalorder %s4918_s17, 1  ;;  %p4919_p5 = scmp.ge.s32.totalorder %s6403_s15, 1 }
   0x9   : > { %p6467_p4 = por %p8160_p1, %p40_p0  ;;  %p119_p7 = scmp.lt.s32.totalorder %s6403_s15, 3 }
   0xa   : > { %p6472_p6 = por %p112_p3, %p40_p0  ;;  %s6405_s21 = smov [#allocation7]  }
   0xb   : > { %s8228_s18 = scalar_select %p6467_p4, 1, 0 }
   0xc   : > { %s8229_s19 = scalar_select %p6472_p6, 1, 0 }
   0xd   : > { %p6477_p8 = pnand %p4919_p5, %p119_p7  ;;  %s131_s22 = sshll.u32 %s6405_s21, 4  ;;  %s6481_s22 = int_to_ptr.vmem [resolvable:$true] %s131_s22 }
   0xe   : > { %s6406_s24 = smov [#allocation9]   ;;  %s6247_s28 = scalar_lea.hbm %s8157_s1, 36864 }
   0xf   : > { %p6120_p9 = pneg %p6477_p8  ;;  %s144_s25 = sshll.u32 %s6406_s24, 4  ;;  %s6492_s25 = int_to_ptr.vmem [resolvable:$true] %s144_s25 }
  0x10   : > { %p6248_p12 = scmp.ne.s32.totalorder %s8157_s1, %s6247_s28  ;;  %p6254_p5 = scmp.lt.u32.totalorder %s6247_s28, %s8157_s1 }
  0x11   : > { %p6488_p11 = pnand %p6120_p9, %p8160_p1 }
  0x13   : > { %p6249_p13 = pneg %p6488_p11 }
  0x15   : > { %p6250_p0 = pnand %p6249_p13, %p6248_p12 }
  0x17   : > { %p6251_p3 = pneg %p6250_p0 }
  0x19   : > { %p6256_p7 = pnand %p6254_p5, %p6251_p3 }
  0x1b   : > { %6259 = shalt.err (!%p6256_p7)
}
  0x1c   : > { %s6260_s6 = scalar_lea.vmem %s6481_s22, 36864  ;;  %p6268_p2 = scmp.lt.s32.totalorder %s6481_s22, %s6481_s22 }
  0x1d   : > { %p6261_p9 = scmp.ne.s32.totalorder %s6481_s22, %s6260_s6  ;;  %p6269_p12 = scmp.lt.s32.totalorder %s6260_s6, %s6260_s6 }
  0x1f   : > { %p6263_p10 = pnand %p6261_p9, %p6249_p13  ;;  %p6270_p0 = por %p6269_p12, %p6268_p2 }
  0x21   : > { %p6264_p1 = pneg %p6263_p10 }
  0x23   : > { %p6271_p6 = pnand %p6270_p0, %p6264_p1 }
  0x25   : > { %6274 = shalt.err (!%p6271_p6)
}
  0x26   : > { %s6407_s7 = smov 128   ;;  %s6408_s8 = smov 8  }
  0x27   : > { %6123 = dma.hbm_to_vmem [thread:$0]  (!%p6488_p11), %s8157_s1, 36864, %s6481_s22, [#allocation8], %s6407_s7, %s6407_s7, %s6408_s8  }
  0x28   : > { %s6275_s21 = scalar_lea.hbm %s8158_s2, 32 }
  0x29   : > { %p6276_p1 = scmp.ne.s32.totalorder %s8158_s2, %s6275_s21  ;;  %p6282_p10 = scmp.lt.u32.totalorder %s6275_s21, %s8158_s2 }
  0x2b   : > { %p6278_p2 = pnand %p6276_p1, %p6249_p13 }
  0x2d   : > { %p6279_p6 = pneg %p6278_p2 }
  0x2f   : > { %p6284_p3 = pnand %p6282_p10, %p6279_p6 }
  0x31   : > { %6287 = shalt.err (!%p6284_p3)
}
  0x32   : > { %s6288_s22 = scalar_lea.vmem %s6492_s25, 32  ;;  %p6296_p12 = scmp.lt.s32.totalorder %s6492_s25, %s6492_s25 }
  0x33   : > { %p6289_p5 = scmp.ne.s32.totalorder %s6492_s25, %s6288_s22  ;;  %p6297_p0 = scmp.lt.s32.totalorder %s6288_s22, %s6288_s22 }
  0x35   : > { %p6291_p7 = pnand %p6289_p5, %p6249_p13  ;;  %p6298_p1 = por %p6297_p0, %p6296_p12 }
  0x37   : > { %p6292_p9 = pneg %p6291_p7 }
  0x39   : > { %p6299_p2 = pnand %p6298_p1, %p6292_p9 }
  0x3b   : > { %6302 = shalt.err (!%p6299_p2)
}
  0x3c   : > { %s6409_s29 = smov 16   ;;  %s6410_s30 = smov 1  }
  0x3d   : > { %6126 = dma.hbm_to_vmem [thread:$0]  (!%p6488_p11), %s8158_s2, 32, %s6492_s25, [#allocation8], %s6409_s29, %s6409_s29, %s6410_s30  }
  0x3e   : > { %s6550_s6 = sadd.s32 1, %s6403_s15   ;;  %s27_s10 = sadd.s32 1, %s6399_s14 }
  0x3f   : > { %s24_s9 = ssub.s32 %s6403_s15, %s6550_s6  ;;  %p34_p6 = scmp.ne.s32.totalorder %s6399_s14, %s6395_s13 }
  0x40   : > { %p25_p13 = scmp.eq.s32.totalorder %s24_s9, 0  ;;  %p35_p10 = scmp.eq.s32.totalorder %s6403_s15, 0 }
  0x41   : > { %p8232_p5 = scmp.eq.s32.totalorder %s6458_s16, 1  ;;  %p6137_p9 = scmp.lt.s32.totalorder %s6403_s15, 2 }
  0x42   : > { %s6559_s11 = scalar_select %p25_p13, %s6399_s14, %s27_s10  }
  0x43   : > { %p36_p3 = por %p35_p10, %p34_p6  ;;  %p6563_p7 = por %p8232_p5, %p34_p6 }
  0x44   : > { %s158_s23 = sand.u32 1, %s6399_s14   ;;  %s4938_s25 = sshll.u32 %s6403_s15, 12 }
  0x45   : > { %s8233_s17 = scalar_select %p6563_p7, 1, 0 }
  0x46   : > { %s4923_s21 = sshll.u32 %s158_s23, 8  ;;  %s6573_s27 = scalar_lea.hbm %s8156_s0, %s4938_s25 }
  0x47   : > { %s162_s28 = scalar_lea.vmem [#allocation4], %s4923_s21  ;;  %p6577_p11 = pnand %p6137_p9, %p36_p3 }
  0x48   : > { %s169_s22 = sshll.u32 %s162_s28, 4  ;;  %s6581_s30 = scalar_lea.sflag [#allocation5], %s158_s23  ;;  %s6575_s22 = int_to_ptr.vmem [resolvable:$true] %s169_s22 }
  0x49   : > { %s6303_s4 = scalar_lea.hbm %s6573_s27, 4096  ;;  %p6305_p0 = pneg %p6577_p11 }
  0x4a   : > { %p6304_p12 = scmp.ne.s32.totalorder %s6573_s27, %s6303_s4  ;;  %s6308_s10 = scalar_lea.hbm %s8156_s0, 8192 }
  0x4b   : > { %p6309_p13 = scmp.lt.u32.totalorder %s6573_s27, %s8156_s0  ;;  %p6310_p6 = scmp.lt.u32.totalorder %s6308_s10, %s6303_s4 }
  0x4c   : > { %p6306_p1 = pnand %p6305_p0, %p6304_p12  ;;  %p6312_p3 = scmp.lt.u32.totalorder %s6303_s4, %s6573_s27 }
  0x4d   : > { %p6311_p10 = por %p6310_p6, %p6309_p13 }
  0x4e   : > { %p6307_p2 = pneg %p6306_p1 }
  0x4f   : > { %p6313_p5 = por %p6312_p3, %p6311_p10 }
  0x51   : > { %p6314_p9 = pnand %p6313_p5, %p6307_p2 }
  0x53   : > { %6317 = shalt.err (!%p6314_p9)
}
  0x54   : > { %s6318_s23 = scalar_lea.vmem %s6575_s22, 4096  ;;  %s6411_s24 = smov [#allocation4]  }
  0x55   : > { %p6319_p12 = scmp.ne.s32.totalorder %s6575_s22, %s6318_s23  ;;  %s6323_s26 = sshll.u32 %s6411_s24, 4  ;;  %s6324_s26 = int_to_ptr.vmem [resolvable:$false] %s6323_s26 }
  0x56   : > { %s6325_s28 = scalar_lea.vmem %s6324_s26, 8192  ;;  %p6326_p4 = scmp.lt.s32.totalorder %s6575_s22, %s6324_s26 }
  0x57   : > { %p6321_p1 = pnand %p6319_p12, %p6305_p0  ;;  %p6327_p13 = scmp.lt.s32.totalorder %s6325_s28, %s6318_s23 }
  0x59   : > { %p6322_p7 = pneg %p6321_p1  ;;  %p6328_p6 = por %p6327_p13, %p6326_p4 }
  0x5b   : > { %p6329_p10 = pnand %p6328_p6, %p6322_p7 }
  0x5d   : > { %6332 = shalt.err (!%p6329_p10)
}
  0x5e   : > { %6130 = dma.hbm_to_vmem [thread:$0]  (!%p6577_p11), %s6573_s27, 4096, %s6575_s22, %s6581_s30, %s6407_s7, %s6407_s7, %s6408_s8  }
  0x5f   : > { %181 = sbr.rel (%p6477_p8) target bundleno = 1539 (0x603), region = 32 }
  0x66   : > { %s6615_s4 = sand.u32 1, %s6395_s13   ;;  %p8235_p4 = scmp.ne.s32.totalorder %s8228_s18, 0 }
  0x67   : > { %s4927_s5 = sshll.u32 %s6615_s4, 8  ;;  %s184_s9 = scalar_lea.sflag [#allocation5], %s6615_s4 }
  0x68   : > { %s6621_s29 = scalar_lea.vmem [#allocation4], %s4927_s5 }
  0x69   : > { %6378 = dma.done.wait (%p8235_p4), %s184_s9, 4096  }
  0x6a   : > { %6380 = vsyncadd (%p8235_p4), %s184_s9, 4294963200  ;;  %p8236_p7 = scmp.eq.s32.totalorder %s6458_s16, 0 }
  0x6c   : > { %6382 = dma.done.wait (%p8236_p7), [#allocation8], 36896   ;;  %p8237_p8 = pmov %p8236_p7 }
  0x6d   : > { %v8163_v0 = vmov 0.0|0.0   ;;  %v6413_v1 = vmov 0.0   ;;  %v1202_v2 = vld [vmem:[#allocation7] sm:$0xff]  ;;  %v1203_v3 = vld [vmem:[#allocation7 + $0x8] sm:$0xff]  ;;  %v1204_v4 = vld [vmem:[#allocation7 + $0x10] sm:$0xff]  ;;  %s7988_s18 = scalar_lea.vmem [#allocation10], %s4927_s5 }
  0x6e   : > { %6384 = vsyncadd (%p8237_p8), [#allocation8], 4294930400  ;;  %5196 = vmatprep.subr.bf16.mxu0 %v8163_v0  ;;  %218 = vst [vmem:[#allocation2] sm:$0xff] %v6413_v1  ;;  %v5197_v5 = vpack.c.bf16 %v1203_v3, %v1202_v2  ;;  %v1205_v6 = vld [vmem:[#allocation7 + $0x18] sm:$0xff]  ;;  %v1206_v8 = vld [vmem:[#allocation7 + $0x20] sm:$0xff]  ;;  %s4939_s20 = sshll.u32 %s6458_s16, 12 }
  0x6f   : > { %219 = vst [vmem:[#allocation2 + $0x8] sm:$0xff] %v6413_v1  ;;  %220 = vst [vmem:[#allocation2 + $0x10] sm:$0xff] %v6413_v1  ;;  %v5200_v7 = vpack.c.bf16 %v1205_v6, %v1204_v4  ;;  %v1207_v9 = vld [vmem:[#allocation7 + $0x28] sm:$0xff]  ;;  %v1208_v11 = vld [vmem:[#allocation7 + $0x30] sm:$0xff]  ;;  %s4826_s7 = sshll.u32 %s7988_s18, 4  ;;  %s8108_s22 = scalar_lea.hbm %s8159_s3, %s4939_s20  ;;  %s8110_s7 = int_to_ptr.vmem [resolvable:$true] %s4826_s7 }
  0x70   : > { %221 = vst [vmem:[#allocation2 + $0x18] sm:$0xff] %v6413_v1  ;;  %222 = vst [vmem:[#allocation2 + $0x20] sm:$0xff] %v6413_v1  ;;  %5198 = vmatpush1.bf16.msra.mxu0 %v5197_v5  ;;  %v5203_v10 = vpack.c.bf16 %v1207_v9, %v1206_v8  ;;  %v1209_v12 = vld [vmem:[#allocation7 + $0x38] sm:$0xff]  ;;  %v1210_v15 = vld [vmem:[#allocation7 + $0x40] sm:$0xff]  ;;  %s4813_s16 = scalar_lea.sflag [#allocation6], %s6615_s4  ;;  %s6333_s30 = scalar_lea.vmem %s8110_s7, 4096 }
  0x71   : > { %223 = vst [vmem:[#allocation2 + $0x28] sm:$0xff] %v6413_v1  ;;  %224 = vst [vmem:[#allocation2 + $0x30] sm:$0xff] %v6413_v1  ;;  %5199 = vmatprep.subr.bf16.mxu0 %v8163_v0  ;;  %v5206_v14 = vpack.c.bf16 %v1209_v12, %v1208_v11  ;;  %v1211_v16 = vld [vmem:[#allocation7 + $0x48] sm:$0xff]  ;;  %v6690_v17 = vld [vmem:[%s6621_s29] sm:$0xff]  ;;  %p6334_p11 = scmp.ne.s32.totalorder %s8110_s7, %s6333_s30  ;;  %p8337_p0 = scmp.ne.s32.totalorder %s8233_s17, 0 }
  0x72   : > { %225 = vst [vmem:[#allocation2 + $0x38] sm:$0xff] %v6413_v1  ;;  %226 = vst [vmem:[#allocation2 + $0x40] sm:$0xff] %v6413_v1  ;;  %v6694_v18 = vld [vmem:[%s6621_s29 + $0x8] sm:$0xff]  ;;  %v6697_v19 = vld [vmem:[%s6621_s29 + $0x10] sm:$0xff]  ;;  %v5209_v22 = vpack.c.bf16 %v1211_v16, %v1210_v15  ;;  %s6414_s10 = smov [#allocation10]  }
  0x73   : > { %227 = vst [vmem:[#allocation2 + $0x48] sm:$0xff] %v6413_v1  ;;  %228 = vst [vmem:[#allocation2 + $0x50] sm:$0xff] %v6413_v1  ;;  %v6702_v20 = vld [vmem:[%s6621_s29 + $0x18] sm:$0xff]  ;;  %v6705_v21 = vld [vmem:[%s6621_s29 + $0x20] sm:$0xff]  ;;  %p6335_p2 = pnand %p6334_p11, %p8337_p0  ;;  %s6337_s21 = sshll.u32 %s6414_s10, 4  ;;  %s6338_s21 = int_to_ptr.vmem [resolvable:$false] %s6337_s21 }
  0x74   : > { %229 = vst [vmem:[#allocation2 + $0x58] sm:$0xff] %v6413_v1  ;;  %230 = vst [vmem:[#allocation2 + $0x60] sm:$0xff] %v6413_v1  ;;  %5201 = vmatpush1.bf16.msra.mxu0 %v5200_v7  ;;  %v6710_v23 = vld [vmem:[%s6621_s29 + $0x28] sm:$0xff]  ;;  %v1212_v24 = vld [vmem:[#allocation7 + $0x50] sm:$0xff]  ;;  %s6339_s25 = scalar_lea.vmem %s6338_s21, 8192  ;;  %p6340_p5 = scmp.lt.s32.totalorder %s8110_s7, %s6338_s21 }
  0x75   : > { %231 = vst [vmem:[#allocation2 + $0x68] sm:$0xff] %v6413_v1  ;;  %232 = vst [vmem:[#allocation2 + $0x70] sm:$0xff] %v6413_v1  ;;  %5202 = vmatprep.subr.bf16.mxu0 %v8163_v0  ;;  %v1213_v25 = vld [vmem:[#allocation7 + $0x58] sm:$0xff]  ;;  %v6715_v26 = vld [vmem:[%s6621_s29 + $0x30] sm:$0xff]  ;;  %p6336_p3 = pneg %p6335_p2  ;;  %p6341_p9 = scmp.lt.s32.totalorder %s6339_s25, %s6333_s30 }
  0x76   : > { %233 = vst [vmem:[#allocation2 + $0x78] sm:$0xff] %v6413_v1  ;;  %234 = vst [vmem:[#allocation2 + $0x80] sm:$0xff] %v6413_v1  ;;  %v401_v13 = vld [vmem:[#allocation2 + $0x1] sm:$0xff]  ;;  %v6722_v28 = vld [vmem:[%s6621_s29 + $0x40] sm:$0xff]  ;;  %v5212_v31 = vpack.c.bf16 %v1213_v25, %v1212_v24 }
  0x77   : > { %235 = vst [vmem:[#allocation2 + $0x88] sm:$0xff] %v6413_v1  ;;  %236 = vst [vmem:[#allocation2 + $0x90] sm:$0xff] %v6413_v1  ;;  %1417 = vmatprep.mubr.f32.mxu0 %v401_v13  ;;  %v6719_v27 = vld [vmem:[%s6621_s29 + $0x38] sm:$0xff]  ;;  %v6727_v29 = vld [vmem:[%s6621_s29 + $0x48] sm:$0xff]  ;;  %p6342_p12 = por %p6341_p9, %p6340_p5 }
  0x78   : > { %237 = vst [vmem:[#allocation2 + $0x98] sm:$0xff] %v6413_v1  ;;  %238 = vst [vmem:[#allocation2 + $0xa0] sm:$0xff] %v6413_v1  ;;  %5204 = vmatpush1.bf16.msra.mxu0 %v5203_v10  ;;  %v6730_v30 = vld [vmem:[%s6621_s29 + $0x50] sm:$0xff]  ;;  %v6735_v32 = vld [vmem:[%s6621_s29 + $0x58] sm:$0xff] }
  0x79   : > { %239 = vst [vmem:[#allocation2 + $0xa8] sm:$0xff] %v6413_v1  ;;  %240 = vst [vmem:[#allocation2 + $0xb0] sm:$0xff] %v6413_v1  ;;  %5205 = vmatprep.subr.bf16.mxu0 %v8163_v0  ;;  %v1214_v33 = vld [vmem:[#allocation7 + $0x60] sm:$0xff]  ;;  %v1215_v34 = vld [vmem:[#allocation7 + $0x68] sm:$0xff]  ;;  %p6343_p1 = pnand %p6342_p12, %p6336_p3 }
  0x7a   : > { %241 = vst [vmem:[#allocation2 + $0xb8] sm:$0xff] %v6413_v1  ;;  %242 = vst [vmem:[#allocation2 + $0xc0] sm:$0xff] %v6413_v1  ;;  %v6740_v35 = vld [vmem:[%s6621_s29 + $0x60] sm:$0xff]  ;;  %v6744_v36 = vld [vmem:[%s6621_s29 + $0x68] sm:$0xff]  ;;  %v5215_v37 = vpack.c.bf16 %v1215_v34, %v1214_v33 }
  0x7b   : > { %243 = vst [vmem:[#allocation2 + $0xc8] sm:$0xff] %v6413_v1  ;;  %244 = vst [vmem:[#allocation2 + $0xd0] sm:$0xff] %v6413_v1  ;;  %v6748_v38 = vld [vmem:[%s6621_s29 + $0x70] sm:$0xff]  ;;  %v1217_v40 = vld [vmem:[#allocation7 + $0x78] sm:$0xff] }
  0x7c   : > { %245 = vst [vmem:[#allocation2 + $0xd8] sm:$0xff] %v6413_v1  ;;  %246 = vst [vmem:[#allocation2 + $0xe0] sm:$0xff] %v6413_v1  ;;  %5207 = vmatpush1.bf16.msra.mxu0 %v5206_v14  ;;  %v1216_v39 = vld [vmem:[#allocation7 + $0x70] sm:$0xff]  ;;  %v6753_v41 = vld [vmem:[%s6621_s29 + $0x78] sm:$0xff] }
  0x7d   : > { %247 = vst [vmem:[#allocation2 + $0xe8] sm:$0xff] %v6413_v1  ;;  %248 = vst [vmem:[#allocation2 + $0xf0] sm:$0xff] %v6413_v1  ;;  %5208 = vmatprep.subr.bf16.mxu0 %v8163_v0  ;;  %v6757_v42 = vld [vmem:[%s6621_s29 + $0x80] sm:$0xff]  ;;  %v5218_v43 = vpack.c.bf16 %v1217_v40, %v1216_v39  ;;  %v6761_v44 = vld [vmem:[%s6621_s29 + $0x88] sm:$0xff] }
  0x7e   : > { %249 = vst [vmem:[#allocation2 + $0xf8] sm:$0xff] %v6413_v1  ;;  %250 = vst [vmem:[#allocation2 + $0x100] sm:$0xff] %v6413_v1  ;;  %v1218_v45 = vld [vmem:[#allocation7 + $0x80] sm:$0xff]  ;;  %v1219_v46 = vld [vmem:[#allocation7 + $0x88] sm:$0xff] }
  0x7f   : > { %251 = vst [vmem:[#allocation2 + $0x108] sm:$0xff] %v6413_v1  ;;  %252 = vst [vmem:[#allocation2 + $0x110] sm:$0xff] %v6413_v1  ;;  %v6766_v47 = vld [vmem:[%s6621_s29 + $0x90] sm:$0xff]  ;;  %v6770_v48 = vld [vmem:[%s6621_s29 + $0x98] sm:$0xff]  ;;  %v5221_v50 = vpack.c.bf16 %v1219_v46, %v1218_v45 }
  0x80   : > { %253 = vst [vmem:[#allocation2 + $0x118] sm:$0xff] %v6413_v1  ;;  %254 = vst [vmem:[#allocation2 + $0x120] sm:$0xff] %v6413_v1  ;;  %5210 = vmatpush1.bf16.msra.mxu0 %v5209_v22  ;;  %v6773_v49 = vld [vmem:[%s6621_s29 + $0xa0] sm:$0xff]  ;;  %v6778_v51 = vld [vmem:[%s6621_s29 + $0xa8] sm:$0xff] }
  0x81   : > { %255 = vst [vmem:[#allocation2 + $0x128] sm:$0xff] %v6413_v1  ;;  %256 = vst [vmem:[#allocation2 + $0x130] sm:$0xff] %v6413_v1  ;;  %5211 = vmatprep.subr.bf16.mxu0 %v8163_v0  ;;  %v6781_v52 = vld [vmem:[%s6621_s29 + $0xb0] sm:$0xff]  ;;  %v1221_v54 = vld [vmem:[#allocation7 + $0x98] sm:$0xff] }
  0x82   : > { %257 = vst [vmem:[#allocation2 + $0x138] sm:$0xff] %v6413_v1  ;;  %258 = vst [vmem:[#allocation2 + $0x140] sm:$0xff] %v6413_v1  ;;  %v1220_v53 = vld [vmem:[#allocation7 + $0x90] sm:$0xff]  ;;  %v6787_v55 = vld [vmem:[%s6621_s29 + $0xb8] sm:$0xff] }
  0x83   : > { %259 = vst [vmem:[#allocation2 + $0x148] sm:$0xff] %v6413_v1  ;;  %260 = vst [vmem:[#allocation2 + $0x150] sm:$0xff] %v6413_v1  ;;  %v6791_v56 = vld [vmem:[%s6621_s29 + $0xc0] sm:$0xff]  ;;  %v5224_v57 = vpack.c.bf16 %v1221_v54, %v1220_v53  ;;  %v1223_v59 = vld [vmem:[#allocation7 + $0xa8] sm:$0xff] }
  0x84   : > { %261 = vst [vmem:[#allocation2 + $0x158] sm:$0xff] %v6413_v1  ;;  %262 = vst [vmem:[#allocation2 + $0x160] sm:$0xff] %v6413_v1  ;;  %5213 = vmatpush1.bf16.msra.mxu0 %v5212_v31  ;;  %v1222_v58 = vld [vmem:[#allocation7 + $0xa0] sm:$0xff]  ;;  %v6796_v60 = vld [vmem:[%s6621_s29 + $0xc8] sm:$0xff] }
  0x85   : > { %263 = vst [vmem:[#allocation2 + $0x168] sm:$0xff] %v6413_v1  ;;  %264 = vst [vmem:[#allocation2 + $0x170] sm:$0xff] %v6413_v1  ;;  %5214 = vmatprep.subr.bf16.mxu0 %v8163_v0  ;;  %v5227_v61 = vpack.c.bf16 %v1223_v59, %v1222_v58  ;;  %v1224_v62 = vld [vmem:[#allocation7 + $0xb0] sm:$0xff]  ;;  %v1225_v63 = vld [vmem:[#allocation7 + $0xb8] sm:$0xff] }
  0x86   : > { %265 = vst [vmem:[#allocation2 + $0x178] sm:$0xff] %v6413_v1  ;;  %266 = vst [vmem:[#allocation2 + $0x180] sm:$0xff] %v6413_v1  ;;  %v6801_v2 = vld [vmem:[%s6621_s29 + $0xd0] sm:$0xff]  ;;  %v5230_v3 = vpack.c.bf16 %v1225_v63, %v1224_v62  ;;  %v1226_v4 = vld [vmem:[#allocation7 + $0xc0] sm:$0xff] }
  0x87   : > { %267 = vst [vmem:[#allocation2 + $0x188] sm:$0xff] %v6413_v1  ;;  %268 = vst [vmem:[#allocation2 + $0x190] sm:$0xff] %v6413_v1  ;;  %v1227_v5 = vld [vmem:[#allocation7 + $0xc8] sm:$0xff]  ;;  %v6806_v6 = vld [vmem:[%s6621_s29 + $0xd8] sm:$0xff] }
  0x88   : > { %269 = vst [vmem:[#allocation2 + $0x198] sm:$0xff] %v6413_v1  ;;  %270 = vst [vmem:[#allocation2 + $0x1a0] sm:$0xff] %v6413_v1  ;;  %5216 = vmatpush1.bf16.msra.mxu0 %v5215_v37  ;;  %v5233_v7 = vpack.c.bf16 %v1227_v5, %v1226_v4  ;;  %v1228_v8 = vld [vmem:[#allocation7 + $0xd0] sm:$0xff]  ;;  %v1229_v9 = vld [vmem:[#allocation7 + $0xd8] sm:$0xff] }
  0x89   : > { %271 = vst [vmem:[#allocation2 + $0x1a8] sm:$0xff] %v6413_v1  ;;  %305 = vst [vmem:[#allocation2 + $0x19] sm:$0xff] %v6690_v17  ;;  %5217 = vmatprep.subr.bf16.mxu0 %v8163_v0  ;;  %v6811_v10 = vld [vmem:[%s6621_s29 + $0xe0] sm:$0xff]  ;;  %v5236_v11 = vpack.c.bf16 %v1229_v9, %v1228_v8  ;;  %v1231_v13 = vld [vmem:[#allocation7 + $0xe8] sm:$0xff] }
  0x8a   : > { %306 = vst [vmem:[#allocation2 + $0x21] sm:$0xff] %v6694_v18  ;;  %307 = vst [vmem:[#allocation2 + $0x31] sm:$0xff] %v6697_v19  ;;  %v1230_v12 = vld [vmem:[#allocation7 + $0xe0] sm:$0xff]  ;;  %v6816_v14 = vld [vmem:[%s6621_s29 + $0xe8] sm:$0xff] }
  0x8b   : > { %308 = vst [vmem:[#allocation2 + $0x39] sm:$0xff] %v6702_v20  ;;  %309 = vst [vmem:[#allocation2 + $0x49] sm:$0xff] %v6705_v21  ;;  %v5239_v15 = vpack.c.bf16 %v1231_v13, %v1230_v12  ;;  %v1232_v16 = vld [vmem:[#allocation7 + $0xf0] sm:$0xff]  ;;  %v1233_v22 = vld [vmem:[#allocation7 + $0xf8] sm:$0xff] }
  0x8c   : > { %310 = vst [vmem:[#allocation2 + $0x51] sm:$0xff] %v6710_v23  ;;  %311 = vst [vmem:[#allocation2 + $0x61] sm:$0xff] %v6715_v26  ;;  %5219 = vmatpush1.bf16.msra.mxu0 %v5218_v43  ;;  %v5242_v24 = vpack.c.bf16 %v1233_v22, %v1232_v16  ;;  %v1234_v25 = vld [vmem:[#allocation7 + $0x100] sm:$0xff]  ;;  %v1235_v31 = vld [vmem:[#allocation7 + $0x108] sm:$0xff] }
  0x8d   : > { %312 = vst [vmem:[#allocation2 + $0x69] sm:$0xff] %v6719_v27  ;;  %313 = vst [vmem:[#allocation2 + $0x79] sm:$0xff] %v6722_v28  ;;  %5220 = vmatprep.subr.bf16.mxu0 %v8163_v0  ;;  %v5245_v33 = vpack.c.bf16 %v1235_v31, %v1234_v25  ;;  %v402_v34 = vld [vmem:[#allocation2 + $0x9] sm:$0xff]  ;;  %v1236_v37 = vld [vmem:[#allocation7 + $0x110] sm:$0xff] }
  0x8e   : > { %314 = vst [vmem:[#allocation2 + $0x81] sm:$0xff] %v6727_v29  ;;  %315 = vst [vmem:[#allocation2 + $0x91] sm:$0xff] %v6730_v30  ;;  %v1237_v39 = vld [vmem:[#allocation7 + $0x118] sm:$0xff]  ;;  %v1238_v43 = vld [vmem:[#allocation7 + $0x120] sm:$0xff] }
  0x8f   : > { %316 = vst [vmem:[#allocation2 + $0x99] sm:$0xff] %v6735_v32  ;;  %317 = vst [vmem:[#allocation2 + $0xa9] sm:$0xff] %v6740_v35  ;;  %v5248_v40 = vpack.c.bf16 %v1237_v39, %v1236_v37  ;;  %v1239_v45 = vld [vmem:[#allocation7 + $0x128] sm:$0xff]  ;;  %v1240_v53 = vld [vmem:[#allocation7 + $0x130] sm:$0xff] }
  0x90   : > { %318 = vst [vmem:[#allocation2 + $0xb1] sm:$0xff] %v6744_v36  ;;  %319 = vst [vmem:[#allocation2 + $0xc1] sm:$0xff] %v6748_v38  ;;  %5222 = vmatpush1.bf16.msra.mxu0 %v5221_v50  ;;  %v6826_v46 = vld [vmem:[#allocation2 + $0x18] sm:$0xff]  ;;  %v5251_v50 = vpack.c.bf16 %v1239_v45, %v1238_v43  ;;  %v1241_v54 = vld [vmem:[#allocation7 + $0x138] sm:$0xff] }
  0x91   : > { %320 = vst [vmem:[#allocation2 + $0xc9] sm:$0xff] %v6753_v41  ;;  %321 = vst [vmem:[#allocation2 + $0xd9] sm:$0xff] %v6757_v42  ;;  %5223 = vmatprep.subr.bf16.mxu0 %v8163_v0  ;;  %v5254_v58 = vpack.c.bf16 %v1241_v54, %v1240_v53  ;;  %v6836_v59 = vld [vmem:[#allocation2 + $0x30] sm:$0xff]  ;;  %v1245_v63 = vld [vmem:[#allocation7 + $0x158] sm:$0xff] }
  0x92   : > { %322 = vst [vmem:[#allocation2 + $0xe1] sm:$0xff] %v6761_v44  ;;  %323 = vst [vmem:[#allocation2 + $0xf1] sm:$0xff] %v6766_v47  ;;  %v6838_v62 = vld [vmem:[#allocation2 + $0x32] sm:$0xff]  ;;  %v1248_v9 = vld [vmem:[#allocation7 + $0x170] sm:$0xff] }
  0x93   : > { %324 = vst [vmem:[#allocation2 + $0xf9] sm:$0xff] %v6770_v48  ;;  %325 = vst [vmem:[#allocation2 + $0x109] sm:$0xff] %v6773_v49  ;;  %5068 = vmatprep.mubr.f32.mxu1 %v6838_v62  ;;  %v1246_v4 = vld [vmem:[#allocation7 + $0x160] sm:$0xff]  ;;  %v1247_v5 = vld [vmem:[#allocation7 + $0x168] sm:$0xff] }
  0x94   : > { %326 = vst [vmem:[#allocation2 + $0x111] sm:$0xff] %v6778_v51  ;;  %327 = vst [vmem:[#allocation2 + $0x121] sm:$0xff] %v6781_v52  ;;  %5225 = vmatpush1.bf16.msra.mxu0 %v5224_v57  ;;  %v6831_v57 = vld [vmem:[#allocation2 + $0x20] sm:$0xff]  ;;  %v5263_v8 = vpack.c.bf16 %v1247_v5, %v1246_v4  ;;  %v1250_v13 = vld [vmem:[#allocation7 + $0x180] sm:$0xff] }
  0x95   : > { %328 = vst [vmem:[#allocation2 + $0x129] sm:$0xff] %v6787_v55  ;;  %329 = vst [vmem:[#allocation2 + $0x139] sm:$0xff] %v6791_v56  ;;  %5226 = vmatprep.subr.bf16.mxu0 %v8163_v0  ;;  %v1252_v22 = vld [vmem:[#allocation7 + $0x190] sm:$0xff]  ;;  %v1254_v31 = vld [vmem:[#allocation7 + $0x1a0] sm:$0xff] }
  0x96   : > { %330 = vst [vmem:[#allocation2 + $0x141] sm:$0xff] %v6796_v60  ;;  %331 = vst [vmem:[#allocation2 + $0x151] sm:$0xff] %v6801_v2  ;;  %v1256_v37 = vld [vmem:[#allocation7 + $0x1b0] sm:$0xff]  ;;  %v1258_v43 = vld [vmem:[#allocation7 + $0x1c0] sm:$0xff] }
  0x97   : > { %332 = vst [vmem:[#allocation2 + $0x159] sm:$0xff] %v6806_v6  ;;  %333 = vst [vmem:[#allocation2 + $0x169] sm:$0xff] %v6811_v10  ;;  %v6874_v39 = vld [vmem:[#allocation2 + $0x80] sm:$0xff]  ;;  %v6879_v45 = vld [vmem:[#allocation2 + $0x90] sm:$0xff] }
  0x98   : > { %5228 = vmatpush1.bf16.msra.mxu0 %v5227_v61  ;;  %334 = vst [vmem:[#allocation2 + $0x171] sm:$0xff] %v6816_v14  ;;  %v1260_v53 = vld [vmem:[#allocation7 + $0x1d0] sm:$0xff]  ;;  %v6884_v54 = vld [vmem:[#allocation2 + $0x98] sm:$0xff] }
  0x99   : > { %5229 = vmatprep.subr.bf16.mxu0 %v8163_v0  ;;  %v6908_v4 = vld [vmem:[#allocation2 + $0xd8] sm:$0xff]  ;;  %v6916_v5 = vld [vmem:[#allocation2 + $0xf0] sm:$0xff] }
  0x9c   : > { %5231 = vmatpush1.bf16.msra.mxu0 %v5230_v3  ;;  %v6844_v3 = vld [vmem:[#allocation2 + $0x38] sm:$0xff] }
  0x9d   : > { %5232 = vmatprep.subr.bf16.mxu0 %v8163_v0 }
  0xa0   : > { %5234 = vmatpush1.bf16.msra.mxu0 %v5233_v7  ;;  %v6849_v7 = vld [vmem:[#allocation2 + $0x48] sm:$0xff] }
  0xa1   : > { %5235 = vmatprep.subr.bf16.mxu0 %v8163_v0 }
  0xa4   : > { %5237 = vmatpush1.bf16.msra.mxu0 %v5236_v11  ;;  %v6854_v11 = vld [vmem:[#allocation2 + $0x50] sm:$0xff] }
  0xa5   : > { %5238 = vmatprep.subr.bf16.mxu0 %v8163_v0 }
  0xa8   : > { %5240 = vmatpush1.bf16.msra.mxu0 %v5239_v15  ;;  %v6859_v15 = vld [vmem:[#allocation2 + $0x60] sm:$0xff] }
  0xa9   : > { %5241 = vmatprep.subr.bf16.mxu0 %v8163_v0 }
  0xac   : > { %5243 = vmatpush1.bf16.msra.mxu0 %v5242_v24  ;;  %v6864_v24 = vld [vmem:[#allocation2 + $0x68] sm:$0xff] }
  0xad   : > { %5244 = vmatprep.subr.bf16.mxu0 %v8163_v0 }
  0xaf   : > { %1418 = vmatmul.mubr.f32.vlgmr.msra.gmra.mrb[0].mxu0 %v6413_v1 }
  0xb0   : > { %5246 = vmatpush1.bf16.msra.mxu0 %v5245_v33  ;;  %1422 = vmatprep.mubr.f32.mxu0 %v402_v34  ;;  %v6869_v33 = vld [vmem:[#allocation2 + $0x78] sm:$0xff] }
  0xb1   : > { %5247 = vmatprep.subr.bf16.mxu0 %v8163_v0 }
  0xb3   : > { %1423 = vmatmul.mubr.f32.gmra.mrb[2].mxu0 %v6413_v1  ;;  %v1242_v1 = vld [vmem:[#allocation7 + $0x140] sm:$0xff] }
  0xb4   : > { %1427 = vmatprep.mubr.f32.mxu0 %v6690_v17  ;;  %5249 = vmatpush1.bf16.msra.mxu0 %v5248_v40  ;;  %v1243_v17 = vld [vmem:[#allocation7 + $0x148] sm:$0xff] }
  0xb5   : > { %5250 = vmatprep.subr.bf16.mxu0 %v8163_v0  ;;  %v5257_v61 = vpack.c.bf16 %v1243_v17, %v1242_v1  ;;  %v1262_v1 = vld [vmem:[#allocation7 + $0x1e0] sm:$0xff]  ;;  %v6889_v17 = vld [vmem:[#allocation2 + $0xa8] sm:$0xff] }
  0xb7   : > { %1428 = vmatmul.mubr.f32.gmra.mrb[4].mxu0 %v6826_v46 }
  0xb8   : > { %1432 = vmatprep.mubr.f32.mxu0 %v6694_v18  ;;  %5252 = vmatpush1.bf16.msra.mxu0 %v5251_v50  ;;  %v1244_v18 = vld [vmem:[#allocation7 + $0x150] sm:$0xff] }
  0xb9   : > { %5253 = vmatprep.subr.bf16.mxu0 %v8163_v0 }
  0xbb   : > { %1433 = vmatmul.mubr.f32.gmra.mrb[6].mxu0 %v6831_v57 }
  0xbc   : > { %1437 = vmatprep.mubr.f32.mxu0 %v6697_v19  ;;  %5255 = vmatpush1.bf16.msra.mxu0 %v5254_v58  ;;  %v5260_v19 = vpack.c.bf16 %v1245_v63, %v1244_v18  ;;  %v1264_v18 = vld [vmem:[#allocation7 + $0x1f0] sm:$0xff]  ;;  %v6894_v63 = vld [vmem:[#allocation2 + $0xb0] sm:$0xff] }
  0xbd   : > { %5256 = vmatprep.subr.bf16.mxu0 %v8163_v0 }
  0xbf   : > { %1438 = vmatmul.mubr.f32.gmra.mrb[8].mxu0 %v6836_v59 }
  0xc0   : > { %1442 = vmatprep.mubr.f32.mxu0 %v6702_v20  ;;  %5258 = vmatpush1.bf16.msra.mxu0 %v5257_v61  ;;  %v1249_v20 = vld [vmem:[#allocation7 + $0x178] sm:$0xff] }
  0xc1   : > { %5259 = vmatprep.subr.bf16.mxu0 %v8163_v0  ;;  %v5266_v12 = vpack.c.bf16 %v1249_v20, %v1248_v9  ;;  %v1266_v9 = vld [vmem:[#allocation7 + $0x200] sm:$0xff]  ;;  %v465_v20 = vld [vmem:[#allocation2 + $0x2] sm:$0xff] }
  0xc3   : > { %1443 = vmatmul.mubr.f32.gmra.mrb[10].mxu0 %v6844_v3 }
  0xc4   : > { %1447 = vmatprep.mubr.f32.mxu0 %v6705_v21  ;;  %5261 = vmatpush1.bf16.msra.mxu0 %v5260_v19  ;;  %v1251_v21 = vld [vmem:[#allocation7 + $0x188] sm:$0xff] }
  0xc5   : > { %5262 = vmatprep.subr.bf16.mxu0 %v8163_v0  ;;  %v5269_v16 = vpack.c.bf16 %v1251_v21, %v1250_v13  ;;  %v1268_v13 = vld [vmem:[#allocation7 + $0x210] sm:$0xff]  ;;  %v1269_v21 = vld [vmem:[#allocation7 + $0x218] sm:$0xff] }
  0xc7   : > { %1448 = vmatmul.mubr.f32.gmra.mrb[12].mxu0 %v6849_v7 }
  0xc8   : > { %1452 = vmatprep.mubr.f32.mxu0 %v6710_v23  ;;  %5264 = vmatpush1.bf16.msra.mxu0 %v5263_v8  ;;  %v1253_v23 = vld [vmem:[#allocation7 + $0x198] sm:$0xff] }
  0xc9   : > { %5265 = vmatprep.subr.bf16.mxu0 %v8163_v0  ;;  %v5272_v25 = vpack.c.bf16 %v1253_v23, %v1252_v22  ;;  %v6959_v8 = vld [vmem:[%s6621_s29 + $0xf8] sm:$0xff]  ;;  %v1271_v22 = vld [vmem:[#allocation7 + $0x228] sm:$0xff] }
  0xca   : > { %336 = vst [vmem:[#allocation2 + $0x189] sm:$0xff] %v6959_v8  ;;  %v6975_v23 = vld [vmem:[#allocation2 + $0x1a] sm:$0xff] }
  0xcb   : > { %1453 = vmatmul.mubr.f32.gmra.mrb[14].mxu0 %v6854_v11 }
  0xcc   : > { %1457 = vmatprep.mubr.f32.mxu0 %v6715_v26  ;;  %5267 = vmatpush1.bf16.msra.mxu0 %v5266_v12  ;;  %v1255_v26 = vld [vmem:[#allocation7 + $0x1a8] sm:$0xff] }
  0xcd   : > { %5268 = vmatprep.subr.bf16.mxu0 %v8163_v0  ;;  %v5275_v34 = vpack.c.bf16 %v1255_v26, %v1254_v31  ;;  %v1273_v31 = vld [vmem:[#allocation7 + $0x238] sm:$0xff] }
  0xcf   : > { %1458 = vmatmul.mubr.f32.gmra.mrb[16].mxu0 %v6859_v15 }
  0xd0   : > { %1462 = vmatprep.mubr.f32.mxu0 %v6719_v27  ;;  %5270 = vmatpush1.bf16.msra.mxu0 %v5269_v16  ;;  %v1257_v27 = vld [vmem:[#allocation7 + $0x1b8] sm:$0xff]  ;;  %v5296_v16 = vpack.c.bf16 %v1269_v21, %v1268_v13  ;;  %v1288_v13 = vld [vmem:[#allocation7 + $0x2b0] sm:$0xff] }
  0xd1   : > { %5271 = vmatprep.subr.bf16.mxu0 %v8163_v0  ;;  %v5278_v40 = vpack.c.bf16 %v1257_v27, %v1256_v37  ;;  %v1276_v27 = vld [vmem:[#allocation7 + $0x250] sm:$0xff] }
  0xd2   : > { %v7018_v21 = vld [vmem:[#allocation2 + $0x82] sm:$0xff] }
  0xd3   : > { %1463 = vmatmul.mubr.f32.gmra.mrb[18].mxu0 %v6864_v24 }
  0xd4   : > { %1467 = vmatprep.mubr.f32.mxu0 %v6722_v28  ;;  %5273 = vmatpush1.bf16.msra.mxu0 %v5272_v25  ;;  %v1259_v28 = vld [vmem:[#allocation7 + $0x1c8] sm:$0xff]  ;;  %v1272_v25 = vld [vmem:[#allocation7 + $0x230] sm:$0xff] }
  0xd5   : > { %5274 = vmatprep.subr.bf16.mxu0 %v8163_v0  ;;  %v5281_v50 = vpack.c.bf16 %v1259_v28, %v1258_v43  ;;  %v5302_v26 = vpack.c.bf16 %v1273_v31, %v1272_v25  ;;  %v1278_v28 = vld [vmem:[#allocation7 + $0x260] sm:$0xff]  ;;  %v7028_v25 = vld [vmem:[#allocation2 + $0x9a] sm:$0xff] }
  0xd7   : > { %1468 = vmatmul.mubr.f32.gmra.mrb[20].mxu0 %v6869_v33 }
  0xd8   : > { %1472 = vmatprep.mubr.f32.mxu0 %v6727_v29  ;;  %5276 = vmatpush1.bf16.msra.mxu0 %v5275_v34  ;;  %v1261_v29 = vld [vmem:[#allocation7 + $0x1d8] sm:$0xff]  ;;  %v1274_v34 = vld [vmem:[#allocation7 + $0x240] sm:$0xff] }
  0xd9   : > { %5277 = vmatprep.subr.bf16.mxu0 %v8163_v0  ;;  %v5284_v58 = vpack.c.bf16 %v1261_v29, %v1260_v53  ;;  %v1280_v29 = vld [vmem:[#allocation7 + $0x270] sm:$0xff] }
  0xdb   : > { %1473 = vmatmul.mubr.f32.gmra.mrb[22].mxu0 %v6874_v39 }
  0xdc   : > { %1477 = vmatprep.mubr.f32.mxu0 %v6730_v30  ;;  %5279 = vmatpush1.bf16.msra.mxu0 %v5278_v40  ;;  %v1263_v30 = vld [vmem:[#allocation7 + $0x1e8] sm:$0xff]  ;;  %v1277_v40 = vld [vmem:[#allocation7 + $0x258] sm:$0xff] }
  0xdd   : > { %5280 = vmatprep.subr.bf16.mxu0 %v8163_v0  ;;  %v5287_v61 = vpack.c.bf16 %v1263_v30, %v1262_v1  ;;  %v5308_v43 = vpack.c.bf16 %v1277_v40, %v1276_v27  ;;  %v1282_v30 = vld [vmem:[#allocation7 + $0x280] sm:$0xff] }
  0xde   : > { %v7038_v27 = vld [vmem:[#allocation2 + $0xb2] sm:$0xff] }
  0xdf   : > { %1478 = vmatmul.mubr.f32.gmra.mrb[24].mxu0 %v6879_v45 }
  0xe0   : > { %1482 = vmatprep.mubr.f32.mxu0 %v6735_v32  ;;  %5282 = vmatpush1.bf16.msra.mxu0 %v5281_v50  ;;  %v1265_v32 = vld [vmem:[#allocation7 + $0x1f8] sm:$0xff]  ;;  %v1279_v50 = vld [vmem:[#allocation7 + $0x268] sm:$0xff] }
  0xe1   : > { %5283 = vmatprep.subr.bf16.mxu0 %v8163_v0  ;;  %v5290_v19 = vpack.c.bf16 %v1265_v32, %v1264_v18  ;;  %v5311_v53 = vpack.c.bf16 %v1279_v50, %v1278_v28  ;;  %v1284_v32 = vld [vmem:[#allocation7 + $0x290] sm:$0xff]  ;;  %v7060_v28 = vld [vmem:[#allocation2 + $0xf2] sm:$0xff] }
  0xe2   : > { %v1331_v50 = vld [vmem:[#allocation7 + $0x408] sm:$0xff] }
  0xe3   : > { %1483 = vmatmul.mubr.f32.gmra.mrb[26].mxu0 %v6884_v54 }
  0xe4   : > { %1487 = vmatprep.mubr.f32.mxu0 %v6740_v35  ;;  %5285 = vmatpush1.bf16.msra.mxu0 %v5284_v58  ;;  %v6899_v35 = vld [vmem:[#allocation2 + $0xc0] sm:$0xff]  ;;  %v6998_v58 = vld [vmem:[#allocation2 + $0x52] sm:$0xff] }
  0xe5   : > { %5286 = vmatprep.subr.bf16.mxu0 %v8163_v0 }
  0xe7   : > { %1488 = vmatmul.mubr.f32.gmra.mrb[28].mxu0 %v6889_v17 }
  0xe8   : > { %1492 = vmatprep.mubr.f32.mxu0 %v6744_v36  ;;  %5288 = vmatpush1.bf16.msra.mxu0 %v5287_v61  ;;  %v6904_v36 = vld [vmem:[#allocation2 + $0xc8] sm:$0xff] }
  0xe9   : > { %5289 = vmatprep.subr.bf16.mxu0 %v8163_v0  ;;  %v7003_v61 = vld [vmem:[#allocation2 + $0x62] sm:$0xff] }
  0xeb   : > { %1493 = vmatmul.mubr.f32.gmra.mrb[30].mxu0 %v6894_v63 }
  0xec   : > { %1497 = vmatprep.mubr.f32.mxu0 %v6748_v38  ;;  %5291 = vmatpush1.bf16.msra.mxu0 %v5290_v19  ;;  %v6912_v38 = vld [vmem:[#allocation2 + $0xe0] sm:$0xff]  ;;  %v7008_v19 = vld [vmem:[#allocation2 + $0x6a] sm:$0xff] }
  0xed   : > { %5292 = vmatprep.subr.bf16.mxu0 %v8163_v0 }
  0xef   : > { %1498 = vmatmul.mubr.f32.gmra.mrb[32].mxu0 %v6899_v35 }
  0xf0   : > { %1502 = vmatprep.mubr.f32.mxu0 %v6753_v41  ;;  %v6920_v41 = vld [vmem:[#allocation2 + $0xf8] sm:$0xff] }
  0xf3   : > { %1503 = vmatmul.mubr.f32.gmra.mrb[34].mxu0 %v6904_v36 }
  0xf4   : > { %1507 = vmatprep.mubr.f32.mxu0 %v6757_v42  ;;  %v6924_v42 = vld [vmem:[#allocation2 + $0x108] sm:$0xff] }
  0xf7   : > { %1508 = vmatmul.mubr.f32.gmra.mrb[36].mxu0 %v6908_v4 }
  0xf8   : > { %1512 = vmatprep.mubr.f32.mxu0 %v6761_v44  ;;  %v6928_v44 = vld [vmem:[#allocation2 + $0x110] sm:$0xff] }
  0xfb   : > { %1513 = vmatmul.mubr.f32.gmra.mrb[38].mxu0 %v6912_v38 }
  0xfc   : > { %1517 = vmatprep.mubr.f32.mxu0 %v6766_v47  ;;  %v6932_v47 = vld [vmem:[#allocation2 + $0x120] sm:$0xff] }
  0xff   : > { %1518 = vmatmul.mubr.f32.gmra.mrb[40].mxu0 %v6916_v5 }
 0x100   : > { %1522 = vmatprep.mubr.f32.mxu0 %v6770_v48  ;;  %v6936_v48 = vld [vmem:[#allocation2 + $0x128] sm:$0xff] }
 0x103   : > { %1523 = vmatmul.mubr.f32.gmra.mrb[42].mxu0 %v6920_v41 }
 0x104   : > { %1527 = vmatprep.mubr.f32.mxu0 %v6773_v49  ;;  %v6940_v49 = vld [vmem:[#allocation2 + $0x138] sm:$0xff] }
 0x107   : > { %1528 = vmatmul.mubr.f32.gmra.mrb[44].mxu0 %v6924_v42 }
 0x108   : > { %1532 = vmatprep.mubr.f32.mxu0 %v6778_v51  ;;  %v6944_v51 = vld [vmem:[#allocation2 + $0x140] sm:$0xff] }
 0x10b   : > { %1533 = vmatmul.mubr.f32.gmra.mrb[46].mxu0 %v6928_v44 }
 0x10c   : > { %1537 = vmatprep.mubr.f32.mxu0 %v6781_v52  ;;  %v6948_v52 = vld [vmem:[#allocation2 + $0x150] sm:$0xff] }
 0x10f   : > { %1538 = vmatmul.mubr.f32.gmra.mrb[48].mxu0 %v6932_v47 }
 0x110   : > { %1542 = vmatprep.mubr.f32.mxu0 %v6787_v55  ;;  %v6951_v55 = vld [vmem:[%s6621_s29 + $0xf0] sm:$0xff] }
 0x111   : > { %335 = vst [vmem:[#allocation2 + $0x181] sm:$0xff] %v6951_v55 }
 0x113   : > { %1543 = vmatmul.mubr.f32.gmra.mrb[50].mxu0 %v6936_v48 }
 0x114   : > { %1547 = vmatprep.mubr.f32.mxu0 %v6791_v56  ;;  %v6956_v56 = vld [vmem:[#allocation2 + $0x158] sm:$0xff] }
 0x117   : > { %1548 = vmatmul.mubr.f32.gmra.mrb[52].mxu0 %v6940_v49 }
 0x118   : > { %1552 = vmatprep.mubr.f32.mxu0 %v6796_v60  ;;  %v6964_v60 = vld [vmem:[#allocation2 + $0x168] sm:$0xff] }
 0x11b   : > { %1553 = vmatmul.mubr.f32.gmra.mrb[54].mxu0 %v6944_v51 }
 0x11c   : > { %1557 = vmatprep.mubr.f32.mxu0 %v6801_v2  ;;  %v6968_v2 = vld [vmem:[#allocation2 + $0x170] sm:$0xff] }
 0x11f   : > { %1558 = vmatmul.mubr.f32.gmra.mrb[56].mxu0 %v6948_v52 }
 0x120   : > { %1562 = vmatprep.mubr.f32.mxu0 %v6806_v6  ;;  %v1267_v6 = vld [vmem:[#allocation7 + $0x208] sm:$0xff] }
 0x121   : > { %v5293_v12 = vpack.c.bf16 %v1267_v6, %v1266_v9  ;;  %v1286_v6 = vld [vmem:[#allocation7 + $0x2a0] sm:$0xff] }
 0x123   : > { %1563 = vmatmul.mubr.f32.gmra.mrb[58].mxu0 %v6956_v56 }
 0x124   : > { %1567 = vmatprep.mubr.f32.mxu0 %v6811_v10  ;;  %v466_v10 = vld [vmem:[#allocation2 + $0xa] sm:$0xff] }
 0x127   : > { %1568 = vmatmul.mubr.f32.gmra.mrb[60].mxu0 %v6964_v60 }
 0x128   : > { %1572 = vmatprep.mubr.f32.mxu0 %v6816_v14  ;;  %v1270_v14 = vld [vmem:[#allocation7 + $0x220] sm:$0xff] }
 0x12b   : > { %1573 = vmatmul.mubr.f32.gmra.mrb[62].mxu0 %v6968_v2 }
 0x12c   : > { %1642 = vmatprep.mubr.f32.mxu0 %v6826_v46  ;;  %v5299_v46 = vpack.c.bf16 %v1271_v22, %v1270_v14  ;;  %v7023_v14 = vld [vmem:[#allocation2 + $0x92] sm:$0xff] }
 0x12f   : > { %1643 = vmatmul.mubr.f32.vlgmr.msra.gmra.mrb[0].mxu0 %v465_v20  ;;  %v7013_v20 = vld [vmem:[#allocation2 + $0x7a] sm:$0xff] }
 0x130   : > { %5294 = vmatpush1.bf16.msra.mxu0 %v5293_v12  ;;  %1647 = vmatprep.mubr.f32.mxu0 %v6831_v57  ;;  %v6980_v57 = vld [vmem:[#allocation2 + $0x22] sm:$0xff] }
 0x131   : > { %5295 = vmatprep.subr.bf16.mxu0 %v8163_v0 }
 0x133   : > { %1648 = vmatmul.mubr.f32.gmra.mrb[2].mxu0 %v466_v10 }
 0x134   : > { %1652 = vmatprep.mubr.f32.mxu0 %v6836_v59  ;;  %5297 = vmatpush1.bf16.msra.mxu0 %v5296_v16  ;;  %v1275_v59 = vld [vmem:[#allocation7 + $0x248] sm:$0xff]  ;;  %v1290_v16 = vld [vmem:[#allocation7 + $0x2c0] sm:$0xff] }
 0x135   : > { %5298 = vmatprep.subr.bf16.mxu0 %v8163_v0  ;;  %v5305_v37 = vpack.c.bf16 %v1275_v59, %v1274_v34  ;;  %v7033_v34 = vld [vmem:[#allocation2 + $0xaa] sm:$0xff] }
 0x137   : > { %1653 = vmatmul.mubr.f32.gmra.mrb[4].mxu0 %v6975_v23 }
 0x138   : > { %1657 = vmatprep.mubr.f32.mxu0 %v6844_v3  ;;  %5300 = vmatpush1.bf16.msra.mxu0 %v5299_v46  ;;  %v6988_v3 = vld [vmem:[#allocation2 + $0x3a] sm:$0xff] }
 0x139   : > { %5301 = vmatprep.subr.bf16.mxu0 %v8163_v0  ;;  %v1292_v46 = vld [vmem:[#allocation7 + $0x2d0] sm:$0xff] }
 0x13b   : > { %1658 = vmatmul.mubr.f32.gmra.mrb[6].mxu0 %v6980_v57 }
 0x13c   : > { %1662 = vmatprep.mubr.f32.mxu0 %v6849_v7  ;;  %5303 = vmatpush1.bf16.msra.mxu0 %v5302_v26  ;;  %v6993_v7 = vld [vmem:[#allocation2 + $0x4a] sm:$0xff] }
 0x13d   : > { %5304 = vmatprep.subr.bf16.mxu0 %v8163_v0  ;;  %v1294_v26 = vld [vmem:[#allocation7 + $0x2e0] sm:$0xff] }
 0x13f   : > { %1663 = vmatmul.mubr.f32.gmra.mrb[8].mxu0 %v6838_v62 }
 0x140   : > { %1667 = vmatprep.mubr.f32.mxu0 %v6854_v11  ;;  %5306 = vmatpush1.bf16.msra.mxu0 %v5305_v37  ;;  %v1281_v11 = vld [vmem:[#allocation7 + $0x278] sm:$0xff]  ;;  %v1296_v37 = vld [vmem:[#allocation7 + $0x2f0] sm:$0xff] }
 0x141   : > { %5307 = vmatprep.subr.bf16.mxu0 %v8163_v0  ;;  %v5314_v1 = vpack.c.bf16 %v1281_v11, %v1280_v29  ;;  %v1333_v29 = vld [vmem:[#allocation7 + $0x418] sm:$0xff] }
 0x143   : > { %1668 = vmatmul.mubr.f32.gmra.mrb[10].mxu0 %v6988_v3 }
 0x144   : > { %1672 = vmatprep.mubr.f32.mxu0 %v6859_v15  ;;  %5309 = vmatpush1.bf16.msra.mxu0 %v5308_v43  ;;  %v1283_v15 = vld [vmem:[#allocation7 + $0x288] sm:$0xff] }
 0x145   : > { %5310 = vmatprep.subr.bf16.mxu0 %v8163_v0  ;;  %v5317_v18 = vpack.c.bf16 %v1283_v15, %v1282_v30  ;;  %v7052_v43 = vld [vmem:[#allocation2 + $0xda] sm:$0xff] }
 0x146   : > { %v1335_v30 = vld [vmem:[#allocation7 + $0x428] sm:$0xff] }
 0x147   : > { %1673 = vmatmul.mubr.f32.gmra.mrb[12].mxu0 %v6993_v7 }
 0x148   : > { %1677 = vmatprep.mubr.f32.mxu0 %v6864_v24  ;;  %5312 = vmatpush1.bf16.msra.mxu0 %v5311_v53  ;;  %v1285_v24 = vld [vmem:[#allocation7 + $0x298] sm:$0xff] }
 0x149   : > { %5313 = vmatprep.subr.bf16.mxu0 %v8163_v0  ;;  %v5320_v9 = vpack.c.bf16 %v1285_v24, %v1284_v32  ;;  %v1337_v32 = vld [vmem:[#allocation7 + $0x438] sm:$0xff] }
 0x14b   : > { %1678 = vmatmul.mubr.f32.gmra.mrb[14].mxu0 %v6998_v58 }
 0x14c   : > { %1682 = vmatprep.mubr.f32.mxu0 %v6869_v33  ;;  %5315 = vmatpush1.bf16.msra.mxu0 %v5314_v1  ;;  %v1287_v33 = vld [vmem:[#allocation7 + $0x2a8] sm:$0xff]  ;;  %v1334_v1 = vld [vmem:[#allocation7 + $0x420] sm:$0xff] }
 0x14d   : > { %5316 = vmatprep.subr.bf16.mxu0 %v8163_v0  ;;  %v5323_v12 = vpack.c.bf16 %v1287_v33, %v1286_v6  ;;  %v5396_v15 = vpack.c.bf16 %v1335_v30, %v1334_v1  ;;  %v1339_v6 = vld [vmem:[#allocation7 + $0x448] sm:$0xff]  ;;  %v1305_v1 = vld [vmem:[#allocation7 + $0x338] sm:$0xff] }
 0x14f   : > { %1683 = vmatmul.mubr.f32.gmra.mrb[16].mxu0 %v7003_v61 }
 0x150   : > { %1687 = vmatprep.mubr.f32.mxu0 %v6874_v39  ;;  %5318 = vmatpush1.bf16.msra.mxu0 %v5317_v18  ;;  %v1289_v39 = vld [vmem:[#allocation7 + $0x2b8] sm:$0xff]  ;;  %v1336_v18 = vld [vmem:[#allocation7 + $0x430] sm:$0xff] }
 0x151   : > { %5319 = vmatprep.subr.bf16.mxu0 %v8163_v0  ;;  %v5326_v10 = vpack.c.bf16 %v1289_v39, %v1288_v13  ;;  %v5400_v24 = vpack.c.bf16 %v1337_v32, %v1336_v18  ;;  %v1341_v13 = vld [vmem:[#allocation7 + $0x458] sm:$0xff]  ;;  %v7098_v39 = vld [vmem:[#allocation2 + $0x180] sm:$0xff] }
 0x152   : > { %v6186_v18 = vld [vmem:[#allocation2 + $0x39] sm:$0xff] }
 0x153   : > { %1688 = vmatmul.mubr.f32.gmra.mrb[18].mxu0 %v7008_v19 }
 0x154   : > { %1692 = vmatprep.mubr.f32.mxu0 %v6879_v45  ;;  %5321 = vmatpush1.bf16.msra.mxu0 %v5320_v9  ;;  %v1291_v45 = vld [vmem:[#allocation7 + $0x2c8] sm:$0xff]  ;;  %v1338_v9 = vld [vmem:[#allocation7 + $0x440] sm:$0xff] }
 0x155   : > { %5322 = vmatprep.subr.bf16.mxu0 %v8163_v0  ;;  %v5329_v22 = vpack.c.bf16 %v1291_v45, %v1290_v16  ;;  %v5404_v33 = vpack.c.bf16 %v1339_v6, %v1338_v9  ;;  %v1342_v16 = vld [vmem:[#allocation7 + $0x460] sm:$0xff]  ;;  %v1343_v45 = vld [vmem:[#allocation7 + $0x468] sm:$0xff] }
 0x156   : > { %v6187_v9 = vld [vmem:[#allocation2 + $0x49] sm:$0xff] }
 0x157   : > { %1693 = vmatmul.mubr.f32.gmra.mrb[20].mxu0 %v7013_v20 }
 0x158   : > { %1697 = vmatprep.mubr.f32.mxu0 %v6884_v54  ;;  %5324 = vmatpush1.bf16.msra.mxu0 %v5323_v12  ;;  %v1293_v54 = vld [vmem:[#allocation7 + $0x2d8] sm:$0xff]  ;;  %v1340_v12 = vld [vmem:[#allocation7 + $0x450] sm:$0xff] }
 0x159   : > { %5325 = vmatprep.subr.bf16.mxu0 %v8163_v0  ;;  %v5332_v31 = vpack.c.bf16 %v1293_v54, %v1292_v46  ;;  %v7108_v46 = vld [vmem:[#allocation2 + $0x172] sm:$0xff]  ;;  %v1344_v54 = vld [vmem:[#allocation7 + $0x470] sm:$0xff] }
 0x15b   : > { %1698 = vmatmul.mubr.f32.gmra.mrb[22].mxu0 %v7018_v21 }
 0x15c   : > { %1702 = vmatprep.mubr.f32.mxu0 %v6889_v17  ;;  %5327 = vmatpush1.bf16.msra.mxu0 %v5326_v10  ;;  %v1295_v17 = vld [vmem:[#allocation7 + $0x2e8] sm:$0xff]  ;;  %v5408_v10 = vpack.c.bf16 %v1341_v13, %v1340_v12 }
 0x15d   : > { %5328 = vmatprep.subr.bf16.mxu0 %v8163_v0  ;;  %v5335_v59 = vpack.c.bf16 %v1295_v17, %v1294_v26  ;;  %v1298_v26 = vld [vmem:[#allocation7 + $0x300] sm:$0xff]  ;;  %v1299_v17 = vld [vmem:[#allocation7 + $0x308] sm:$0xff] }
 0x15e   : > { %v6188_v12 = vld [vmem:[#allocation2 + $0x51] sm:$0xff] }
 0x15f   : > { %1703 = vmatmul.mubr.f32.gmra.mrb[24].mxu0 %v7023_v14 }
 0x160   : > { %1707 = vmatprep.mubr.f32.mxu0 %v6894_v63  ;;  %5330 = vmatpush1.bf16.msra.mxu0 %v5329_v22  ;;  %v1297_v63 = vld [vmem:[#allocation7 + $0x2f8] sm:$0xff] }
 0x161   : > { %5331 = vmatprep.subr.bf16.mxu0 %v8163_v0  ;;  %v5338_v40 = vpack.c.bf16 %v1297_v63, %v1296_v37  ;;  %v7104_v22 = vld [vmem:[#allocation2 + $0x188] sm:$0xff]  ;;  %v5341_v37 = vpack.c.bf16 %v1299_v17, %v1298_v26  ;;  %v1300_v63 = vld [vmem:[#allocation7 + $0x310] sm:$0xff] }
 0x162   : > { %v1316_v26 = vld [vmem:[#allocation7 + $0x390] sm:$0xff] }
 0x163   : > { %1708 = vmatmul.mubr.f32.gmra.mrb[26].mxu0 %v7028_v25  ;;  %v6191_v17 = vld [vmem:[#allocation2 + $0x79] sm:$0xff] }
 0x164   : > { %1712 = vmatprep.mubr.f32.mxu0 %v6899_v35  ;;  %5333 = vmatpush1.bf16.msra.mxu0 %v5332_v31  ;;  %v7043_v35 = vld [vmem:[#allocation2 + $0xc2] sm:$0xff] }
 0x165   : > { %5334 = vmatprep.subr.bf16.mxu0 %v8163_v0  ;;  %v1345_v31 = vld [vmem:[#allocation7 + $0x478] sm:$0xff] }
 0x167   : > { %1713 = vmatmul.mubr.f32.gmra.mrb[28].mxu0 %v7033_v34 }
 0x168   : > { %1717 = vmatprep.mubr.f32.mxu0 %v6904_v36  ;;  %5336 = vmatpush1.bf16.msra.mxu0 %v5335_v59  ;;  %v7048_v36 = vld [vmem:[#allocation2 + $0xca] sm:$0xff]  ;;  %v5416_v59 = vpack.c.bf16 %v1345_v31, %v1344_v54 }
 0x169   : > { %5337 = vmatprep.subr.bf16.mxu0 %v8163_v0  ;;  %v6190_v54 = vld [vmem:[#allocation2 + $0x69] sm:$0xff] }
 0x16b   : > { %1718 = vmatmul.mubr.f32.gmra.mrb[30].mxu0 %v7038_v27 }
 0x16c   : > { %1722 = vmatprep.mubr.f32.mxu0 %v6908_v4  ;;  %5339 = vmatpush1.bf16.msra.mxu0 %v5338_v40  ;;  %v7056_v4 = vld [vmem:[#allocation2 + $0xe2] sm:$0xff] }
 0x16d   : > { %5340 = vmatprep.subr.bf16.mxu0 %v8163_v0  ;;  %v1301_v40 = vld [vmem:[#allocation7 + $0x318] sm:$0xff] }
 0x16f   : > { %1723 = vmatmul.mubr.f32.gmra.mrb[32].mxu0 %v7043_v35 }
 0x170   : > { %1727 = vmatprep.mubr.f32.mxu0 %v6912_v38  ;;  %v7064_v38 = vld [vmem:[#allocation2 + $0xfa] sm:$0xff] }
 0x173   : > { %1728 = vmatmul.mubr.f32.gmra.mrb[34].mxu0 %v7048_v36 }
 0x174   : > { %1732 = vmatprep.mubr.f32.mxu0 %v6916_v5  ;;  %v7068_v5 = vld [vmem:[#allocation2 + $0x10a] sm:$0xff] }
 0x177   : > { %1733 = vmatmul.mubr.f32.gmra.mrb[36].mxu0 %v7052_v43 }
 0x178   : > { %1737 = vmatprep.mubr.f32.mxu0 %v6920_v41  ;;  %v7072_v41 = vld [vmem:[#allocation2 + $0x112] sm:$0xff] }
 0x17b   : > { %1738 = vmatmul.mubr.f32.gmra.mrb[38].mxu0 %v7056_v4 }
 0x17c   : > { %1742 = vmatprep.mubr.f32.mxu0 %v6924_v42  ;;  %v7076_v42 = vld [vmem:[#allocation2 + $0x122] sm:$0xff] }
 0x17f   : > { %1743 = vmatmul.mubr.f32.gmra.mrb[40].mxu0 %v7060_v28 }
 0x180   : > { %1747 = vmatprep.mubr.f32.mxu0 %v6928_v44  ;;  %v1330_v44 = vld [vmem:[#allocation7 + $0x400] sm:$0xff] }
 0x181   : > { %v5388_v53 = vpack.c.bf16 %v1331_v50, %v1330_v44  ;;  %v6183_v44 = vld [vmem:[#allocation2 + $0x19] sm:$0xff]  ;;  %v5344_v50 = vpack.c.bf16 %v1301_v40, %v1300_v63  ;;  %v6192_v63 = vld [vmem:[#allocation2 + $0x81] sm:$0xff] }
 0x183   : > { %1748 = vmatmul.mubr.f32.gmra.mrb[42].mxu0 %v7064_v38  ;;  %5389 = vmatprep.subr.bf16.mxu1 %v5388_v53 }
 0x184   : > { %1752 = vmatprep.mubr.f32.mxu0 %v6932_v47  ;;  %v7080_v47 = vld [vmem:[#allocation2 + $0x12a] sm:$0xff]  ;;  %5391 = vmatpush3.bf16.msra.mxu1 %v5388_v53 }
 0x185   : > { %v1302_v53 = vld [vmem:[#allocation7 + $0x320] sm:$0xff] }
 0x187   : > { %1753 = vmatmul.mubr.f32.gmra.mrb[44].mxu0 %v7068_v5 }
 0x188   : > { %1757 = vmatprep.mubr.f32.mxu0 %v6936_v48  ;;  %v1332_v48 = vld [vmem:[#allocation7 + $0x410] sm:$0xff] }
 0x189   : > { %v5392_v11 = vpack.c.bf16 %v1333_v29, %v1332_v48  ;;  %v1303_v48 = vld [vmem:[#allocation7 + $0x328] sm:$0xff] }
 0x18a   : > { %v5347_v29 = vpack.c.bf16 %v1303_v48, %v1302_v53  ;;  %v1322_v48 = vld [vmem:[#allocation7 + $0x3c0] sm:$0xff] }
 0x18b   : > { %1758 = vmatmul.mubr.f32.gmra.mrb[46].mxu0 %v7072_v41  ;;  %5393 = vmatprep.subr.bf16.mxu1 %v5392_v11 }
 0x18c   : > { %1762 = vmatprep.mubr.f32.mxu0 %v6940_v49  ;;  %v7084_v49 = vld [vmem:[#allocation2 + $0x13a] sm:$0xff]  ;;  %5395 = vmatpush3.bf16.msra.mxu1 %v5392_v11 }
 0x18d   : > { %5397 = vmatprep.subr.bf16.mxu1 %v5396_v15  ;;  %v1304_v11 = vld [vmem:[#allocation7 + $0x330] sm:$0xff] }
 0x18e   : > { %v5350_v30 = vpack.c.bf16 %v1305_v1, %v1304_v11  ;;  %v1324_v11 = vld [vmem:[#allocation7 + $0x3d0] sm:$0xff]  ;;  %v6195_v1 = vld [vmem:[#allocation2 + $0xa9] sm:$0xff] }
 0x18f   : > { %1763 = vmatmul.mubr.f32.gmra.mrb[48].mxu0 %v7076_v42 }
 0x190   : > { %1767 = vmatprep.mubr.f32.mxu0 %v6944_v51  ;;  %v7088_v51 = vld [vmem:[#allocation2 + $0x142] sm:$0xff]  ;;  %5399 = vmatpush3.bf16.msra.mxu1 %v5396_v15  ;;  %v1306_v15 = vld [vmem:[#allocation7 + $0x340] sm:$0xff] }
 0x191   : > { %5401 = vmatprep.subr.bf16.mxu1 %v5400_v24 }
 0x193   : > { %1768 = vmatmul.mubr.f32.gmra.mrb[50].mxu0 %v7080_v47 }
 0x194   : > { %1772 = vmatprep.mubr.f32.mxu0 %v6948_v52  ;;  %v7092_v52 = vld [vmem:[#allocation2 + $0x152] sm:$0xff]  ;;  %5403 = vmatpush3.bf16.msra.mxu1 %v5400_v24  ;;  %v1308_v24 = vld [vmem:[#allocation7 + $0x350] sm:$0xff] }
 0x195   : > { %5405 = vmatprep.subr.bf16.mxu1 %v5404_v33 }
 0x197   : > { %1773 = vmatmul.mubr.f32.gmra.mrb[52].mxu0 %v7084_v49 }
 0x198   : > { %1777 = vmatprep.mubr.f32.mxu0 %v6956_v56  ;;  %v7096_v56 = vld [vmem:[#allocation2 + $0x15a] sm:$0xff]  ;;  %5407 = vmatpush3.bf16.msra.mxu1 %v5404_v33  ;;  %v1310_v33 = vld [vmem:[#allocation7 + $0x360] sm:$0xff] }
 0x199   : > { %5409 = vmatprep.subr.bf16.mxu1 %v5408_v10 }
 0x19b   : > { %1778 = vmatmul.mubr.f32.gmra.mrb[54].mxu0 %v7088_v51 }
 0x19c   : > { %1782 = vmatprep.mubr.f32.mxu0 %v6964_v60  ;;  %v7102_v60 = vld [vmem:[#allocation2 + $0x16a] sm:$0xff]  ;;  %5411 = vmatpush3.bf16.msra.mxu1 %v5408_v10  ;;  %v1312_v10 = vld [vmem:[#allocation7 + $0x370] sm:$0xff] }
 0x19f   : > { %1783 = vmatmul.mubr.f32.gmra.mrb[56].mxu0 %v7092_v52 }
 0x1a0   : > { %1787 = vmatprep.mubr.f32.mxu0 %v6968_v2  ;;  %v5412_v2 = vpack.c.bf16 %v1343_v45, %v1342_v16  ;;  %v6189_v16 = vld [vmem:[#allocation2 + $0x61] sm:$0xff] }
 0x1a2   : > { %5413 = vmatprep.subr.bf16.mxu1 %v5412_v2 }
 0x1a3   : > { %1788 = vmatmul.mubr.f32.gmra.mrb[58].mxu0 %v7096_v56  ;;  %5415 = vmatpush3.bf16.msra.mxu1 %v5412_v2  ;;  %v1314_v2 = vld [vmem:[#allocation7 + $0x380] sm:$0xff] }
 0x1a4   : > { %1792 = vmatprep.mubr.f32.mxu0 %v7098_v39  ;;  %5417 = vmatprep.subr.bf16.mxu1 %v5416_v59 }
 0x1a7   : > { %1793 = vmatmul.mubr.f32.gmra.mrb[60].mxu0 %v7102_v60  ;;  %5419 = vmatpush3.bf16.msra.mxu1 %v5416_v59 }
 0x1a8   : > { %1797 = vmatprep.mubr.f32.mxu0 %v7104_v22  ;;  %5420 = vmatprep.subr.bf16.mxu1 %v8163_v0 }
 0x1aa   : > { %5069 = vmatmul.mubr.f32.vlgmr.msra.gmra.mrb[0].mxu1 %v6988_v3 }
 0x1ab   : > { %1798 = vmatmul.mubr.f32.gmra.mrb[62].mxu0 %v7108_v46  ;;  %5071 = vmatprep.mubr.f32.mxu1 %v6993_v7 }
 0x1ac   : > { %1867 = vmatprep.mubr.f32.mxu0 %v6975_v23  ;;  %v6184_v23 = vld [vmem:[#allocation2 + $0x21] sm:$0xff] }
 0x1ae   : > { %5072 = vmatmul.mubr.f32.gmra.mrb[2].mxu1 %v6998_v58 }
 0x1af   : > { %1868 = vmatmul.mubr.f32.vlgmr.msra.gmra.mrb[0].mxu0 %v6183_v44  ;;  %5074 = vmatprep.mubr.f32.mxu1 %v7003_v61  ;;  %v1320_v44 = vld [vmem:[#allocation7 + $0x3b0] sm:$0xff] }
 0x1b0   : > { %5342 = vmatpush1.bf16.msra.mxu0 %v5341_v37  ;;  %1872 = vmatprep.mubr.f32.mxu0 %v6980_v57  ;;  %v6185_v57 = vld [vmem:[#allocation2 + $0x31] sm:$0xff] }
 0x1b1   : > { %5343 = vmatprep.subr.bf16.mxu0 %v8163_v0  ;;  %v1318_v37 = vld [vmem:[#allocation7 + $0x3a0] sm:$0xff] }
 0x1b2   : > { %5075 = vmatmul.mubr.f32.gmra.mrb[4].mxu1 %v7008_v19 }
 0x1b3   : > { %1873 = vmatmul.mubr.f32.gmra.mrb[2].mxu0 %v6184_v23  ;;  %5077 = vmatprep.mubr.f32.mxu1 %v7013_v20  ;;  %v6194_v23 = vld [vmem:[#allocation2 + $0x99] sm:$0xff] }
 0x1b4   : > { %1877 = vmatprep.mubr.f32.mxu0 %v6838_v62  ;;  %5345 = vmatpush1.bf16.msra.mxu0 %v5344_v50  ;;  %v1307_v62 = vld [vmem:[#allocation7 + $0x348] sm:$0xff] }
 0x1b5   : > { %5346 = vmatprep.subr.bf16.mxu0 %v8163_v0  ;;  %v5353_v32 = vpack.c.bf16 %v1307_v62, %v1306_v15  ;;  %v6193_v50 = vld [vmem:[#allocation2 + $0x91] sm:$0xff] }
 0x1b6   : > { %5078 = vmatmul.mubr.f32.gmra.mrb[6].mxu1 %v7018_v21  ;;  %v6196_v15 = vld [vmem:[#allocation2 + $0xb1] sm:$0xff] }
 0x1b7   : > { %1878 = vmatmul.mubr.f32.gmra.mrb[4].mxu0 %v6185_v57  ;;  %5080 = vmatprep.mubr.f32.mxu1 %v7023_v14 }
 0x1b8   : > { %1882 = vmatprep.mubr.f32.mxu0 %v6988_v3  ;;  %5348 = vmatpush1.bf16.msra.mxu0 %v5347_v29  ;;  %v1309_v3 = vld [vmem:[#allocation7 + $0x358] sm:$0xff] }
 0x1b9   : > { %5349 = vmatprep.subr.bf16.mxu0 %v8163_v0  ;;  %v5356_v6 = vpack.c.bf16 %v1309_v3, %v1308_v24  ;;  %v688_v24 = vld [vmem:[#allocation2 + $0x18a] sm:$0xff]  ;;  %v6197_v3 = vld [vmem:[#allocation2 + $0xc1] sm:$0xff] }
 0x1ba   : > { %5081 = vmatmul.mubr.f32.gmra.mrb[8].mxu1 %v7028_v25 }
 0x1bb   : > { %1883 = vmatmul.mubr.f32.gmra.mrb[6].mxu0 %v6186_v18  ;;  %5083 = vmatprep.mubr.f32.mxu1 %v7033_v34  ;;  %v687_v18 = vld [vmem:[#allocation2 + $0x182] sm:$0xff] }
 0x1bc   : > { %1887 = vmatprep.mubr.f32.mxu0 %v6993_v7  ;;  %5351 = vmatpush1.bf16.msra.mxu0 %v5350_v30  ;;  %v1311_v7 = vld [vmem:[#allocation7 + $0x368] sm:$0xff]  ;;  %v1326_v30 = vld [vmem:[#allocation7 + $0x3e0] sm:$0xff] }
 0x1bd   : > { %5352 = vmatprep.subr.bf16.mxu0 %v8163_v0  ;;  %v5359_v13 = vpack.c.bf16 %v1311_v7, %v1310_v33  ;;  %v6200_v33 = vld [vmem:[#allocation2 + $0xe1] sm:$0xff]  ;;  %v6201_v7 = vld [vmem:[#allocation2 + $0xf1] sm:$0xff] }
 0x1be   : > { %5084 = vmatmul.mubr.f32.gmra.mrb[10].mxu1 %v7038_v27 }
 0x1bf   : > { %1888 = vmatmul.mubr.f32.gmra.mrb[8].mxu0 %v6187_v9  ;;  %5086 = vmatprep.mubr.f32.mxu1 %v7043_v35 }
 0x1c0   : > { %1892 = vmatprep.mubr.f32.mxu0 %v6998_v58  ;;  %5354 = vmatpush1.bf16.msra.mxu0 %v5353_v32  ;;  %v1313_v58 = vld [vmem:[#allocation7 + $0x378] sm:$0xff] }
 0x1c1   : > { %5355 = vmatprep.subr.bf16.mxu0 %v8163_v0  ;;  %v5362_v45 = vpack.c.bf16 %v1313_v58, %v1312_v10  ;;  %v1329_v32 = vld [vmem:[#allocation7 + $0x3f8] sm:$0xff]  ;;  %v3440_v10 = vld [vmem:[#allocation7 + $0x488] sm:$0xff]  ;;  %v722_v58 = vld [vmem:[#allocation2 + $0x30] sm:$0xff] }
 0x1c2   : > { %5087 = vmatmul.mubr.f32.gmra.mrb[12].mxu1 %v7048_v36 }
 0x1c3   : > { %1893 = vmatmul.mubr.f32.gmra.mrb[10].mxu0 %v6188_v12  ;;  %5089 = vmatprep.mubr.f32.mxu1 %v7052_v43  ;;  %v6203_v12 = vld [vmem:[#allocation2 + $0x109] sm:$0xff] }
 0x1c4   : > { %1897 = vmatprep.mubr.f32.mxu0 %v7003_v61  ;;  %5357 = vmatpush1.bf16.msra.mxu0 %v5356_v6  ;;  %v1315_v61 = vld [vmem:[#allocation7 + $0x388] sm:$0xff]  ;;  %v6198_v6 = vld [vmem:[#allocation2 + $0xc9] sm:$0xff] }
 0x1c5   : > { %5358 = vmatprep.subr.bf16.mxu0 %v8163_v0  ;;  %v5365_v31 = vpack.c.bf16 %v1315_v61, %v1314_v2  ;;  %v3444_v61 = vld [vmem:[#allocation7 + $0x4a8] sm:$0xff] }
 0x1c6   : > { %5090 = vmatmul.mubr.f32.gmra.mrb[14].mxu1 %v7056_v4 }
 0x1c7   : > { %1898 = vmatmul.mubr.f32.gmra.mrb[12].mxu0 %v6189_v16  ;;  %5092 = vmatprep.mubr.f32.mxu1 %v7060_v28 }
 0x1c8   : > { %1902 = vmatprep.mubr.f32.mxu0 %v7008_v19  ;;  %5360 = vmatpush1.bf16.msra.mxu0 %v5359_v13  ;;  %v1317_v19 = vld [vmem:[#allocation7 + $0x398] sm:$0xff]  ;;  %v786_v13 = vld [vmem:[#allocation2 + $0x31] sm:$0xff] }
 0x1c9   : > { %5361 = vmatprep.subr.bf16.mxu0 %v8163_v0  ;;  %v5368_v59 = vpack.c.bf16 %v1317_v19, %v1316_v26  ;;  %v3445_v26 = vld [vmem:[#allocation7 + $0x4b0] sm:$0xff]  ;;  %v3446_v19 = vld [vmem:[#allocation7 + $0x4b8] sm:$0xff] }
 0x1ca   : > { %5093 = vmatmul.mubr.f32.gmra.mrb[16].mxu1 %v7064_v38 }
 0x1cb   : > { %1903 = vmatmul.mubr.f32.gmra.mrb[14].mxu0 %v6190_v54  ;;  %5095 = vmatprep.mubr.f32.mxu1 %v7068_v5  ;;  %v723_v54 = vld [vmem:[#allocation2 + $0x38] sm:$0xff] }
 0x1cc   : > { %1907 = vmatprep.mubr.f32.mxu0 %v7013_v20  ;;  %5363 = vmatpush1.bf16.msra.mxu0 %v5362_v45  ;;  %v1319_v20 = vld [vmem:[#allocation7 + $0x3a8] sm:$0xff] }
 0x1cd   : > { %5364 = vmatprep.subr.bf16.mxu0 %v8163_v0  ;;  %v5371_v40 = vpack.c.bf16 %v1319_v20, %v1318_v37  ;;  %v787_v45 = vld [vmem:[#allocation2 + $0x39] sm:$0xff]  ;;  %v789_v20 = vld [vmem:[#allocation2 + $0x51] sm:$0xff] }
 0x1ce   : > { %5096 = vmatmul.mubr.f32.gmra.mrb[18].mxu1 %v7072_v41  ;;  %v3568_v37 = vld [vmem:[#allocation7 + $0x888] sm:$0xff] }
 0x1cf   : > { %1908 = vmatmul.mubr.f32.gmra.mrb[16].mxu0 %v6191_v17  ;;  %5098 = vmatprep.mubr.f32.mxu1 %v7076_v42  ;;  %v3567_v17 = vld [vmem:[#allocation7 + $0x880] sm:$0xff] }
 0x1d0   : > { %1912 = vmatprep.mubr.f32.mxu0 %v7018_v21  ;;  %5366 = vmatpush1.bf16.msra.mxu0 %v5365_v31  ;;  %v1321_v21 = vld [vmem:[#allocation7 + $0x3b8] sm:$0xff] }
 0x1d1   : > { %5367 = vmatprep.subr.bf16.mxu0 %v8163_v0  ;;  %v5374_v53 = vpack.c.bf16 %v1321_v21, %v1320_v44  ;;  %v788_v31 = vld [vmem:[#allocation2 + $0x49] sm:$0xff]  ;;  %v3448_v21 = vld [vmem:[#allocation7 + $0x4c8] sm:$0xff] }
 0x1d2   : > { %5099 = vmatmul.mubr.f32.gmra.mrb[20].mxu1 %v7080_v47  ;;  %v3447_v44 = vld [vmem:[#allocation7 + $0x4c0] sm:$0xff] }
 0x1d3   : > { %1913 = vmatmul.mubr.f32.gmra.mrb[18].mxu0 %v6192_v63  ;;  %5101 = vmatprep.mubr.f32.mxu1 %v7084_v49  ;;  %v7188_v63 = vpack.c.bf16 %v3568_v37, %v3567_v17  ;;  %v802_v17 = vld [vmem:[#allocation2 + $0xf1] sm:$0xff]  ;;  %v803_v37 = vld [vmem:[#allocation2 + $0xf9] sm:$0xff] }
 0x1d4   : > { %1917 = vmatprep.mubr.f32.mxu0 %v7023_v14  ;;  %5369 = vmatpush1.bf16.msra.mxu0 %v5368_v59  ;;  %v1323_v14 = vld [vmem:[#allocation7 + $0x3c8] sm:$0xff]  ;;  %v724_v59 = vld [vmem:[#allocation2 + $0x48] sm:$0xff] }
 0x1d5   : > { %5370 = vmatprep.subr.bf16.mxu0 %v8163_v0  ;;  %v5377_v29 = vpack.c.bf16 %v1323_v14, %v1322_v48  ;;  %8238 = vst [vmem:[#allocation14_spill] sm:$0xff] %v7188_v63  ;;  %v5433_v48 = vpack.c.bf16 %v3448_v21, %v3447_v44  ;;  %v3449_v14 = vld [vmem:[#allocation7 + $0x4d0] sm:$0xff]  ;;  %v740_v44 = vld [vmem:[#allocation2 + $0x108] sm:$0xff]  ;;  %v805_v21 = vld [vmem:[#allocation2 + $0x111] sm:$0xff] }
 0x1d6   : > { %5102 = vmatmul.mubr.f32.gmra.mrb[22].mxu1 %v7088_v51 }
 0x1d7   : > { %1918 = vmatmul.mubr.f32.gmra.mrb[20].mxu0 %v6193_v50  ;;  %5104 = vmatprep.mubr.f32.mxu1 %v7092_v52  ;;  %v725_v50 = vld [vmem:[#allocation2 + $0x50] sm:$0xff] }
 0x1d8   : > { %1922 = vmatprep.mubr.f32.mxu0 %v7028_v25  ;;  %5372 = vmatpush1.bf16.msra.mxu0 %v5371_v40  ;;  %v1325_v25 = vld [vmem:[#allocation7 + $0x3d8] sm:$0xff]  ;;  %v5430_v40 = vpack.c.bf16 %v3446_v19, %v3445_v26  ;;  %v737_v19 = vld [vmem:[#allocation2 + $0xe0] sm:$0xff] }
 0x1d9   : > { %5373 = vmatprep.subr.bf16.mxu0 %v8163_v0  ;;  %v5380_v57 = vpack.c.bf16 %v1325_v25, %v1324_v11  ;;  %v791_v11 = vld [vmem:[#allocation2 + $0x69] sm:$0xff]  ;;  %v801_v26 = vld [vmem:[#allocation2 + $0xe1] sm:$0xff] }
 0x1da   : > { %5105 = vmatmul.mubr.f32.gmra.mrb[24].mxu1 %v7096_v56 }
 0x1db   : > { %1923 = vmatmul.mubr.f32.gmra.mrb[22].mxu0 %v6194_v23  ;;  %5107 = vmatprep.mubr.f32.mxu1 %v7102_v60  ;;  %v3450_v23 = vld [vmem:[#allocation7 + $0x4d8] sm:$0xff] }
 0x1dc   : > { %1927 = vmatprep.mubr.f32.mxu0 %v7033_v34  ;;  %5375 = vmatpush1.bf16.msra.mxu0 %v5374_v53  ;;  %v1327_v34 = vld [vmem:[#allocation7 + $0x3e8] sm:$0xff]  ;;  %v790_v53 = vld [vmem:[#allocation2 + $0x61] sm:$0xff]  ;;  %v5436_v25 = vpack.c.bf16 %v3450_v23, %v3449_v14  ;;  %v3467_v14 = vld [vmem:[#allocation7 + $0x560] sm:$0xff] }
 0x1dd   : > { %5376 = vmatprep.subr.bf16.mxu0 %v8163_v0  ;;  %v5383_v62 = vpack.c.bf16 %v1327_v34, %v1326_v30  ;;  %v727_v30 = vld [vmem:[#allocation2 + $0x68] sm:$0xff]  ;;  %v792_v34 = vld [vmem:[#allocation2 + $0x79] sm:$0xff] }
 0x1de   : > { %5108 = vmatmul.mubr.f32.gmra.mrb[26].mxu1 %v7108_v46  ;;  %v3468_v23 = vld [vmem:[#allocation7 + $0x568] sm:$0xff] }
 0x1df   : > { %1928 = vmatmul.mubr.f32.gmra.mrb[24].mxu0 %v6195_v1  ;;  %5110 = vmatprep.mubr.f32.mxu1 %v687_v18  ;;  %v3451_v1 = vld [vmem:[#allocation7 + $0x4e0] sm:$0xff] }
 0x1e0   : > { %1932 = vmatprep.mubr.f32.mxu0 %v7038_v27  ;;  %5378 = vmatpush1.bf16.msra.mxu0 %v5377_v29  ;;  %v1328_v27 = vld [vmem:[#allocation7 + $0x3f0] sm:$0xff] }
 0x1e1   : > { %5379 = vmatprep.subr.bf16.mxu0 %v8163_v0  ;;  %v5386_v9 = vpack.c.bf16 %v1329_v32, %v1328_v27  ;;  %v726_v29 = vld [vmem:[#allocation2 + $0x60] sm:$0xff]  ;;  %v728_v27 = vld [vmem:[#allocation2 + $0x78] sm:$0xff] }
 0x1e2   : > { %5111 = vmatmul.mubr.f32.gmra.mrb[28].mxu1 %v688_v24  ;;  %v793_v32 = vld [vmem:[#allocation2 + $0x81] sm:$0xff] }
 0x1e3   : > { %1933 = vmatmul.mubr.f32.gmra.mrb[26].mxu0 %v6196_v15 }
 0x1e4   : > { %1937 = vmatprep.mubr.f32.mxu0 %v7043_v35  ;;  %5381 = vmatpush1.bf16.msra.mxu0 %v5380_v57  ;;  %v6199_v35 = vld [vmem:[#allocation2 + $0xd9] sm:$0xff] }
 0x1e5   : > { %5382 = vmatprep.subr.bf16.mxu0 %v8163_v0  ;;  %v3452_v57 = vld [vmem:[#allocation7 + $0x4e8] sm:$0xff] }
 0x1e6   : > { %v5439_v15 = vpack.c.bf16 %v3452_v57, %v3451_v1  ;;  %v3469_v1 = vld [vmem:[#allocation7 + $0x570] sm:$0xff]  ;;  %v3470_v57 = vld [vmem:[#allocation7 + $0x578] sm:$0xff] }
 0x1e7   : > { %1938 = vmatmul.mubr.f32.gmra.mrb[28].mxu0 %v6197_v3  ;;  %v3455_v3 = vld [vmem:[#allocation7 + $0x500] sm:$0xff] }
 0x1e8   : > { %1942 = vmatprep.mubr.f32.mxu0 %v7048_v36  ;;  %5384 = vmatpush1.bf16.msra.mxu0 %v5383_v62  ;;  %v6202_v36 = vld [vmem:[#allocation2 + $0xf9] sm:$0xff] }
 0x1e9   : > { %5385 = vmatprep.subr.bf16.mxu0 %v8163_v0  ;;  %v3453_v62 = vld [vmem:[#allocation7 + $0x4f0] sm:$0xff] }
 0x1eb   : > { %1943 = vmatmul.mubr.f32.gmra.mrb[30].mxu0 %v6198_v6  ;;  %v729_v6 = vld [vmem:[#allocation2 + $0x80] sm:$0xff] }
 0x1ec   : > { %1947 = vmatprep.mubr.f32.mxu0 %v7052_v43  ;;  %5387 = vmatpush1.bf16.msra.mxu0 %v5386_v9  ;;  %v6204_v43 = vld [vmem:[#allocation2 + $0x111] sm:$0xff] }
 0x1ed   : > { %5613 = vmatprep.subr.bf16.mxu0 %v7188_v63  ;;  %v3456_v9 = vld [vmem:[#allocation7 + $0x508] sm:$0xff] }
 0x1ef   : > { %1948 = vmatmul.mubr.f32.gmra.mrb[32].mxu0 %v6199_v35  ;;  %v794_v35 = vld [vmem:[#allocation2 + $0x91] sm:$0xff] }
 0x1f0   : > { %1952 = vmatprep.mubr.f32.mxu0 %v7056_v4  ;;  %v6205_v4 = vld [vmem:[#allocation2 + $0x121] sm:$0xff] }
 0x1f3   : > { %1953 = vmatmul.mubr.f32.gmra.mrb[34].mxu0 %v6200_v33  ;;  %v5445_v33 = vpack.c.bf16 %v3456_v9, %v3455_v3  ;;  %v2638_v3 = vld [vmem:[#allocation2 + $0x1] sm:$0xff] }
 0x1f4   : > { %1957 = vmatprep.mubr.f32.mxu0 %v7060_v28  ;;  %v6206_v28 = vld [vmem:[#allocation2 + $0x129] sm:$0xff]  ;;  %v809_v9 = vld [vmem:[#allocation2 + $0x141] sm:$0xff] }
 0x1f7   : > { %1958 = vmatmul.mubr.f32.gmra.mrb[36].mxu0 %v6201_v7  ;;  %v3457_v7 = vld [vmem:[#allocation7 + $0x510] sm:$0xff] }
 0x1f8   : > { %1962 = vmatprep.mubr.f32.mxu0 %v7064_v38  ;;  %v6207_v38 = vld [vmem:[#allocation2 + $0x139] sm:$0xff] }
 0x1fb   : > { %1963 = vmatmul.mubr.f32.gmra.mrb[38].mxu0 %v6202_v36  ;;  %v3458_v36 = vld [vmem:[#allocation7 + $0x518] sm:$0xff] }
 0x1fc   : > { %1967 = vmatprep.mubr.f32.mxu0 %v7068_v5  ;;  %v6208_v5 = vld [vmem:[#allocation2 + $0x141] sm:$0xff] }
 0x1ff   : > { %1968 = vmatmul.mubr.f32.gmra.mrb[40].mxu0 %v6203_v12  ;;  %v730_v12 = vld [vmem:[#allocation2 + $0x90] sm:$0xff] }
 0x200   : > { %1972 = vmatprep.mubr.f32.mxu0 %v7072_v41  ;;  %v6209_v41 = vld [vmem:[#allocation2 + $0x151] sm:$0xff] }
 0x203   : > { %1973 = vmatmul.mubr.f32.gmra.mrb[42].mxu0 %v6204_v43  ;;  %v795_v43 = vld [vmem:[#allocation2 + $0x99] sm:$0xff] }
 0x204   : > { %1977 = vmatprep.mubr.f32.mxu0 %v7076_v42  ;;  %v6210_v42 = vld [vmem:[#allocation2 + $0x159] sm:$0xff] }
 0x207   : > { %1978 = vmatmul.mubr.f32.gmra.mrb[44].mxu0 %v6205_v4  ;;  %v5448_v4 = vpack.c.bf16 %v3458_v36, %v3457_v7  ;;  %v7215_v7 = vld [vmem:[#allocation2] sm:$0xff] }
 0x208   : > { %1982 = vmatprep.mubr.f32.mxu0 %v7080_v47  ;;  %v6211_v47 = vld [vmem:[#allocation2 + $0x169] sm:$0xff]  ;;  %v745_v36 = vld [vmem:[#allocation2 + $0x140] sm:$0xff] }
 0x20b   : > { %1983 = vmatmul.mubr.f32.gmra.mrb[46].mxu0 %v6206_v28  ;;  %v3459_v28 = vld [vmem:[#allocation7 + $0x520] sm:$0xff] }
 0x20c   : > { %1987 = vmatprep.mubr.f32.mxu0 %v7084_v49  ;;  %v6212_v49 = vld [vmem:[#allocation2 + $0x171] sm:$0xff] }
 0x20f   : > { %1988 = vmatmul.mubr.f32.gmra.mrb[48].mxu0 %v6207_v38  ;;  %v3460_v38 = vld [vmem:[#allocation7 + $0x528] sm:$0xff] }
 0x210   : > { %1992 = vmatprep.mubr.f32.mxu0 %v7088_v51  ;;  %v880_v51 = vld [vmem:[#allocation2 + $0x19a] sm:$0xff] }
 0x211   : > { %5113 = vmatprep.mubr.f32.mxu1 %v880_v51  ;;  %v732_v51 = vld [vmem:[#allocation2 + $0xa8] sm:$0xff] }
 0x213   : > { %1993 = vmatmul.mubr.f32.gmra.mrb[50].mxu0 %v6208_v5  ;;  %v731_v5 = vld [vmem:[#allocation2 + $0x98] sm:$0xff] }
 0x214   : > { %1997 = vmatprep.mubr.f32.mxu0 %v7092_v52  ;;  %v881_v52 = vld [vmem:[#allocation2 + $0x1a2] sm:$0xff] }
 0x215   : > { %5114 = vmatmul.mubr.f32.gmra.mrb[30].mxu1 %v881_v52  ;;  %v797_v52 = vld [vmem:[#allocation2 + $0xb1] sm:$0xff] }
 0x216   : > { %3655 = vmatprep.mubr.f32.mxu1 %v2638_v3  ;;  %v3480_v3 = vld [vmem:[#allocation7 + $0x5c8] sm:$0xff] }
 0x217   : > { %1998 = vmatmul.mubr.f32.gmra.mrb[52].mxu0 %v6209_v41  ;;  %v796_v41 = vld [vmem:[#allocation2 + $0xa9] sm:$0xff] }
 0x218   : > { %2002 = vmatprep.mubr.f32.mxu0 %v7096_v56  ;;  %v3439_v56 = vld [vmem:[#allocation7 + $0x480] sm:$0xff] }
 0x219   : > { %v5421_v16 = vpack.c.bf16 %v3440_v10, %v3439_v56  ;;  %v3463_v56 = vld [vmem:[#allocation7 + $0x540] sm:$0xff]  ;;  %v3464_v10 = vld [vmem:[#allocation7 + $0x548] sm:$0xff] }
 0x21b   : > { %2003 = vmatmul.mubr.f32.gmra.mrb[54].mxu0 %v6210_v42  ;;  %5422 = vmatpush1.bf16.msra.mxu1 %v5421_v16  ;;  %v5451_v42 = vpack.c.bf16 %v3460_v38, %v3459_v28  ;;  %v5457_v16 = vpack.c.bf16 %v3464_v10, %v3463_v56  ;;  %v3574_v28 = vld [vmem:[#allocation7 + $0x8b8] sm:$0xff]  ;;  %v3577_v10 = vld [vmem:[#allocation7 + $0x8d0] sm:$0xff] }
 0x21c   : > { %2007 = vmatprep.mubr.f32.mxu0 %v7102_v60  ;;  %v3441_v60 = vld [vmem:[#allocation7 + $0x490] sm:$0xff]  ;;  %5423 = vmatprep.subr.bf16.mxu1 %v8163_v0  ;;  %v812_v56 = vld [vmem:[#allocation2 + $0x169] sm:$0xff] }
 0x21f   : > { %2008 = vmatmul.mubr.f32.gmra.mrb[56].mxu0 %v6211_v47  ;;  %v3461_v47 = vld [vmem:[#allocation7 + $0x530] sm:$0xff] }
 0x220   : > { %2012 = vmatprep.mubr.f32.mxu0 %v7108_v46  ;;  %v3442_v46 = vld [vmem:[#allocation7 + $0x498] sm:$0xff] }
 0x221   : > { %v5424_v2 = vpack.c.bf16 %v3442_v46, %v3441_v60  ;;  %v733_v60 = vld [vmem:[#allocation2 + $0xb0] sm:$0xff]  ;;  %v3465_v46 = vld [vmem:[#allocation7 + $0x550] sm:$0xff] }
 0x223   : > { %2013 = vmatmul.mubr.f32.gmra.mrb[58].mxu0 %v6212_v49  ;;  %5425 = vmatpush1.bf16.msra.mxu1 %v5424_v2  ;;  %v3462_v49 = vld [vmem:[#allocation7 + $0x538] sm:$0xff]  ;;  %v734_v2 = vld [vmem:[#allocation2 + $0xc0] sm:$0xff] }
 0x224   : > { %2017 = vmatprep.mubr.f32.mxu0 %v687_v18  ;;  %5426 = vmatprep.subr.bf16.mxu1 %v8163_v0  ;;  %v3454_v18 = vld [vmem:[#allocation7 + $0x4f8] sm:$0xff] }
 0x227   : > { %2018 = vmatmul.mubr.f32.gmra.mrb[60].mxu0 %v6951_v55  ;;  %v3443_v55 = vld [vmem:[#allocation7 + $0x4a0] sm:$0xff] }
 0x228   : > { %2022 = vmatprep.mubr.f32.mxu0 %v688_v24  ;;  %v5442_v24 = vpack.c.bf16 %v3454_v18, %v3453_v62  ;;  %v5466_v62 = vpack.c.bf16 %v3470_v57, %v3469_v1  ;;  %v817_v57 = vld [vmem:[#allocation2 + $0x1a1] sm:$0xff] }
 0x22b   : > { %2023 = vmatmul.mubr.f32.gmra.mrb[62].mxu0 %v6959_v8  ;;  %v5427_v8 = vpack.c.bf16 %v3444_v61, %v3443_v55  ;;  %v799_v55 = vld [vmem:[#allocation2 + $0xc9] sm:$0xff] }
 0x22c   : > { %2092 = vmatprep.mubr.f32.mxu0 %v786_v13  ;;  %v5454_v13 = vpack.c.bf16 %v3462_v49, %v3461_v47  ;;  %v811_v47 = vld [vmem:[#allocation2 + $0x159] sm:$0xff]  ;;  %v3575_v49 = vld [vmem:[#allocation7 + $0x8c0] sm:$0xff] }
 0x22d   : > { %5428 = vmatpush1.bf16.msra.mxu1 %v5427_v8  ;;  %v736_v8 = vld [vmem:[#allocation2 + $0xd8] sm:$0xff] }
 0x22e   : > { %5429 = vmatprep.subr.bf16.mxu1 %v8163_v0 }
 0x22f   : > { %2093 = vmatmul.mubr.f32.vlgmr.msra.gmra.mrb[0].mxu0 %v722_v58  ;;  %v798_v58 = vld [vmem:[#allocation2 + $0xc1] sm:$0xff] }
 0x230   : > { %2097 = vmatprep.mubr.f32.mxu0 %v787_v45  ;;  %5615 = vmatpush3.bf16.msra.mxu0 %v7188_v63  ;;  %v3466_v45 = vld [vmem:[#allocation7 + $0x558] sm:$0xff] }
 0x231   : > { %5431 = vmatpush1.bf16.msra.mxu1 %v5430_v40  ;;  %v5460_v61 = vpack.c.bf16 %v3466_v45, %v3465_v46  ;;  %v804_v40 = vld [vmem:[#allocation2 + $0x109] sm:$0xff]  ;;  %v3472_v45 = vld [vmem:[#allocation7 + $0x588] sm:$0xff] }
 0x232   : > { %5432 = vmatprep.subr.bf16.mxu1 %v8163_v0  ;;  %v3471_v46 = vld [vmem:[#allocation7 + $0x580] sm:$0xff] }
 0x233   : > { %2098 = vmatmul.mubr.f32.gmra.mrb[2].mxu0 %v723_v54  ;;  %v735_v54 = vld [vmem:[#allocation2 + $0xc8] sm:$0xff] }
 0x234   : > { %2102 = vmatprep.mubr.f32.mxu0 %v788_v31  ;;  %v800_v31 = vld [vmem:[#allocation2 + $0xd9] sm:$0xff] }
 0x235   : > { %5434 = vmatpush1.bf16.msra.mxu1 %v5433_v48  ;;  %v742_v48 = vld [vmem:[#allocation2 + $0x120] sm:$0xff] }
 0x236   : > { %5435 = vmatprep.subr.bf16.mxu1 %v8163_v0 }
 0x237   : > { %2103 = vmatmul.mubr.f32.gmra.mrb[4].mxu0 %v724_v59  ;;  %v738_v59 = vld [vmem:[#allocation2 + $0xf0] sm:$0xff] }
 0x238   : > { %2107 = vmatprep.mubr.f32.mxu0 %v789_v20  ;;  %v739_v20 = vld [vmem:[#allocation2 + $0xf8] sm:$0xff] }
 0x239   : > { %5437 = vmatpush1.bf16.msra.mxu1 %v5436_v25  ;;  %v743_v25 = vld [vmem:[#allocation2 + $0x128] sm:$0xff] }
 0x23a   : > { %5438 = vmatprep.subr.bf16.mxu1 %v8163_v0 }
 0x23b   : > { %2108 = vmatmul.mubr.f32.gmra.mrb[6].mxu0 %v725_v50  ;;  %v741_v50 = vld [vmem:[#allocation2 + $0x110] sm:$0xff] }
 0x23c   : > { %2112 = vmatprep.mubr.f32.mxu0 %v790_v53  ;;  %v806_v53 = vld [vmem:[#allocation2 + $0x121] sm:$0xff] }
 0x23d   : > { %5440 = vmatpush1.bf16.msra.mxu1 %v5439_v15  ;;  %v3570_v15 = vld [vmem:[#allocation7 + $0x898] sm:$0xff] }
 0x23e   : > { %5441 = vmatprep.subr.bf16.mxu1 %v8163_v0 }
 0x23f   : > { %2113 = vmatmul.mubr.f32.gmra.mrb[8].mxu0 %v726_v29  ;;  %v807_v29 = vld [vmem:[#allocation2 + $0x129] sm:$0xff] }
 0x240   : > { %2117 = vmatprep.mubr.f32.mxu0 %v791_v11  ;;  %v5463_v11 = vpack.c.bf16 %v3468_v23, %v3467_v14  ;;  %v816_v14 = vld [vmem:[#allocation2 + $0x199] sm:$0xff] }
 0x241   : > { %5443 = vmatpush1.bf16.msra.mxu1 %v5442_v24  ;;  %v744_v24 = vld [vmem:[#allocation2 + $0x138] sm:$0xff] }
 0x242   : > { %5444 = vmatprep.subr.bf16.mxu1 %v8163_v0 }
 0x243   : > { %2118 = vmatmul.mubr.f32.gmra.mrb[10].mxu0 %v727_v30  ;;  %v808_v30 = vld [vmem:[#allocation2 + $0x139] sm:$0xff] }
 0x244   : > { %2122 = vmatprep.mubr.f32.mxu0 %v792_v34  ;;  %v3569_v34 = vld [vmem:[#allocation7 + $0x890] sm:$0xff] }
 0x245   : > { %5446 = vmatpush1.bf16.msra.mxu1 %v5445_v33 }
 0x246   : > { %5447 = vmatprep.subr.bf16.mxu1 %v8163_v0 }
 0x247   : > { %2123 = vmatmul.mubr.f32.gmra.mrb[12].mxu0 %v728_v27  ;;  %v7207_v27 = vpack.c.bf16 %v3570_v15, %v3569_v34  ;;  %v3478_v34 = vld [vmem:[#allocation7 + $0x5b8] sm:$0xff] }
 0x248   : > { %2127 = vmatprep.mubr.f32.mxu0 %v793_v32 }
 0x249   : > { %5449 = vmatpush1.bf16.msra.mxu1 %v5448_v4  ;;  %8239 = vst [vmem:[#allocation15_spill] sm:$0xff] %v7207_v27  ;;  %5617 = vmatprep.subr.bf16.mxu0 %v7207_v27  ;;  %v3573_v4 = vld [vmem:[#allocation7 + $0x8b0] sm:$0xff] }
 0x24a   : > { %5450 = vmatprep.subr.bf16.mxu1 %v8163_v0  ;;  %5619 = vmatpush3.bf16.msra.mxu0 %v7207_v27  ;;  %v7553_v27 = vld [vmem:[#allocation2 + $0x121] sm:$0xff] }
 0x24b   : > { %2128 = vmatmul.mubr.f32.gmra.mrb[14].mxu0 %v729_v6  ;;  %v3571_v6 = vld [vmem:[#allocation7 + $0x8a0] sm:$0xff]  ;;  %8271 = vst [vmem:[#allocation47_spill] sm:$0xff] %v7553_v27 }
 0x24c   : > { %2132 = vmatprep.mubr.f32.mxu0 %v794_v35  ;;  %v3572_v35 = vld [vmem:[#allocation7 + $0x8a8] sm:$0xff] }
 0x24d   : > { %5452 = vmatpush1.bf16.msra.mxu1 %v5451_v42  ;;  %v7213_v33 = vpack.c.bf16 %v3572_v35, %v3571_v6  ;;  %v746_v42 = vld [vmem:[#allocation2 + $0x150] sm:$0xff] }
 0x24e   : > { %5453 = vmatprep.subr.bf16.mxu1 %v8163_v0 }
 0x24f   : > { %2133 = vmatmul.mubr.f32.gmra.mrb[16].mxu0 %v730_v12  ;;  %8240 = vst [vmem:[#allocation16_spill] sm:$0xff] %v7213_v33  ;;  %5621 = vmatprep.subr.bf16.mxu0 %v7213_v33  ;;  %v2639_v12 = vld [vmem:[#allocation2 + $0x9] sm:$0xff] }
 0x250   : > { %2137 = vmatprep.mubr.f32.mxu0 %v795_v43  ;;  %v810_v43 = vld [vmem:[#allocation2 + $0x151] sm:$0xff]  ;;  %5623 = vmatpush3.bf16.msra.mxu0 %v7213_v33 }
 0x251   : > { %5455 = vmatpush1.bf16.msra.mxu1 %v5454_v13  ;;  %v747_v13 = vld [vmem:[#allocation2 + $0x158] sm:$0xff] }
 0x252   : > { %5456 = vmatprep.subr.bf16.mxu1 %v8163_v0 }
 0x253   : > { %2138 = vmatmul.mubr.f32.gmra.mrb[18].mxu0 %v731_v5  ;;  %v7223_v5 = vpack.c.bf16 %v3574_v28, %v3573_v4  ;;  %v3483_v28 = vld [vmem:[#allocation7 + $0x5e0] sm:$0xff] }
 0x254   : > { %2142 = vmatprep.mubr.f32.mxu0 %v796_v41 }
 0x255   : > { %5458 = vmatpush1.bf16.msra.mxu1 %v5457_v16  ;;  %8241 = vst [vmem:[#allocation17_spill] sm:$0xff] %v7223_v5  ;;  %5625 = vmatprep.subr.bf16.mxu0 %v7223_v5 }
 0x256   : > { %5459 = vmatprep.subr.bf16.mxu1 %v8163_v0  ;;  %5627 = vmatpush3.bf16.msra.mxu0 %v7223_v5  ;;  %v7531_v5 = vld [vmem:[#allocation2 + $0x109] sm:$0xff] }
 0x257   : > { %2143 = vmatmul.mubr.f32.gmra.mrb[20].mxu0 %v732_v51  ;;  %v3576_v51 = vld [vmem:[#allocation7 + $0x8c8] sm:$0xff]  ;;  %8268 = vst [vmem:[#allocation44_spill] sm:$0xff] %v7531_v5 }
 0x258   : > { %2147 = vmatprep.mubr.f32.mxu0 %v797_v52  ;;  %v7230_v52 = vpack.c.bf16 %v3576_v51, %v3575_v49 }
 0x259   : > { %5461 = vmatpush1.bf16.msra.mxu1 %v5460_v61  ;;  %v5469_v61 = vpack.c.bf16 %v3472_v45, %v3471_v46  ;;  %v3487_v45 = vld [vmem:[#allocation7 + $0x600] sm:$0xff] }
 0x25a   : > { %5462 = vmatprep.subr.bf16.mxu1 %v8163_v0  ;;  %8242 = vst [vmem:[#allocation18_spill] sm:$0xff] %v7230_v52  ;;  %5629 = vmatprep.subr.bf16.mxu0 %v7230_v52 }
 0x25b   : > { %2148 = vmatmul.mubr.f32.gmra.mrb[22].mxu0 %v733_v60  ;;  %v3578_v60 = vld [vmem:[#allocation7 + $0x8d8] sm:$0xff] }
 0x25c   : > { %2152 = vmatprep.mubr.f32.mxu0 %v798_v58  ;;  %5631 = vmatpush3.bf16.msra.mxu0 %v7230_v52  ;;  %v7236_v16 = vpack.c.bf16 %v3578_v60, %v3577_v10 }
 0x25d   : > { %5464 = vmatpush1.bf16.msra.mxu1 %v5463_v11  ;;  %v3476_v11 = vld [vmem:[#allocation7 + $0x5a8] sm:$0xff] }
 0x25e   : > { %5465 = vmatprep.subr.bf16.mxu1 %v8163_v0  ;;  %8243 = vst [vmem:[#allocation19_spill] sm:$0xff] %v7236_v16  ;;  %5633 = vmatprep.subr.bf16.mxu0 %v7236_v16 }
 0x25f   : > { %2153 = vmatmul.mubr.f32.gmra.mrb[24].mxu0 %v734_v2 }
 0x260   : > { %2157 = vmatprep.mubr.f32.mxu0 %v799_v55  ;;  %v748_v55 = vld [vmem:[#allocation2 + $0x168] sm:$0xff]  ;;  %5635 = vmatpush3.bf16.msra.mxu0 %v7236_v16  ;;  %v7509_v16 = vld [vmem:[#allocation2 + $0xf1] sm:$0xff] }
 0x261   : > { %5467 = vmatpush1.bf16.msra.mxu1 %v5466_v62  ;;  %8266 = vst [vmem:[#allocation42_spill] sm:$0xff] %v7509_v16 }
 0x262   : > { %5468 = vmatprep.subr.bf16.mxu1 %v8163_v0 }
 0x263   : > { %2158 = vmatmul.mubr.f32.gmra.mrb[26].mxu0 %v735_v54  ;;  %v813_v54 = vld [vmem:[#allocation2 + $0x171] sm:$0xff] }
 0x264   : > { %2162 = vmatprep.mubr.f32.mxu0 %v800_v31  ;;  %3656 = vmatmul.mubr.f32.vlgmr.msra.gmra.mrb[32].mxu1 %v7215_v7  ;;  %v3579_v31 = vld [vmem:[#allocation7 + $0x8e0] sm:$0xff] }
 0x265   : > { %3660 = vmatprep.mubr.f32.mxu1 %v2639_v12  ;;  %5470 = vmatpush1.bf16.msra.mxu1 %v5469_v61 }
 0x266   : > { %5471 = vmatprep.subr.bf16.mxu1 %v8163_v0 }
 0x267   : > { %2163 = vmatmul.mubr.f32.gmra.mrb[28].mxu0 %v736_v8  ;;  %v3580_v8 = vld [vmem:[#allocation7 + $0x8e8] sm:$0xff] }
 0x268   : > { %2167 = vmatprep.mubr.f32.mxu0 %v801_v26  ;;  %3661 = vmatmul.mubr.f32.gmra.mrb[34].mxu1 %v7215_v7  ;;  %v7242_v26 = vpack.c.bf16 %v3580_v8, %v3579_v31  ;;  %v3489_v8 = vld [vmem:[#allocation7 + $0x610] sm:$0xff] }
 0x26a   : > { %8244 = vst [vmem:[#allocation20_spill] sm:$0xff] %v7242_v26  ;;  %5637 = vmatprep.subr.bf16.mxu0 %v7242_v26 }
 0x26b   : > { %2168 = vmatmul.mubr.f32.gmra.mrb[30].mxu0 %v737_v19  ;;  %v749_v19 = vld [vmem:[#allocation2 + $0x170] sm:$0xff] }
 0x26c   : > { %2172 = vmatprep.mubr.f32.mxu0 %v802_v17  ;;  %5639 = vmatpush3.bf16.msra.mxu0 %v7242_v26  ;;  %v3581_v17 = vld [vmem:[#allocation7 + $0x8f0] sm:$0xff] }
 0x26f   : > { %2173 = vmatmul.mubr.f32.gmra.mrb[32].mxu0 %v738_v59  ;;  %v3582_v59 = vld [vmem:[#allocation7 + $0x8f8] sm:$0xff] }
 0x270   : > { %2177 = vmatprep.mubr.f32.mxu0 %v803_v37 }
 0x273   : > { %2178 = vmatmul.mubr.f32.gmra.mrb[34].mxu0 %v739_v20  ;;  %v7249_v20 = vpack.c.bf16 %v3582_v59, %v3581_v17 }
 0x274   : > { %2182 = vmatprep.mubr.f32.mxu0 %v804_v40  ;;  %v3473_v40 = vld [vmem:[#allocation7 + $0x590] sm:$0xff] }
 0x275   : > { %8245 = vst [vmem:[#allocation21_spill] sm:$0xff] %v7249_v20  ;;  %5641 = vmatprep.subr.bf16.mxu0 %v7249_v20 }
 0x276   : > { %5643 = vmatpush3.bf16.msra.mxu0 %v7249_v20  ;;  %v7487_v20 = vld [vmem:[#allocation2 + $0xd9] sm:$0xff] }
 0x277   : > { %2183 = vmatmul.mubr.f32.gmra.mrb[36].mxu0 %v740_v44  ;;  %v3474_v44 = vld [vmem:[#allocation7 + $0x598] sm:$0xff]  ;;  %8264 = vst [vmem:[#allocation40_spill] sm:$0xff] %v7487_v20 }
 0x278   : > { %2187 = vmatprep.mubr.f32.mxu0 %v805_v21 }
 0x27b   : > { %2188 = vmatmul.mubr.f32.gmra.mrb[38].mxu0 %v741_v50  ;;  %v7253_v50 = vld [vmem:[#allocation2 + $0x181] sm:$0xff] }
 0x27c   : > { %2192 = vmatprep.mubr.f32.mxu0 %v806_v53  ;;  %8246 = vst [vmem:[#allocation22_spill] sm:$0xff] %v7253_v50  ;;  %v5472_v53 = vpack.c.bf16 %v3474_v44, %v3473_v40  ;;  %v3491_v44 = vld [vmem:[#allocation7 + $0x620] sm:$0xff] }
 0x27d   : > { %v7205_v18 = vpop.f32.mrb[0].mxu1 }
 0x27e   : > { %v7209_v32 = vpop.f32.mrb[1].mxu1  ;;  %5473 = vmatpush1.bf16.msra.mxu1 %v5472_v53  ;;  %v3492_v53 = vld [vmem:[#allocation7 + $0x628] sm:$0xff] }
 0x27f   : > { %2193 = vmatmul.mubr.f32.gmra.mrb[40].mxu0 %v742_v48  ;;  %5474 = vmatprep.subr.bf16.mxu1 %v8163_v0  ;;  %v7260_v48 = vld [vmem:[#allocation2 + $0x189] sm:$0xff] }
 0x280   : > { %2197 = vmatprep.mubr.f32.mxu0 %v807_v29  ;;  %8247 = vst [vmem:[#allocation23_spill] sm:$0xff] %v7260_v48  ;;  %v3475_v29 = vld [vmem:[#allocation7 + $0x5a0] sm:$0xff] }
 0x281   : > { %v7221_v38 = vpop.f32.mrb[2].mxu1  ;;  %v5475_v1 = vpack.c.bf16 %v3476_v11, %v3475_v29  ;;  %v5499_v29 = vpack.c.bf16 %v3492_v53, %v3491_v44  ;;  %v3502_v44 = vld [vmem:[#allocation7 + $0x678] sm:$0xff] }
 0x282   : > { %v7226_v41 = vpop.f32.mrb[3].mxu1 }
 0x283   : > { %2198 = vmatmul.mubr.f32.gmra.mrb[42].mxu0 %v743_v25  ;;  %5476 = vmatpush1.bf16.msra.mxu1 %v5475_v1  ;;  %v3493_v1 = vld [vmem:[#allocation7 + $0x630] sm:$0xff] }
 0x284   : > { %2202 = vmatprep.mubr.f32.mxu0 %v808_v30  ;;  %5477 = vmatprep.subr.bf16.mxu1 %v8163_v0  ;;  %v3477_v30 = vld [vmem:[#allocation7 + $0x5b0] sm:$0xff] }
 0x285   : > { %v7234_v58 = vpop.f32.mrb[4].mxu1  ;;  %v5478_v15 = vpack.c.bf16 %v3478_v34, %v3477_v30 }
 0x286   : > { %v7238_v2 = vpop.f32.mrb[5].mxu1 }
 0x287   : > { %2203 = vmatmul.mubr.f32.gmra.mrb[44].mxu0 %v744_v24  ;;  %5479 = vmatpush1.bf16.msra.mxu1 %v5478_v15  ;;  %v3479_v24 = vld [vmem:[#allocation7 + $0x5c0] sm:$0xff] }
 0x288   : > { %2207 = vmatprep.mubr.f32.mxu0 %v809_v9  ;;  %5480 = vmatprep.subr.bf16.mxu1 %v8163_v0  ;;  %v5481_v6 = vpack.c.bf16 %v3480_v3, %v3479_v24  ;;  %v3495_v24 = vld [vmem:[#allocation7 + $0x640] sm:$0xff]  ;;  %v3496_v3 = vld [vmem:[#allocation7 + $0x648] sm:$0xff] }
 0x289   : > { %v7247_v37 = vpop.f32.mrb[6].mxu1 }
 0x28a   : > { %v7251_v21 = vpop.f32.mrb[7].mxu1 }
 0x28b   : > { %2208 = vmatmul.mubr.f32.gmra.mrb[46].mxu0 %v745_v36  ;;  %5482 = vmatpush1.bf16.msra.mxu1 %v5481_v6  ;;  %v3482_v36 = vld [vmem:[#allocation7 + $0x5d8] sm:$0xff] }
 0x28c   : > { %2212 = vmatprep.mubr.f32.mxu0 %v810_v43  ;;  %5483 = vmatprep.subr.bf16.mxu1 %v8163_v0 }
 0x28d   : > { %v7263_v23 = vpop.f32.mrb[8].mxu1 }
 0x28e   : > { %v7266_v25 = vpop.f32.mrb[9].mxu1 }
 0x28f   : > { %2213 = vmatmul.mubr.f32.gmra.mrb[48].mxu0 %v746_v42  ;;  %v3484_v42 = vld [vmem:[#allocation7 + $0x5e8] sm:$0xff] }
 0x290   : > { %2217 = vmatprep.mubr.f32.mxu0 %v811_v47  ;;  %v5487_v49 = vpack.c.bf16 %v3484_v42, %v3483_v28 }
 0x293   : > { %2218 = vmatmul.mubr.f32.gmra.mrb[50].mxu0 %v747_v13  ;;  %v3485_v13 = vld [vmem:[#allocation7 + $0x5f0] sm:$0xff] }
 0x294   : > { %2222 = vmatprep.mubr.f32.mxu0 %v812_v56  ;;  %v3486_v56 = vld [vmem:[#allocation7 + $0x5f8] sm:$0xff] }
 0x295   : > { %v5490_v60 = vpack.c.bf16 %v3486_v56, %v3485_v13  ;;  %v7326_v13 = vld [vmem:[#allocation9] ss:$0 sm:$0xff] }
 0x296   : > { %v3499_v56 = vld [vmem:[#allocation7 + $0x660] sm:$0xff] }
 0x297   : > { %2223 = vmatmul.mubr.f32.gmra.mrb[52].mxu0 %v748_v55  ;;  %v3488_v55 = vld [vmem:[#allocation7 + $0x608] sm:$0xff] }
 0x298   : > { %2227 = vmatprep.mubr.f32.mxu0 %v813_v54  ;;  %v5493_v54 = vpack.c.bf16 %v3488_v55, %v3487_v45 }
 0x29b   : > { %2228 = vmatmul.mubr.f32.gmra.mrb[54].mxu0 %v749_v19  ;;  %v3490_v19 = vld [vmem:[#allocation7 + $0x618] sm:$0xff] }
 0x29c   : > { %2232 = vmatprep.mubr.f32.mxu0 %v7253_v50  ;;  %v5496_v59 = vpack.c.bf16 %v3490_v19, %v3489_v8 }
 0x29f   : > { %2233 = vmatmul.mubr.f32.gmra.mrb[56].mxu0 %v7098_v39  ;;  %v7270_v39 = vpop.f32.mrb[10].mxu1 }
 0x2a0   : > { %2237 = vmatprep.mubr.f32.mxu0 %v7260_v48 }
 0x2a3   : > { %2238 = vmatmul.mubr.f32.gmra.mrb[58].mxu0 %v7104_v22  ;;  %v7273_v22 = vpop.f32.mrb[11].mxu1 }
 0x2a4   : > { %2242 = vmatprep.mubr.f32.mxu0 %v816_v14  ;;  %v7276_v62 = vpop.f32.mrb[12].mxu1 }
 0x2a5   : > { %v7278_v9 = vpop.f32.mrb[13].mxu1 }
 0x2a6   : > { %v7281_v35 = vpop.f32.mrb[14].mxu1 }
 0x2a7   : > { %2243 = vmatmul.mubr.f32.gmra.mrb[60].mxu0 %v7215_v7  ;;  %v7283_v12 = vpop.f32.mrb[15].mxu1 }
 0x2a8   : > { %2247 = vmatprep.mubr.f32.mxu0 %v817_v57  ;;  %v7286_v4 = vpop.f32.mrb[16].mxu1  ;;  %v3494_v57 = vld [vmem:[#allocation7 + $0x638] sm:$0xff] }
 0x2a9   : > { %v7288_v47 = vpop.f32.mrb[17].mxu1  ;;  %v5502_v34 = vpack.c.bf16 %v3494_v57, %v3493_v1  ;;  %v7331_v1 = vld [vmem:[#allocation2 + $0x19] sm:$0xff] }
 0x2aa   : > { %v7291_v51 = vpop.f32.mrb[18].mxu1  ;;  %8248 = vst [vmem:[#allocation24_spill] sm:$0xff] %v7331_v1 }
 0x2ab   : > { %2248 = vmatmul.mubr.f32.gmra.mrb[62].mxu0 %v7215_v7  ;;  %v3481_v7 = vld [vmem:[#allocation7 + $0x5d0] sm:$0xff]  ;;  %v7293_v10 = vpop.f32.mrb[19].mxu1 }
 0x2ac   : > { %v5484_v43 = vpack.c.bf16 %v3482_v36, %v3481_v7  ;;  %v7296_v46 = vpop.f32.mrb[20].mxu1  ;;  %v5505_v7 = vpack.c.bf16 %v3496_v3, %v3495_v24  ;;  %v3497_v36 = vld [vmem:[#allocation7 + $0x650] sm:$0xff] }
 0x2ad   : > { %v7298_v61 = vpop.f32.mrb[21].mxu1 }
 0x2ae   : > { %5485 = vmatpush1.bf16.msra.mxu1 %v5484_v43  ;;  %v7301_v31 = vpop.f32.mrb[22].mxu1  ;;  %v3498_v43 = vld [vmem:[#allocation7 + $0x658] sm:$0xff] }
 0x2af   : > { %5486 = vmatprep.subr.bf16.mxu1 %v8163_v0  ;;  %v7303_v17 = vpop.f32.mrb[23].mxu1  ;;  %v5508_v42 = vpack.c.bf16 %v3498_v43, %v3497_v36  ;;  %v7337_v36 = vld [vmem:[#allocation2 + $0x21] sm:$0xff] }
 0x2b0   : > { %v7306_v40 = vpop.f32.mrb[24].mxu1  ;;  %8249 = vst [vmem:[#allocation25_spill] sm:$0xff] %v7337_v36 }
 0x2b1   : > { %v7308_v14 = vpop.f32.mrb[25].mxu1 }
 0x2b2   : > { %5488 = vmatpush1.bf16.msra.mxu1 %v5487_v49  ;;  %v7311_v11 = vpop.f32.mrb[26].mxu1 }
 0x2b3   : > { %5489 = vmatprep.subr.bf16.mxu1 %v8163_v0  ;;  %v7313_v30 = vpop.f32.mrb[27].mxu1 }
 0x2b5   : > { %v7316_v15 = vpop.f32.mrb[28].mxu1 }
 0x2b6   : > { %5491 = vmatpush1.bf16.msra.mxu1 %v5490_v60  ;;  %v7318_v6 = vpop.f32.mrb[29].mxu1  ;;  %v3500_v60 = vld [vmem:[#allocation7 + $0x668] sm:$0xff] }
 0x2b7   : > { %5492 = vmatprep.subr.bf16.mxu1 %v8163_v0  ;;  %v5511_v55 = vpack.c.bf16 %v3500_v60, %v3499_v56 }
 0x2ba   : > { %5494 = vmatpush1.bf16.msra.mxu1 %v5493_v54 }
 0x2bb   : > { %5495 = vmatprep.subr.bf16.mxu1 %v8163_v0 }
 0x2be   : > { %5497 = vmatpush1.bf16.msra.mxu1 %v5496_v59  ;;  %v3501_v59 = vld [vmem:[#allocation7 + $0x670] sm:$0xff] }
 0x2bf   : > { %5498 = vmatprep.subr.bf16.mxu1 %v8163_v0 }
 0x2c2   : > { %5500 = vmatpush1.bf16.msra.mxu1 %v5499_v29  ;;  %v5514_v29 = vpack.c.bf16 %v3502_v44, %v3501_v59 }
 0x2c3   : > { %5501 = vmatprep.subr.bf16.mxu1 %v8163_v0 }
 0x2c6   : > { %5503 = vmatpush1.bf16.msra.mxu1 %v5502_v34 }
 0x2c7   : > { %5504 = vmatprep.subr.bf16.mxu1 %v8163_v0 }
 0x2ca   : > { %5506 = vmatpush1.bf16.msra.mxu1 %v5505_v7 }
 0x2cb   : > { %5507 = vmatprep.subr.bf16.mxu1 %v8163_v0 }
 0x2ce   : > { %5509 = vmatpush1.bf16.msra.mxu1 %v5508_v42 }
 0x2cf   : > { %5510 = vmatprep.subr.bf16.mxu1 %v8163_v0 }
 0x2d2   : > { %5512 = vmatpush1.bf16.msra.mxu1 %v5511_v55 }
 0x2d3   : > { %5513 = vmatprep.subr.bf16.mxu1 %v8163_v0 }
 0x2d6   : > { %5515 = vmatpush1.bf16.msra.mxu1 %v5514_v29 }
 0x2d7   : > { %5516 = vmatprep.subr.bf16.mxu1 %v8163_v0  ;;  %v7399_v0 = vld [vmem:[#allocation2 + $0x79] sm:$0xff] }
 0x2d8   : > { %8256 = vst [vmem:[#allocation32_spill] sm:$0xff] %v7399_v0 }
 0x2e8   : > { %v7321_v28 = vpop.f32.mrb[30].mxu1 }
 0x2e9   : > { %v7323_v49 = vpop.f32.mrb[31].mxu1 }
 0x302   : > { %v2094_v45 = vpop.f32.mrb[0].mxu0 }
 0x303   : > { %v5660_v54 = vadd.f32 %v7326_v13, %v2094_v45  ;;  %v2096_v8 = vpop.f32.mrb[1].mxu0 }
 0x305   : > { %v2320_v19 = vadd.f32 %v5660_v54, %v7209_v32  ;;  %v7342_v54 = vld [vmem:[#allocation2 + $0x31] sm:$0xff] }
 0x306   : > { %v2099_v53 = vpop.f32.mrb[2].mxu0  ;;  %8250 = vst [vmem:[#allocation26_spill] sm:$0xff] %v7342_v54 }
 0x307   : > { %v2478_v57 = vadd.f32 %v7331_v1, %v2320_v19  ;;  %v5661_v34 = vadd.f32 %v7326_v13, %v2099_v53  ;;  %v2101_v24 = vpop.f32.mrb[3].mxu0 }
 0x309   : > { %v2510_v3 = vmax.f32 %v2478_v57, 0.0  ;;  %v2325_v7 = vadd.f32 %v5661_v34, %v7205_v18  ;;  %v7349_v57 = vld [vmem:[#allocation2 + $0x39] sm:$0xff] }
 0x30a   : > { %v2104_v32 = vpop.f32.mrb[4].mxu0  ;;  %8251 = vst [vmem:[#allocation27_spill] sm:$0xff] %v7349_v57 }
 0x30b   : > { %2542 = vst [vmem:[#allocation2 + $0x19] sm:$0xff] %v2510_v3  ;;  %v2479_v43 = vadd.f32 %v7337_v36, %v2325_v7  ;;  %v5662_v42 = vadd.f32 %v7326_v13, %v2104_v32  ;;  %v2106_v56 = vpop.f32.mrb[5].mxu0  ;;  %3665 = vmatprep.mubr.f32.mxu1 %v2510_v3  ;;  %v7465_v36 = vld [vmem:[#allocation2 + $0xc1] sm:$0xff] }
 0x30c   : > { %8262 = vst [vmem:[#allocation38_spill] sm:$0xff] %v7465_v36 }
 0x30d   : > { %v2511_v60 = vmax.f32 %v2479_v43, 0.0  ;;  %v2330_v45 = vadd.f32 %v5662_v42, %v7226_v41 }
 0x30e   : > { %v2109_v55 = vpop.f32.mrb[6].mxu0 }
 0x30f   : > { %2543 = vst [vmem:[#allocation2 + $0x21] sm:$0xff] %v2511_v60  ;;  %v2480_v18 = vadd.f32 %v7342_v54, %v2330_v45  ;;  %v5663_v8 = vadd.f32 %v7326_v13, %v2109_v55  ;;  %v2111_v19 = vpop.f32.mrb[7].mxu0 }
 0x311   : > { %v2512_v59 = vmax.f32 %v2480_v18, 0.0  ;;  %v2335_v44 = vadd.f32 %v5663_v8, %v7221_v38  ;;  %v7357_v38 = vld [vmem:[#allocation2 + $0x49] sm:$0xff] }
 0x312   : > { %v2114_v53 = vpop.f32.mrb[8].mxu0  ;;  %v7347_v29 = vld [vmem:[#allocation2 + $0x18] sm:$0xff]  ;;  %8252 = vst [vmem:[#allocation28_spill] sm:$0xff] %v7357_v38 }
 0x313   : > { %2544 = vst [vmem:[#allocation2 + $0x31] sm:$0xff] %v2512_v59  ;;  %v2481_v41 = vadd.f32 %v7349_v57, %v2335_v44  ;;  %v5664_v34 = vadd.f32 %v7326_v13, %v2114_v53  ;;  %v2116_v24 = vpop.f32.mrb[9].mxu0  ;;  %3666 = vmatmul.mubr.f32.gmra.mrb[36].mxu1 %v7347_v29  ;;  %v7443_v57 = vld [vmem:[#allocation2 + $0xa9] sm:$0xff] }
 0x314   : > { %3670 = vmatprep.mubr.f32.mxu1 %v2511_v60  ;;  %8260 = vst [vmem:[#allocation36_spill] sm:$0xff] %v7443_v57 }
 0x315   : > { %v2513_v3 = vmax.f32 %v2481_v41, 0.0  ;;  %v2340_v7 = vadd.f32 %v5664_v34, %v7238_v2  ;;  %v7365_v2 = vld [vmem:[#allocation2 + $0x51] sm:$0xff] }
 0x316   : > { %v2119_v32 = vpop.f32.mrb[10].mxu0  ;;  %v7355_v43 = vld [vmem:[#allocation2 + $0x20] sm:$0xff]  ;;  %8253 = vst [vmem:[#allocation29_spill] sm:$0xff] %v7365_v2 }
 0x317   : > { %2545 = vst [vmem:[#allocation2 + $0x39] sm:$0xff] %v2513_v3  ;;  %v2482_v42 = vadd.f32 %v7357_v38, %v2340_v7  ;;  %v5665_v56 = vadd.f32 %v7326_v13, %v2119_v32  ;;  %v2121_v45 = vpop.f32.mrb[11].mxu0  ;;  %3671 = vmatmul.mubr.f32.gmra.mrb[38].mxu1 %v7355_v43  ;;  %v7377_v32 = vld [vmem:[#allocation2 + $0x61] sm:$0xff] }
 0x318   : > { %3675 = vmatprep.mubr.f32.mxu1 %v2512_v59  ;;  %8254 = vst [vmem:[#allocation30_spill] sm:$0xff] %v7377_v32 }
 0x319   : > { %v2514_v55 = vmax.f32 %v2482_v42, 0.0  ;;  %v2345_v60 = vadd.f32 %v5665_v56, %v7234_v58 }
 0x31a   : > { %v2124_v18 = vpop.f32.mrb[12].mxu0  ;;  %v7363_v8 = vld [vmem:[#allocation2 + $0x30] sm:$0xff] }
 0x31b   : > { %2546 = vst [vmem:[#allocation2 + $0x49] sm:$0xff] %v2514_v55  ;;  %v2483_v19 = vadd.f32 %v7365_v2, %v2345_v60  ;;  %v5666_v44 = vadd.f32 %v7326_v13, %v2124_v18  ;;  %v2126_v53 = vpop.f32.mrb[13].mxu0  ;;  %3676 = vmatmul.mubr.f32.gmra.mrb[40].mxu1 %v7363_v8  ;;  %v7421_v2 = vld [vmem:[#allocation2 + $0x91] sm:$0xff] }
 0x31c   : > { %3680 = vmatprep.mubr.f32.mxu1 %v2513_v3  ;;  %8258 = vst [vmem:[#allocation34_spill] sm:$0xff] %v7421_v2 }
 0x31d   : > { %v2515_v41 = vmax.f32 %v2483_v19, 0.0  ;;  %v2350_v59 = vadd.f32 %v5666_v44, %v7251_v21  ;;  %v7387_v19 = vld [vmem:[#allocation2 + $0x69] sm:$0xff] }
 0x31e   : > { %v2129_v34 = vpop.f32.mrb[14].mxu0  ;;  %v7371_v24 = vld [vmem:[#allocation2 + $0x32] sm:$0xff]  ;;  %v7375_v7 = vld [vmem:[#allocation2 + $0x3a] sm:$0xff]  ;;  %8255 = vst [vmem:[#allocation31_spill] sm:$0xff] %v7387_v19 }
 0x31f   : > { %v7373_v58 = vld [vmem:[#allocation2 + $0x38] sm:$0xff]  ;;  %2547 = vst [vmem:[#allocation2 + $0x51] sm:$0xff] %v2515_v41  ;;  %v2484_v42 = vadd.f32 %v7377_v32, %v2350_v59  ;;  %v5667_v56 = vadd.f32 %v7326_v13, %v2129_v34  ;;  %v2131_v45 = vpop.f32.mrb[15].mxu0  ;;  %5148 = vmatprep.mubr.f32.mxu0 %v7371_v24 }
 0x320   : > { %3681 = vmatmul.mubr.f32.gmra.mrb[42].mxu1 %v7373_v58  ;;  %5149 = vmatmul.mubr.f32.vlgmr.msra.gmra.mrb[64].mxu0 %v7375_v7 }
 0x321   : > { %3685 = vmatprep.mubr.f32.mxu1 %v2514_v55  ;;  %v2516_v21 = vmax.f32 %v2484_v42, 0.0  ;;  %v2355_v3 = vadd.f32 %v5667_v56, %v7247_v37 }
 0x322   : > { %v2134_v60 = vpop.f32.mrb[16].mxu0  ;;  %v7385_v18 = vld [vmem:[#allocation2 + $0x48] sm:$0xff] }
 0x323   : > { %2548 = vst [vmem:[#allocation2 + $0x61] sm:$0xff] %v2516_v21  ;;  %v2485_v44 = vadd.f32 %v7387_v19, %v2355_v3  ;;  %v5668_v53 = vadd.f32 %v7326_v13, %v2134_v60  ;;  %v2136_v59 = vpop.f32.mrb[17].mxu0  ;;  %v7409_v19 = vld [vmem:[#allocation2 + $0x81] sm:$0xff] }
 0x324   : > { %3686 = vmatmul.mubr.f32.gmra.mrb[44].mxu1 %v7385_v18  ;;  %8257 = vst [vmem:[#allocation33_spill] sm:$0xff] %v7409_v19 }
 0x325   : > { %3690 = vmatprep.mubr.f32.mxu1 %v2515_v41  ;;  %v2517_v34 = vmax.f32 %v2485_v44, 0.0  ;;  %v2360_v55 = vadd.f32 %v5668_v53, %v7266_v25 }
 0x326   : > { %v2139_v42 = vpop.f32.mrb[18].mxu0  ;;  %v7393_v45 = vld [vmem:[#allocation2 + $0x4a] sm:$0xff]  ;;  %v7397_v56 = vld [vmem:[#allocation2 + $0x52] sm:$0xff] }
 0x327   : > { %v7395_v37 = vld [vmem:[#allocation2 + $0x50] sm:$0xff]  ;;  %2549 = vst [vmem:[#allocation2 + $0x69] sm:$0xff] %v2517_v34  ;;  %v2486_v3 = vadd.f32 %v7399_v0, %v2360_v55  ;;  %v5669_v60 = vadd.f32 %v7326_v13, %v2139_v42  ;;  %v2141_v59 = vpop.f32.mrb[19].mxu0  ;;  %5151 = vmatprep.mubr.f32.mxu0 %v7393_v45 }
 0x328   : > { %3691 = vmatmul.mubr.f32.gmra.mrb[46].mxu1 %v7395_v37  ;;  %5152 = vmatmul.mubr.f32.gmra.mrb[66].mxu0 %v7397_v56 }
 0x329   : > { %3695 = vmatprep.mubr.f32.mxu1 %v2516_v21  ;;  %v2518_v25 = vmax.f32 %v2486_v3, 0.0  ;;  %v2365_v41 = vadd.f32 %v5669_v60, %v7263_v23 }
 0x32a   : > { %v2144_v44 = vpop.f32.mrb[20].mxu0  ;;  %v7407_v53 = vld [vmem:[#allocation2 + $0x60] sm:$0xff] }
 0x32b   : > { %2550 = vst [vmem:[#allocation2 + $0x79] sm:$0xff] %v2518_v25  ;;  %v2487_v55 = vadd.f32 %v7409_v19, %v2365_v41  ;;  %v5670_v42 = vadd.f32 %v7326_v13, %v2144_v44  ;;  %v2146_v59 = vpop.f32.mrb[21].mxu0  ;;  %v7431_v19 = vld [vmem:[#allocation2 + $0x99] sm:$0xff] }
 0x32c   : > { %3696 = vmatmul.mubr.f32.gmra.mrb[48].mxu1 %v7407_v53  ;;  %8259 = vst [vmem:[#allocation35_spill] sm:$0xff] %v7431_v19 }
 0x32d   : > { %3700 = vmatprep.mubr.f32.mxu1 %v2517_v34  ;;  %v2519_v0 = vmax.f32 %v2487_v55, 0.0  ;;  %v2370_v21 = vadd.f32 %v5670_v42, %v7273_v22 }
 0x32e   : > { %v2149_v3 = vpop.f32.mrb[22].mxu0  ;;  %v7415_v32 = vld [vmem:[#allocation2 + $0x62] sm:$0xff]  ;;  %v7419_v60 = vld [vmem:[#allocation2 + $0x6a] sm:$0xff] }
 0x32f   : > { %v7417_v23 = vld [vmem:[#allocation2 + $0x68] sm:$0xff]  ;;  %2551 = vst [vmem:[#allocation2 + $0x81] sm:$0xff] %v2519_v0  ;;  %v2488_v41 = vadd.f32 %v7421_v2, %v2370_v21  ;;  %v5671_v44 = vadd.f32 %v7326_v13, %v2149_v3  ;;  %v2151_v59 = vpop.f32.mrb[23].mxu0  ;;  %5154 = vmatprep.mubr.f32.mxu0 %v7415_v32 }
 0x330   : > { %3701 = vmatmul.mubr.f32.gmra.mrb[50].mxu1 %v7417_v23  ;;  %5155 = vmatmul.mubr.f32.gmra.mrb[68].mxu0 %v7419_v60 }
 0x331   : > { %3705 = vmatprep.mubr.f32.mxu1 %v2518_v25  ;;  %v2520_v22 = vmax.f32 %v2488_v41, 0.0  ;;  %v2375_v34 = vadd.f32 %v5671_v44, %v7270_v39 }
 0x332   : > { %v2154_v55 = vpop.f32.mrb[24].mxu0  ;;  %v7429_v42 = vld [vmem:[#allocation2 + $0x78] sm:$0xff] }
 0x333   : > { %2552 = vst [vmem:[#allocation2 + $0x91] sm:$0xff] %v2520_v22  ;;  %v2489_v21 = vadd.f32 %v7431_v19, %v2375_v34  ;;  %v5672_v3 = vadd.f32 %v7326_v13, %v2154_v55  ;;  %v2156_v59 = vpop.f32.mrb[25].mxu0  ;;  %v7453_v19 = vld [vmem:[#allocation2 + $0xb1] sm:$0xff] }
 0x334   : > { %3706 = vmatmul.mubr.f32.gmra.mrb[52].mxu1 %v7429_v42  ;;  %8261 = vst [vmem:[#allocation37_spill] sm:$0xff] %v7453_v19 }
 0x335   : > { %3710 = vmatprep.mubr.f32.mxu1 %v2519_v0  ;;  %v2521_v2 = vmax.f32 %v2489_v21, 0.0  ;;  %v2380_v25 = vadd.f32 %v5672_v3, %v7278_v9 }
 0x336   : > { %v2159_v41 = vpop.f32.mrb[26].mxu0  ;;  %v7437_v38 = vld [vmem:[#allocation2 + $0x7a] sm:$0xff]  ;;  %v7441_v44 = vld [vmem:[#allocation2 + $0x82] sm:$0xff] }
 0x337   : > { %v7439_v39 = vld [vmem:[#allocation2 + $0x80] sm:$0xff]  ;;  %2553 = vst [vmem:[#allocation2 + $0x99] sm:$0xff] %v2521_v2  ;;  %v2490_v34 = vadd.f32 %v7443_v57, %v2380_v25  ;;  %v5673_v55 = vadd.f32 %v7326_v13, %v2159_v41  ;;  %v2161_v59 = vpop.f32.mrb[27].mxu0  ;;  %5157 = vmatprep.mubr.f32.mxu0 %v7437_v38 }
 0x338   : > { %3711 = vmatmul.mubr.f32.gmra.mrb[54].mxu1 %v7439_v39  ;;  %5158 = vmatmul.mubr.f32.gmra.mrb[70].mxu0 %v7441_v44 }
 0x339   : > { %3715 = vmatprep.mubr.f32.mxu1 %v2520_v22  ;;  %v2522_v0 = vmax.f32 %v2490_v34, 0.0  ;;  %v2385_v9 = vadd.f32 %v5673_v55, %v7276_v62 }
 0x33a   : > { %v2164_v21 = vpop.f32.mrb[28].mxu0  ;;  %v7451_v3 = vld [vmem:[#allocation2 + $0x90] sm:$0xff] }
 0x33b   : > { %2554 = vst [vmem:[#allocation2 + $0xa9] sm:$0xff] %v2522_v0  ;;  %v2491_v25 = vadd.f32 %v7453_v19, %v2385_v9  ;;  %v5674_v41 = vadd.f32 %v7326_v13, %v2164_v21  ;;  %v2166_v59 = vpop.f32.mrb[29].mxu0  ;;  %v7475_v19 = vld [vmem:[#allocation2 + $0xc9] sm:$0xff] }
 0x33c   : > { %3716 = vmatmul.mubr.f32.gmra.mrb[56].mxu1 %v7451_v3  ;;  %8263 = vst [vmem:[#allocation39_spill] sm:$0xff] %v7475_v19 }
 0x33d   : > { %3720 = vmatprep.mubr.f32.mxu1 %v2521_v2  ;;  %v2523_v57 = vmax.f32 %v2491_v25, 0.0  ;;  %v2390_v22 = vadd.f32 %v5674_v41, %v7283_v12 }
 0x33e   : > { %v2169_v34 = vpop.f32.mrb[30].mxu0  ;;  %v7459_v54 = vld [vmem:[#allocation2 + $0x92] sm:$0xff]  ;;  %v7463_v55 = vld [vmem:[#allocation2 + $0x9a] sm:$0xff] }
 0x33f   : > { %v7461_v62 = vld [vmem:[#allocation2 + $0x98] sm:$0xff]  ;;  %2555 = vst [vmem:[#allocation2 + $0xb1] sm:$0xff] %v2523_v57  ;;  %v2492_v9 = vadd.f32 %v7465_v36, %v2390_v22  ;;  %v5675_v21 = vadd.f32 %v7326_v13, %v2169_v34  ;;  %v2171_v59 = vpop.f32.mrb[31].mxu0  ;;  %5160 = vmatprep.mubr.f32.mxu0 %v7459_v54 }
 0x340   : > { %3721 = vmatmul.mubr.f32.gmra.mrb[58].mxu1 %v7461_v62  ;;  %5161 = vmatmul.mubr.f32.gmra.mrb[72].mxu0 %v7463_v55 }
 0x341   : > { %3725 = vmatprep.mubr.f32.mxu1 %v2522_v0  ;;  %v2524_v12 = vmax.f32 %v2492_v9, 0.0  ;;  %v2395_v2 = vadd.f32 %v5675_v21, %v7281_v35 }
 0x342   : > { %v2174_v25 = vpop.f32.mrb[32].mxu0  ;;  %v7473_v41 = vld [vmem:[#allocation2 + $0xa8] sm:$0xff] }
 0x343   : > { %2556 = vst [vmem:[#allocation2 + $0xc1] sm:$0xff] %v2524_v12  ;;  %v2493_v22 = vadd.f32 %v7475_v19, %v2395_v2  ;;  %v5676_v34 = vadd.f32 %v7326_v13, %v2174_v25  ;;  %v2176_v59 = vpop.f32.mrb[33].mxu0  ;;  %v7497_v19 = vld [vmem:[#allocation2 + $0xe1] sm:$0xff] }
 0x344   : > { %3726 = vmatmul.mubr.f32.gmra.mrb[60].mxu1 %v7473_v41  ;;  %8265 = vst [vmem:[#allocation41_spill] sm:$0xff] %v7497_v19 }
 0x345   : > { %3730 = vmatprep.mubr.f32.mxu1 %v2523_v57  ;;  %v2525_v36 = vmax.f32 %v2493_v22, 0.0  ;;  %v2400_v0 = vadd.f32 %v5676_v34, %v7288_v47 }
 0x346   : > { %v2179_v9 = vpop.f32.mrb[34].mxu0  ;;  %v7481_v1 = vld [vmem:[#allocation2 + $0xaa] sm:$0xff]  ;;  %v7485_v21 = vld [vmem:[#allocation2 + $0xb2] sm:$0xff] }
 0x347   : > { %v7483_v35 = vld [vmem:[#allocation2 + $0xb0] sm:$0xff]  ;;  %2557 = vst [vmem:[#allocation2 + $0xc9] sm:$0xff] %v2525_v36  ;;  %v2494_v2 = vadd.f32 %v7487_v20, %v2400_v0  ;;  %v5677_v25 = vadd.f32 %v7326_v13, %v2179_v9  ;;  %v2181_v59 = vpop.f32.mrb[35].mxu0  ;;  %5163 = vmatprep.mubr.f32.mxu0 %v7481_v1 }
 0x348   : > { %3731 = vmatmul.mubr.f32.gmra.mrb[62].mxu1 %v7483_v35  ;;  %5164 = vmatmul.mubr.f32.gmra.mrb[74].mxu0 %v7485_v21 }
 0x349   : > { %3735 = vmatprep.mubr.f32.mxu1 %v2524_v12  ;;  %v2526_v47 = vmax.f32 %v2494_v2, 0.0  ;;  %v2405_v57 = vadd.f32 %v5677_v25, %v7286_v4 }
 0x34a   : > { %v2184_v22 = vpop.f32.mrb[36].mxu0  ;;  %v7495_v34 = vld [vmem:[#allocation2 + $0xc0] sm:$0xff] }
 0x34b   : > { %2558 = vst [vmem:[#allocation2 + $0xd9] sm:$0xff] %v2526_v47  ;;  %v2495_v0 = vadd.f32 %v7497_v19, %v2405_v57  ;;  %v5678_v9 = vadd.f32 %v7326_v13, %v2184_v22  ;;  %v2186_v59 = vpop.f32.mrb[37].mxu0  ;;  %v7519_v19 = vld [vmem:[#allocation2 + $0xf9] sm:$0xff] }
 0x34c   : > { %3736 = vmatmul.mubr.f32.gmra.mrb[64].mxu1 %v7495_v34  ;;  %8267 = vst [vmem:[#allocation43_spill] sm:$0xff] %v7519_v19 }
 0x34d   : > { %3740 = vmatprep.mubr.f32.mxu1 %v2525_v36  ;;  %v2527_v20 = vmax.f32 %v2495_v0, 0.0  ;;  %v2410_v12 = vadd.f32 %v5678_v9, %v7293_v10 }
 0x34e   : > { %v2189_v2 = vpop.f32.mrb[38].mxu0  ;;  %v7503_v26 = vld [vmem:[#allocation2 + $0xc2] sm:$0xff]  ;;  %v7507_v25 = vld [vmem:[#allocation2 + $0xca] sm:$0xff] }
 0x34f   : > { %v7505_v4 = vld [vmem:[#allocation2 + $0xc8] sm:$0xff]  ;;  %2559 = vst [vmem:[#allocation2 + $0xe1] sm:$0xff] %v2527_v20  ;;  %v2496_v57 = vadd.f32 %v7509_v16, %v2410_v12  ;;  %v5679_v22 = vadd.f32 %v7326_v13, %v2189_v2  ;;  %v2191_v59 = vpop.f32.mrb[39].mxu0  ;;  %5166 = vmatprep.mubr.f32.mxu0 %v7503_v26 }
 0x350   : > { %3741 = vmatmul.mubr.f32.gmra.mrb[66].mxu1 %v7505_v4  ;;  %5167 = vmatmul.mubr.f32.gmra.mrb[76].mxu0 %v7507_v25 }
 0x351   : > { %3745 = vmatprep.mubr.f32.mxu1 %v2526_v47  ;;  %v2528_v10 = vmax.f32 %v2496_v57, 0.0  ;;  %v2415_v36 = vadd.f32 %v5679_v22, %v7291_v51 }
 0x352   : > { %v2194_v0 = vpop.f32.mrb[40].mxu0  ;;  %v7517_v9 = vld [vmem:[#allocation2 + $0xd8] sm:$0xff] }
 0x353   : > { %2560 = vst [vmem:[#allocation2 + $0xf1] sm:$0xff] %v2528_v10  ;;  %v2497_v12 = vadd.f32 %v7519_v19, %v2415_v36  ;;  %v5680_v2 = vadd.f32 %v7326_v13, %v2194_v0  ;;  %v2196_v59 = vpop.f32.mrb[41].mxu0  ;;  %v7541_v19 = vld [vmem:[#allocation2 + $0x111] sm:$0xff] }
 0x354   : > { %3746 = vmatmul.mubr.f32.gmra.mrb[68].mxu1 %v7517_v9  ;;  %8269 = vst [vmem:[#allocation45_spill] sm:$0xff] %v7541_v19 }
 0x355   : > { %3750 = vmatprep.mubr.f32.mxu1 %v2527_v20  ;;  %v2529_v16 = vmax.f32 %v2497_v12, 0.0  ;;  %v2420_v47 = vadd.f32 %v5680_v2, %v7298_v61 }
 0x356   : > { %v2199_v57 = vpop.f32.mrb[42].mxu0  ;;  %v7525_v52 = vld [vmem:[#allocation2 + $0xda] sm:$0xff]  ;;  %v7529_v22 = vld [vmem:[#allocation2 + $0xe2] sm:$0xff] }
 0x357   : > { %v7527_v51 = vld [vmem:[#allocation2 + $0xe0] sm:$0xff]  ;;  %2561 = vst [vmem:[#allocation2 + $0xf9] sm:$0xff] %v2529_v16  ;;  %v2498_v36 = vadd.f32 %v7531_v5, %v2420_v47  ;;  %v5681_v0 = vadd.f32 %v7326_v13, %v2199_v57  ;;  %v2201_v59 = vpop.f32.mrb[43].mxu0  ;;  %5169 = vmatprep.mubr.f32.mxu0 %v7525_v52 }
 0x358   : > { %3751 = vmatmul.mubr.f32.gmra.mrb[70].mxu1 %v7527_v51  ;;  %5170 = vmatmul.mubr.f32.gmra.mrb[78].mxu0 %v7529_v22 }
 0x359   : > { %3755 = vmatprep.mubr.f32.mxu1 %v2528_v10  ;;  %v2530_v20 = vmax.f32 %v2498_v36, 0.0  ;;  %v2425_v61 = vadd.f32 %v5681_v0, %v7296_v46 }
 0x35a   : > { %v2204_v12 = vpop.f32.mrb[44].mxu0  ;;  %v7539_v2 = vld [vmem:[#allocation2 + $0xf0] sm:$0xff] }
 0x35b   : > { %2562 = vst [vmem:[#allocation2 + $0x109] sm:$0xff] %v2530_v20  ;;  %v2499_v47 = vadd.f32 %v7541_v19, %v2425_v61  ;;  %v5682_v57 = vadd.f32 %v7326_v13, %v2204_v12  ;;  %v2206_v59 = vpop.f32.mrb[45].mxu0  ;;  %v7563_v19 = vld [vmem:[#allocation2 + $0x129] sm:$0xff] }
 0x35c   : > { %3756 = vmatmul.mubr.f32.gmra.mrb[72].mxu1 %v7539_v2  ;;  %8272 = vst [vmem:[#allocation48_spill] sm:$0xff] %v7563_v19 }
 0x35d   : > { %3760 = vmatprep.mubr.f32.mxu1 %v2529_v16  ;;  %v2531_v5 = vmax.f32 %v2499_v47, 0.0  ;;  %v2430_v10 = vadd.f32 %v5682_v57, %v7303_v17 }
 0x35e   : > { %v2209_v36 = vpop.f32.mrb[46].mxu0  ;;  %v7547_v33 = vld [vmem:[#allocation2 + $0xf2] sm:$0xff]  ;;  %v7551_v0 = vld [vmem:[#allocation2 + $0xfa] sm:$0xff] }
 0x35f   : > { %v7549_v46 = vld [vmem:[#allocation2 + $0xf8] sm:$0xff]  ;;  %8270 = vst [vmem:[#allocation46_spill] sm:$0xff] %v7551_v0  ;;  %2563 = vst [vmem:[#allocation2 + $0x111] sm:$0xff] %v2531_v5  ;;  %v2500_v61 = vadd.f32 %v7553_v27, %v2430_v10  ;;  %v5683_v12 = vadd.f32 %v7326_v13, %v2209_v36  ;;  %v2211_v59 = vpop.f32.mrb[47].mxu0  ;;  %5172 = vmatprep.mubr.f32.mxu0 %v7547_v33 }
 0x360   : > { %3761 = vmatmul.mubr.f32.gmra.mrb[74].mxu1 %v7549_v46  ;;  %5173 = vmatmul.mubr.f32.gmra.mrb[80].mxu0 %v7551_v0  ;;  %v7575_v0 = vld [vmem:[#allocation2 + $0x139] sm:$0xff] }
 0x361   : > { %3765 = vmatprep.mubr.f32.mxu1 %v2530_v20  ;;  %v2532_v16 = vmax.f32 %v2500_v61, 0.0  ;;  %v2435_v17 = vadd.f32 %v5683_v12, %v7301_v31  ;;  %8275 = vst [vmem:[#allocation51_spill] sm:$0xff] %v7575_v0 }
 0x362   : > { %v2214_v47 = vpop.f32.mrb[48].mxu0  ;;  %v7561_v57 = vld [vmem:[#allocation2 + $0x108] sm:$0xff] }
 0x363   : > { %2564 = vst [vmem:[#allocation2 + $0x121] sm:$0xff] %v2532_v16  ;;  %v2501_v10 = vadd.f32 %v7563_v19, %v2435_v17  ;;  %v5684_v36 = vadd.f32 %v7326_v13, %v2214_v47  ;;  %v2216_v59 = vpop.f32.mrb[49].mxu0  ;;  %v7585_v19 = vld [vmem:[#allocation2 + $0x141] sm:$0xff] }
 0x364   : > { %3766 = vmatmul.mubr.f32.gmra.mrb[76].mxu1 %v7561_v57  ;;  %8276 = vst [vmem:[#allocation52_spill] sm:$0xff] %v7585_v19 }
 0x365   : > { %3770 = vmatprep.mubr.f32.mxu1 %v2531_v5  ;;  %v2533_v27 = vmax.f32 %v2501_v10, 0.0  ;;  %v2440_v20 = vadd.f32 %v5684_v36, %v7308_v14 }
 0x366   : > { %v2219_v61 = vpop.f32.mrb[50].mxu0  ;;  %v7569_v63 = vld [vmem:[#allocation2 + $0x10a] sm:$0xff]  ;;  %v7573_v12 = vld [vmem:[#allocation2 + $0x112] sm:$0xff] }
 0x367   : > { %8273 = vst [vmem:[#allocation49_spill] sm:$0xff] %v7569_v63  ;;  %v7571_v31 = vld [vmem:[#allocation2 + $0x110] sm:$0xff]  ;;  %8274 = vst [vmem:[#allocation50_spill] sm:$0xff] %v7573_v12  ;;  %v2502_v17 = vadd.f32 %v7575_v0, %v2440_v20  ;;  %v5685_v47 = vadd.f32 %v7326_v13, %v2219_v61  ;;  %v2221_v59 = vpop.f32.mrb[51].mxu0  ;;  %5175 = vmatprep.mubr.f32.mxu0 %v7569_v63 }
 0x368   : > { %2565 = vst [vmem:[#allocation2 + $0x129] sm:$0xff] %v2533_v27  ;;  %3771 = vmatmul.mubr.f32.gmra.mrb[78].mxu1 %v7571_v31  ;;  %5176 = vmatmul.mubr.f32.gmra.mrb[82].mxu0 %v7573_v12  ;;  %v7597_v63 = vld [vmem:[#allocation2 + $0x151] sm:$0xff] }
 0x369   : > { %3775 = vmatprep.mubr.f32.mxu1 %v2532_v16  ;;  %v2534_v5 = vmax.f32 %v2502_v17, 0.0  ;;  %v2445_v14 = vadd.f32 %v5685_v47, %v7306_v40  ;;  %8278 = vst [vmem:[#allocation54_spill] sm:$0xff] %v7597_v63 }
 0x36a   : > { %v2224_v10 = vpop.f32.mrb[52].mxu0  ;;  %v7583_v36 = vld [vmem:[#allocation2 + $0x120] sm:$0xff] }
 0x36b   : > { %2566 = vst [vmem:[#allocation2 + $0x139] sm:$0xff] %v2534_v5  ;;  %v2503_v20 = vadd.f32 %v7585_v19, %v2445_v14  ;;  %v5686_v61 = vadd.f32 %v7326_v13, %v2224_v10  ;;  %v2226_v59 = vpop.f32.mrb[53].mxu0 }
 0x36c   : > { %3776 = vmatmul.mubr.f32.gmra.mrb[80].mxu1 %v7583_v36 }
 0x36d   : > { %3780 = vmatprep.mubr.f32.mxu1 %v2533_v27  ;;  %v2535_v0 = vmax.f32 %v2503_v20, 0.0  ;;  %v2450_v16 = vadd.f32 %v5686_v61, %v7313_v30 }
 0x36e   : > { %v2229_v17 = vpop.f32.mrb[54].mxu0 }
 0x36f   : > { %v7591_v12 = vld [vmem:[#allocation2 + $0x122] sm:$0xff]  ;;  %v7595_v47 = vld [vmem:[#allocation2 + $0x12a] sm:$0xff]  ;;  %2567 = vst [vmem:[#allocation2 + $0x141] sm:$0xff] %v2535_v0  ;;  %v2504_v14 = vadd.f32 %v7597_v63, %v2450_v16  ;;  %v5687_v10 = vadd.f32 %v7326_v13, %v2229_v17  ;;  %v2231_v59 = vpop.f32.mrb[55].mxu0  ;;  %v7610_v16 = vld [vmem:[#allocation2 + $0x159] sm:$0xff] }
 0x370   : > { %v7593_v40 = vld [vmem:[#allocation2 + $0x128] sm:$0xff]  ;;  %8277 = vst [vmem:[#allocation53_spill] sm:$0xff] %v7595_v47  ;;  %5178 = vmatprep.mubr.f32.mxu0 %v7591_v12  ;;  %8280 = vst [vmem:[#allocation56_spill] sm:$0xff] %v7610_v16 }
 0x371   : > { %3781 = vmatmul.mubr.f32.gmra.mrb[82].mxu1 %v7593_v40  ;;  %5179 = vmatmul.mubr.f32.gmra.mrb[84].mxu0 %v7595_v47  ;;  %v7604_v27 = vmax.f32 %v2504_v14, 0.0  ;;  %v2455_v30 = vadd.f32 %v5687_v10, %v7311_v11 }
 0x372   : > { %3785 = vmatprep.mubr.f32.mxu1 %v2534_v5  ;;  %v2234_v20 = vpop.f32.mrb[56].mxu0  ;;  %v7607_v61 = vld [vmem:[#allocation2 + $0x138] sm:$0xff] }
 0x373   : > { %8279 = vst [vmem:[#allocation55_spill] sm:$0xff] %v7604_v27  ;;  %2568 = vst [vmem:[#allocation2 + $0x151] sm:$0xff] %v7604_v27  ;;  %v2505_v17 = vadd.f32 %v7610_v16, %v2455_v30  ;;  %v5688_v59 = vadd.f32 %v7326_v13, %v2234_v20  ;;  %v2236_v63 = vpop.f32.mrb[57].mxu0  ;;  %v7625_v30 = vld [vmem:[#allocation2 + $0x169] sm:$0xff] }
 0x374   : > { %8282 = vst [vmem:[#allocation58_spill] sm:$0xff] %v7625_v30 }
 0x375   : > { %3786 = vmatmul.mubr.f32.gmra.mrb[84].mxu1 %v7607_v61  ;;  %v7615_v5 = vmax.f32 %v2505_v17, 0.0  ;;  %v2460_v14 = vadd.f32 %v5688_v59, %v7318_v6 }
 0x376   : > { %3790 = vmatprep.mubr.f32.mxu1 %v2535_v0  ;;  %v2239_v11 = vpop.f32.mrb[58].mxu0  ;;  %v7618_v10 = vld [vmem:[#allocation2 + $0x13a] sm:$0xff]  ;;  %v7622_v47 = vld [vmem:[#allocation2 + $0x142] sm:$0xff] }
 0x377   : > { %v7620_v19 = vld [vmem:[#allocation2 + $0x140] sm:$0xff]  ;;  %8281 = vst [vmem:[#allocation57_spill] sm:$0xff] %v7622_v47  ;;  %2569 = vst [vmem:[#allocation2 + $0x159] sm:$0xff] %v7615_v5  ;;  %v2506_v63 = vadd.f32 %v7625_v30, %v2460_v14  ;;  %v5689_v20 = vadd.f32 %v7326_v13, %v2239_v11  ;;  %v2241_v0 = vpop.f32.mrb[59].mxu0  ;;  %5181 = vmatprep.mubr.f32.mxu0 %v7618_v10  ;;  %v7639_v14 = vld [vmem:[#allocation2 + $0x171] sm:$0xff] }
 0x378   : > { %5182 = vmatmul.mubr.f32.gmra.mrb[86].mxu0 %v7622_v47  ;;  %8283 = vst [vmem:[#allocation59_spill] sm:$0xff] %v7639_v14 }
 0x379   : > { %3791 = vmatmul.mubr.f32.gmra.mrb[86].mxu1 %v7620_v19  ;;  %v7633_v6 = vmax.f32 %v2506_v63, 0.0  ;;  %v2465_v17 = vadd.f32 %v5689_v20, %v7316_v15 }
 0x37a   : > { %3795 = vmatprep.mubr.f32.mxu1 %v7604_v27  ;;  %v2244_v59 = vpop.f32.mrb[60].mxu0  ;;  %v7636_v16 = vld [vmem:[#allocation2 + $0x150] sm:$0xff] }
 0x37b   : > { %2570 = vst [vmem:[#allocation2 + $0x169] sm:$0xff] %v7633_v6  ;;  %v2507_v11 = vadd.f32 %v7639_v14, %v2465_v17  ;;  %v5690_v0 = vadd.f32 %v7326_v13, %v2244_v59  ;;  %v2246_v30 = vpop.f32.mrb[61].mxu0  ;;  %v8286_v14 = vmov 0.0|0.0  }
 0x37d   : > { %3796 = vmatmul.mubr.f32.gmra.mrb[88].mxu1 %v7636_v16  ;;  %v7645_v63 = vmax.f32 %v2507_v11, 0.0  ;;  %v2470_v15 = vadd.f32 %v5690_v0, %v7323_v49 }
 0x37e   : > { %3800 = vmatprep.mubr.f32.mxu1 %v7615_v5  ;;  %v2249_v20 = vpop.f32.mrb[62].mxu0  ;;  %v7648_v27 = vld [vmem:[#allocation2 + $0x158] sm:$0xff] }
 0x37f   : > { %8284 = vst [vmem:[#allocation60_spill] sm:$0xff] %v7645_v63  ;;  %2571 = vst [vmem:[#allocation2 + $0x171] sm:$0xff] %v7645_v63  ;;  %v7652_v47 = vadd.f32 %v7253_v50, %v2470_v15  ;;  %v5691_v17 = vadd.f32 %v7326_v13, %v2249_v20  ;;  %v2251_v59 = vpop.f32.mrb[63].mxu0  ;;  %v3503_v15 = vld [vmem:[#allocation7 + $0x680] sm:$0xff]  ;;  %v3504_v20 = vld [vmem:[#allocation7 + $0x688] sm:$0xff] }
 0x380   : > { %v2703_v50 = vld [vmem:[#allocation2 + $0xa] sm:$0xff] }
 0x381   : > { %8285 = vst [vmem:[#allocation61_spill] sm:$0xff] %v7652_v47  ;;  %3801 = vmatmul.mubr.f32.gmra.mrb[90].mxu1 %v7648_v27  ;;  %v8221_v30 = vmax.f32 %v7652_v47, 0.0  ;;  %v2475_v11 = vadd.f32 %v5691_v17, %v7321_v28  ;;  %v2702_v28 = vld [vmem:[#allocation2 + $0x2] sm:$0xff]  ;;  %v5517_v17 = vpack.c.bf16 %v3504_v20, %v3503_v15  ;;  %v3507_v47 = vld [vmem:[#allocation7 + $0x6a0] sm:$0xff]  ;;  %v7679_v20 = vld [vmem:[#allocation2 + $0x1a] sm:$0xff] }
 0x382   : > { %3805 = vmatprep.mubr.f32.mxu1 %v7633_v6  ;;  %v7659_v49 = vld [vmem:[#allocation2 + $0x168] sm:$0xff] }
 0x383   : > { %2572 = vst [vmem:[#allocation2 + $0x181] sm:$0xff] %v8221_v30  ;;  %v7664_v0 = vadd.f32 %v7260_v48, %v2475_v11  ;;  %v3505_v11 = vld [vmem:[#allocation7 + $0x690] sm:$0xff]  ;;  %v3506_v30 = vld [vmem:[#allocation7 + $0x698] sm:$0xff] }
 0x384   : > { %v5520_v48 = vpack.c.bf16 %v3506_v30, %v3505_v11  ;;  %v3510_v15 = vld [vmem:[#allocation7 + $0x6b8] sm:$0xff]  ;;  %v3511_v30 = vld [vmem:[#allocation7 + $0x6c0] sm:$0xff] }
 0x385   : > { %3806 = vmatmul.mubr.f32.gmra.mrb[92].mxu1 %v7659_v49  ;;  %v8227_v13 = vmax.f32 %v7664_v0, 0.0  ;;  %v3518_v11 = vld [vmem:[#allocation7 + $0x6f8] sm:$0xff] }
 0x386   : > { %3810 = vmatprep.mubr.f32.mxu1 %v7645_v63  ;;  %v7669_v59 = vld [vmem:[#allocation2 + $0x170] sm:$0xff]  ;;  %v3508_v63 = vld [vmem:[#allocation7 + $0x6a8] sm:$0xff] }
 0x387   : > { %2573 = vst [vmem:[#allocation2 + $0x189] sm:$0xff] %v8227_v13  ;;  %v5523_v13 = vpack.c.bf16 %v3508_v63, %v3507_v47  ;;  %v3514_v47 = vld [vmem:[#allocation7 + $0x6d8] sm:$0xff]  ;;  %v3515_v63 = vld [vmem:[#allocation7 + $0x6e0] sm:$0xff] }
 0x389   : > { %3811 = vmatmul.mubr.f32.gmra.mrb[94].mxu1 %v7669_v59 }
 0x38a   : > { %3880 = vmatprep.mubr.f32.mxu1 %v7347_v29  ;;  %v3509_v29 = vld [vmem:[#allocation7 + $0x6b0] sm:$0xff] }
 0x38d   : > { %3881 = vmatmul.mubr.f32.vlgmr.msra.gmra.mrb[32].mxu1 %v2702_v28  ;;  %v7684_v28 = vld [vmem:[#allocation2 + $0x22] sm:$0xff] }
 0x38e   : > { %3885 = vmatprep.mubr.f32.mxu1 %v7355_v43  ;;  %5518 = vmatpush1.bf16.msra.mxu1 %v5517_v17  ;;  %v5526_v43 = vpack.c.bf16 %v3510_v15, %v3509_v29  ;;  %v3517_v17 = vld [vmem:[#allocation7 + $0x6f0] sm:$0xff]  ;;  %v3520_v29 = vld [vmem:[#allocation7 + $0x708] sm:$0xff]  ;;  %v3522_v15 = vld [vmem:[#allocation7 + $0x718] sm:$0xff] }
 0x38f   : > { %5519 = vmatprep.subr.bf16.mxu1 %v8286_v14 }
 0x391   : > { %3886 = vmatmul.mubr.f32.gmra.mrb[34].mxu1 %v2703_v50  ;;  %v3512_v50 = vld [vmem:[#allocation7 + $0x6c8] sm:$0xff] }
 0x392   : > { %3890 = vmatprep.mubr.f32.mxu1 %v7363_v8  ;;  %5521 = vmatpush1.bf16.msra.mxu1 %v5520_v48  ;;  %v5529_v48 = vpack.c.bf16 %v3512_v50, %v3511_v30  ;;  %v3513_v8 = vld [vmem:[#allocation7 + $0x6d0] sm:$0xff]  ;;  %v3526_v30 = vld [vmem:[#allocation7 + $0x738] sm:$0xff]  ;;  %v3528_v50 = vld [vmem:[#allocation7 + $0x748] sm:$0xff] }
 0x393   : > { %5522 = vmatprep.subr.bf16.mxu1 %v8286_v14 }
 0x395   : > { %3891 = vmatmul.mubr.f32.gmra.mrb[36].mxu1 %v7679_v20 }
 0x396   : > { %3895 = vmatprep.mubr.f32.mxu1 %v7373_v58  ;;  %5524 = vmatpush1.bf16.msra.mxu1 %v5523_v13  ;;  %v5532_v58 = vpack.c.bf16 %v3514_v47, %v3513_v8  ;;  %v3516_v13 = vld [vmem:[#allocation7 + $0x6e8] sm:$0xff]  ;;  %v3534_v47 = vld [vmem:[#allocation7 + $0x778] sm:$0xff] }
 0x397   : > { %5525 = vmatprep.subr.bf16.mxu1 %v8286_v14  ;;  %v3532_v8 = vld [vmem:[#allocation7 + $0x768] sm:$0xff] }
 0x399   : > { %3896 = vmatmul.mubr.f32.gmra.mrb[38].mxu1 %v7684_v28 }
 0x39a   : > { %3900 = vmatprep.mubr.f32.mxu1 %v7385_v18  ;;  %5527 = vmatpush1.bf16.msra.mxu1 %v5526_v43  ;;  %v5535_v18 = vpack.c.bf16 %v3516_v13, %v3515_v63  ;;  %v3524_v43 = vld [vmem:[#allocation7 + $0x728] sm:$0xff]  ;;  %v3539_v13 = vld [vmem:[#allocation7 + $0x7a0] sm:$0xff] }
 0x39b   : > { %5528 = vmatprep.subr.bf16.mxu1 %v8286_v14 }
 0x39d   : > { %3901 = vmatmul.mubr.f32.gmra.mrb[40].mxu1 %v7371_v24  ;;  %v5538_v24 = vpack.c.bf16 %v3518_v11, %v3517_v17  ;;  %v2831_v17 = vld [vmem:[#allocation2 + $0x21] sm:$0xff] }
 0x39e   : > { %3905 = vmatprep.mubr.f32.mxu1 %v7395_v37  ;;  %5530 = vmatpush1.bf16.msra.mxu1 %v5529_v48  ;;  %v3519_v37 = vld [vmem:[#allocation7 + $0x700] sm:$0xff]  ;;  %v3530_v48 = vld [vmem:[#allocation7 + $0x758] sm:$0xff] }
 0x39f   : > { %5531 = vmatprep.subr.bf16.mxu1 %v8286_v14 }
 0x3a1   : > { %3906 = vmatmul.mubr.f32.gmra.mrb[42].mxu1 %v7375_v7  ;;  %v5541_v7 = vpack.c.bf16 %v3520_v29, %v3519_v37  ;;  %v3542_v37 = vld [vmem:[#allocation7 + $0x7b8] sm:$0xff]  ;;  %v7788_v29 = vld [vmem:[#allocation2 + $0x31] sm:$0xff] }
 0x3a2   : > { %3910 = vmatprep.mubr.f32.mxu1 %v7407_v53  ;;  %5533 = vmatpush1.bf16.msra.mxu1 %v5532_v58  ;;  %v3521_v53 = vld [vmem:[#allocation7 + $0x710] sm:$0xff] }
 0x3a3   : > { %5534 = vmatprep.subr.bf16.mxu1 %v8286_v14 }
 0x3a5   : > { %3911 = vmatmul.mubr.f32.gmra.mrb[44].mxu1 %v7393_v45  ;;  %v5544_v45 = vpack.c.bf16 %v3522_v15, %v3521_v53 }
 0x3a6   : > { %3915 = vmatprep.mubr.f32.mxu1 %v7417_v23  ;;  %5536 = vmatpush1.bf16.msra.mxu1 %v5535_v18  ;;  %v3523_v23 = vld [vmem:[#allocation7 + $0x720] sm:$0xff]  ;;  %v3540_v18 = vld [vmem:[#allocation7 + $0x7a8] sm:$0xff] }
 0x3a7   : > { %5537 = vmatprep.subr.bf16.mxu1 %v8286_v14  ;;  %v5571_v11 = vpack.c.bf16 %v3540_v18, %v3539_v13  ;;  %v7820_v13 = vld [vmem:[#allocation2 + $0x69] sm:$0xff]  ;;  %v2902_v18 = vld [vmem:[#allocation2 + $0x7a] sm:$0xff] }
 0x3a9   : > { %3916 = vmatmul.mubr.f32.gmra.mrb[46].mxu1 %v7397_v56  ;;  %v5547_v56 = vpack.c.bf16 %v3524_v43, %v3523_v23  ;;  %v3544_v23 = vld [vmem:[#allocation7 + $0x7c8] sm:$0xff] }
 0x3aa   : > { %3920 = vmatprep.mubr.f32.mxu1 %v7429_v42  ;;  %5539 = vmatpush1.bf16.msra.mxu1 %v5538_v24  ;;  %v3525_v42 = vld [vmem:[#allocation7 + $0x730] sm:$0xff] }
 0x3ab   : > { %5540 = vmatprep.subr.bf16.mxu1 %v8286_v14  ;;  %v3541_v24 = vld [vmem:[#allocation7 + $0x7b0] sm:$0xff] }
 0x3ac   : > { %v5574_v15 = vpack.c.bf16 %v3542_v37, %v3541_v24  ;;  %v7796_v43 = vld [vmem:[#allocation2 + $0x39] sm:$0xff] }
 0x3ad   : > { %3921 = vmatmul.mubr.f32.gmra.mrb[48].mxu1 %v7415_v32  ;;  %v5550_v32 = vpack.c.bf16 %v3526_v30, %v3525_v42  ;;  %v3545_v30 = vld [vmem:[#allocation7 + $0x7d0] sm:$0xff] }
 0x3ae   : > { %3925 = vmatprep.mubr.f32.mxu1 %v7439_v39  ;;  %5542 = vmatpush1.bf16.msra.mxu1 %v5541_v7  ;;  %v3527_v39 = vld [vmem:[#allocation7 + $0x740] sm:$0xff]  ;;  %v7824_v24 = vld [vmem:[#allocation2 + $0x79] sm:$0xff] }
 0x3af   : > { %5543 = vmatprep.subr.bf16.mxu1 %v8286_v14 }
 0x3b1   : > { %3926 = vmatmul.mubr.f32.gmra.mrb[50].mxu1 %v7419_v60  ;;  %v5553_v60 = vpack.c.bf16 %v3528_v50, %v3527_v39  ;;  %v7800_v39 = vld [vmem:[#allocation2 + $0x49] sm:$0xff] }
 0x3b2   : > { %3930 = vmatprep.mubr.f32.mxu1 %v7451_v3  ;;  %5545 = vmatpush1.bf16.msra.mxu1 %v5544_v45  ;;  %v3529_v3 = vld [vmem:[#allocation7 + $0x750] sm:$0xff]  ;;  %v3543_v45 = vld [vmem:[#allocation7 + $0x7c0] sm:$0xff] }
 0x3b3   : > { %5546 = vmatprep.subr.bf16.mxu1 %v8286_v14  ;;  %v5577_v42 = vpack.c.bf16 %v3544_v23, %v3543_v45  ;;  %v3555_v23 = vld [vmem:[#allocation7 + $0x820] sm:$0xff] }
 0x3b5   : > { %3931 = vmatmul.mubr.f32.gmra.mrb[52].mxu1 %v7437_v38  ;;  %v5556_v38 = vpack.c.bf16 %v3530_v48, %v3529_v3 }
 0x3b6   : > { %3935 = vmatprep.mubr.f32.mxu1 %v7461_v62  ;;  %5548 = vmatpush1.bf16.msra.mxu1 %v5547_v56  ;;  %v3531_v62 = vld [vmem:[#allocation7 + $0x760] sm:$0xff] }
 0x3b7   : > { %5549 = vmatprep.subr.bf16.mxu1 %v8286_v14  ;;  %v2898_v56 = vld [vmem:[#allocation2 + $0x4a] sm:$0xff] }
 0x3b9   : > { %3936 = vmatmul.mubr.f32.gmra.mrb[54].mxu1 %v7441_v44  ;;  %v5559_v44 = vpack.c.bf16 %v3532_v8, %v3531_v62  ;;  %v3548_v62 = vld [vmem:[#allocation7 + $0x7e8] sm:$0xff] }
 0x3ba   : > { %3940 = vmatprep.mubr.f32.mxu1 %v7473_v41  ;;  %5551 = vmatpush1.bf16.msra.mxu1 %v5550_v32  ;;  %v3533_v41 = vld [vmem:[#allocation7 + $0x770] sm:$0xff]  ;;  %v3546_v32 = vld [vmem:[#allocation7 + $0x7d8] sm:$0xff]  ;;  %v7808_v8 = vld [vmem:[#allocation2 + $0x51] sm:$0xff] }
 0x3bb   : > { %5552 = vmatprep.subr.bf16.mxu1 %v8286_v14  ;;  %v5580_v48 = vpack.c.bf16 %v3546_v32, %v3545_v30  ;;  %v2904_v30 = vld [vmem:[#allocation2 + $0x92] sm:$0xff] }
 0x3bd   : > { %3941 = vmatmul.mubr.f32.gmra.mrb[56].mxu1 %v7459_v54  ;;  %v5562_v54 = vpack.c.bf16 %v3534_v47, %v3533_v41  ;;  %v3549_v47 = vld [vmem:[#allocation7 + $0x7f0] sm:$0xff] }
 0x3be   : > { %3945 = vmatprep.mubr.f32.mxu1 %v7483_v35  ;;  %5554 = vmatpush1.bf16.msra.mxu1 %v5553_v60  ;;  %v2899_v60 = vld [vmem:[#allocation2 + $0x52] sm:$0xff] }
 0x3bf   : > { %5555 = vmatprep.subr.bf16.mxu1 %v8286_v14 }
 0x3c1   : > { %3946 = vmatmul.mubr.f32.gmra.mrb[58].mxu1 %v7463_v55  ;;  %v8289_v55 = vld [vmem:[#allocation50_spill] sm:$0xff] }
 0x3c2   : > { %3950 = vmatprep.mubr.f32.mxu1 %v7495_v34  ;;  %5557 = vmatpush1.bf16.msra.mxu1 %v5556_v38  ;;  %v8291_v34 = vld [vmem:[#allocation57_spill] sm:$0xff] }
 0x3c3   : > { %5558 = vmatprep.subr.bf16.mxu1 %v8286_v14  ;;  %v3547_v38 = vld [vmem:[#allocation7 + $0x7e0] sm:$0xff] }
 0x3c4   : > { %v5583_v41 = vpack.c.bf16 %v3548_v62, %v3547_v38  ;;  %v7836_v38 = vld [vmem:[#allocation2 + $0x91] sm:$0xff] }
 0x3c5   : > { %3951 = vmatmul.mubr.f32.gmra.mrb[60].mxu1 %v7481_v1  ;;  %v8287_v1 = vld [vmem:[#allocation46_spill] sm:$0xff] }
 0x3c6   : > { %3955 = vmatprep.mubr.f32.mxu1 %v7505_v4  ;;  %5560 = vmatpush1.bf16.msra.mxu1 %v5559_v44  ;;  %v7753_v4 = vld [vmem:[#allocation2 + $0x152] sm:$0xff]  ;;  %v2900_v44 = vld [vmem:[#allocation2 + $0x62] sm:$0xff] }
 0x3c7   : > { %5561 = vmatprep.subr.bf16.mxu1 %v8286_v14 }
 0x3c9   : > { %3956 = vmatmul.mubr.f32.gmra.mrb[62].mxu1 %v7485_v21 }
 0x3ca   : > { %3960 = vmatprep.mubr.f32.mxu1 %v7517_v9  ;;  %5563 = vmatpush1.bf16.msra.mxu1 %v5562_v54  ;;  %v7761_v9 = vld [vmem:[#allocation2 + $0x15a] sm:$0xff]  ;;  %v3550_v54 = vld [vmem:[#allocation7 + $0x7f8] sm:$0xff] }
 0x3cb   : > { %5564 = vmatprep.subr.bf16.mxu1 %v8286_v14 }
 0x3cd   : > { %3961 = vmatmul.mubr.f32.gmra.mrb[64].mxu1 %v7503_v26  ;;  %v8288_v26 = vld [vmem:[#allocation49_spill] sm:$0xff] }
 0x3ce   : > { %3965 = vmatprep.mubr.f32.mxu1 %v7527_v51  ;;  %v7764_v51 = vld [vmem:[#allocation2 + $0x180] sm:$0xff] }
 0x3d1   : > { %3966 = vmatmul.mubr.f32.gmra.mrb[66].mxu1 %v7507_v25 }
 0x3d2   : > { %3970 = vmatprep.mubr.f32.mxu1 %v7539_v2 }
 0x3d5   : > { %3971 = vmatmul.mubr.f32.gmra.mrb[68].mxu1 %v7525_v52  ;;  %v8290_v52 = vld [vmem:[#allocation53_spill] sm:$0xff] }
 0x3d6   : > { %3975 = vmatprep.mubr.f32.mxu1 %v7549_v46  ;;  %v7772_v46 = vld [vmem:[#allocation2 + $0x188] sm:$0xff] }
 0x3d9   : > { %3976 = vmatmul.mubr.f32.gmra.mrb[70].mxu1 %v7529_v22  ;;  %v7767_v22 = vld [vmem:[#allocation2 + $0x16a] sm:$0xff] }
 0x3da   : > { %3980 = vmatprep.mubr.f32.mxu1 %v7561_v57 }
 0x3dd   : > { %3981 = vmatmul.mubr.f32.gmra.mrb[72].mxu1 %v7547_v33 }
 0x3de   : > { %3985 = vmatprep.mubr.f32.mxu1 %v7571_v31  ;;  %v3535_v31 = vld [vmem:[#allocation7 + $0x780] sm:$0xff] }
 0x3e1   : > { %3986 = vmatmul.mubr.f32.gmra.mrb[74].mxu1 %v8287_v1 }
 0x3e2   : > { %3990 = vmatprep.mubr.f32.mxu1 %v7583_v36  ;;  %v3536_v36 = vld [vmem:[#allocation7 + $0x788] sm:$0xff] }
 0x3e5   : > { %3991 = vmatmul.mubr.f32.gmra.mrb[76].mxu1 %v8288_v26 }
 0x3e6   : > { %3995 = vmatprep.mubr.f32.mxu1 %v7593_v40  ;;  %v7777_v40 = vld [vmem:[#allocation2 + $0x172] sm:$0xff] }
 0x3e9   : > { %3996 = vmatmul.mubr.f32.gmra.mrb[78].mxu1 %v8289_v55 }
 0x3ea   : > { %4000 = vmatprep.mubr.f32.mxu1 %v7607_v61  ;;  %v3537_v61 = vld [vmem:[#allocation7 + $0x790] sm:$0xff] }
 0x3ed   : > { %4001 = vmatmul.mubr.f32.gmra.mrb[80].mxu1 %v7591_v12 }
 0x3ee   : > { %4005 = vmatprep.mubr.f32.mxu1 %v7620_v19 }
 0x3f1   : > { %4006 = vmatmul.mubr.f32.gmra.mrb[82].mxu1 %v8290_v52 }
 0x3f2   : > { %4010 = vmatprep.mubr.f32.mxu1 %v7636_v16  ;;  %v3538_v16 = vld [vmem:[#allocation7 + $0x798] sm:$0xff] }
 0x3f3   : > { %v7745_v35 = vpop.f32.mrb[64].mxu0  ;;  %v5568_v63 = vpack.c.bf16 %v3538_v16, %v3537_v61  ;;  %v5586_v16 = vpack.c.bf16 %v3550_v54, %v3549_v47  ;;  %v3559_v54 = vld [vmem:[#allocation7 + $0x840] sm:$0xff] }
 0x3f4   : > { %v7748_v21 = vpop.f32.mrb[65].mxu0 }
 0x3f5   : > { %4011 = vmatmul.mubr.f32.gmra.mrb[84].mxu1 %v7618_v10 }
 0x3f6   : > { %4015 = vmatprep.mubr.f32.mxu1 %v7648_v27  ;;  %v5565_v27 = vpack.c.bf16 %v3536_v36, %v3535_v31  ;;  %v7812_v31 = vld [vmem:[#allocation2 + $0x61] sm:$0xff] }
 0x3f9   : > { %4016 = vmatmul.mubr.f32.gmra.mrb[86].mxu1 %v8291_v34 }
 0x3fa   : > { %4020 = vmatprep.mubr.f32.mxu1 %v7659_v49  ;;  %v2830_v49 = vld [vmem:[#allocation2 + $0x19] sm:$0xff] }
 0x3fb   : > { %v7755_v25 = vpop.f32.mrb[66].mxu0 }
 0x3fc   : > { %v7758_v19 = vpop.f32.mrb[67].mxu0 }
 0x3fd   : > { %4021 = vmatmul.mubr.f32.gmra.mrb[88].mxu1 %v7753_v4 }
 0x3fe   : > { %4025 = vmatprep.mubr.f32.mxu1 %v7669_v59 }
 0x401   : > { %4026 = vmatmul.mubr.f32.gmra.mrb[90].mxu1 %v7761_v9 }
 0x402   : > { %4030 = vmatprep.mubr.f32.mxu1 %v7764_v51 }
 0x403   : > { %v7769_v2 = vpop.f32.mrb[68].mxu0 }
 0x404   : > { %v7774_v57 = vpop.f32.mrb[69].mxu0 }
 0x405   : > { %4031 = vmatmul.mubr.f32.gmra.mrb[92].mxu1 %v7767_v22 }
 0x406   : > { %4035 = vmatprep.mubr.f32.mxu1 %v7772_v46 }
 0x409   : > { %4036 = vmatmul.mubr.f32.gmra.mrb[94].mxu1 %v7777_v40 }
 0x40a   : > { %4105 = vmatprep.mubr.f32.mxu1 %v7679_v20  ;;  %v2896_v20 = vld [vmem:[#allocation2 + $0x32] sm:$0xff] }
 0x40b   : > { %v7781_v59 = vpop.f32.mrb[70].mxu0 }
 0x40c   : > { %v7783_v58 = vpop.f32.mrb[71].mxu0 }
 0x40d   : > { %4106 = vmatmul.mubr.f32.vlgmr.msra.gmra.mrb[32].mxu1 %v2830_v49  ;;  %v3551_v49 = vld [vmem:[#allocation7 + $0x800] sm:$0xff] }
 0x40e   : > { %4110 = vmatprep.mubr.f32.mxu1 %v7684_v28  ;;  %5566 = vmatpush1.bf16.msra.mxu1 %v5565_v27  ;;  %v2897_v28 = vld [vmem:[#allocation2 + $0x3a] sm:$0xff]  ;;  %v2901_v27 = vld [vmem:[#allocation2 + $0x6a] sm:$0xff] }
 0x40f   : > { %5567 = vmatprep.subr.bf16.mxu1 %v8286_v14 }
 0x411   : > { %4111 = vmatmul.mubr.f32.gmra.mrb[34].mxu1 %v2831_v17 }
 0x412   : > { %4115 = vmatprep.mubr.f32.mxu1 %v2896_v20  ;;  %5569 = vmatpush1.bf16.msra.mxu1 %v5568_v63  ;;  %v3552_v63 = vld [vmem:[#allocation7 + $0x808] sm:$0xff]  ;;  %v3553_v20 = vld [vmem:[#allocation7 + $0x810] sm:$0xff] }
 0x413   : > { %5570 = vmatprep.subr.bf16.mxu1 %v8286_v14  ;;  %v7790_v7 = vpop.f32.mrb[72].mxu0  ;;  %v5589_v17 = vpack.c.bf16 %v3552_v63, %v3551_v49  ;;  %v2906_v49 = vld [vmem:[#allocation2 + $0xaa] sm:$0xff] }
 0x414   : > { %v7793_v53 = vpop.f32.mrb[73].mxu0 }
 0x415   : > { %4116 = vmatmul.mubr.f32.gmra.mrb[36].mxu1 %v7788_v29 }
 0x416   : > { %4120 = vmatprep.mubr.f32.mxu1 %v2897_v28  ;;  %5572 = vmatpush1.bf16.msra.mxu1 %v5571_v11  ;;  %v3554_v11 = vld [vmem:[#allocation7 + $0x818] sm:$0xff] }
 0x417   : > { %5573 = vmatprep.subr.bf16.mxu1 %v8286_v14  ;;  %v2903_v28 = vld [vmem:[#allocation2 + $0x82] sm:$0xff]  ;;  %v5592_v45 = vpack.c.bf16 %v3554_v11, %v3553_v20 }
 0x418   : > { %v7848_v20 = vld [vmem:[#allocation2 + $0xa9] sm:$0xff] }
 0x419   : > { %4121 = vmatmul.mubr.f32.gmra.mrb[38].mxu1 %v7796_v43 }
 0x41a   : > { %4125 = vmatprep.mubr.f32.mxu1 %v2898_v56  ;;  %5575 = vmatpush1.bf16.msra.mxu1 %v5574_v15  ;;  %v3556_v56 = vld [vmem:[#allocation7 + $0x828] sm:$0xff] }
 0x41b   : > { %5576 = vmatprep.subr.bf16.mxu1 %v8286_v14  ;;  %v7802_v50 = vpop.f32.mrb[74].mxu0  ;;  %v5595_v32 = vpack.c.bf16 %v3556_v56, %v3555_v23  ;;  %v3563_v56 = vld [vmem:[#allocation7 + $0x860] sm:$0xff] }
 0x41c   : > { %v7805_v3 = vpop.f32.mrb[75].mxu0 }
 0x41d   : > { %4126 = vmatmul.mubr.f32.gmra.mrb[40].mxu1 %v7800_v39 }
 0x41e   : > { %4130 = vmatprep.mubr.f32.mxu1 %v2899_v60  ;;  %5578 = vmatpush1.bf16.msra.mxu1 %v5577_v42  ;;  %v7832_v42 = vld [vmem:[#allocation2 + $0x81] sm:$0xff] }
 0x41f   : > { %5579 = vmatprep.subr.bf16.mxu1 %v8286_v14  ;;  %v3557_v60 = vld [vmem:[#allocation7 + $0x830] sm:$0xff] }
 0x421   : > { %4131 = vmatmul.mubr.f32.gmra.mrb[42].mxu1 %v7808_v8 }
 0x422   : > { %4135 = vmatprep.mubr.f32.mxu1 %v2900_v44  ;;  %5581 = vmatpush1.bf16.msra.mxu1 %v5580_v48  ;;  %v3558_v48 = vld [vmem:[#allocation7 + $0x838] sm:$0xff]  ;;  %v2905_v44 = vld [vmem:[#allocation2 + $0x9a] sm:$0xff] }
 0x423   : > { %5582 = vmatprep.subr.bf16.mxu1 %v8286_v14  ;;  %v7814_v36 = vpop.f32.mrb[76].mxu0  ;;  %v5598_v47 = vpack.c.bf16 %v3558_v48, %v3557_v60  ;;  %v2908_v60 = vld [vmem:[#allocation2 + $0xc2] sm:$0xff] }
 0x424   : > { %v7817_v61 = vpop.f32.mrb[77].mxu0 }
 0x425   : > { %4136 = vmatmul.mubr.f32.gmra.mrb[44].mxu1 %v7812_v31 }
 0x426   : > { %4140 = vmatprep.mubr.f32.mxu1 %v2901_v27  ;;  %5584 = vmatpush1.bf16.msra.mxu1 %v5583_v41  ;;  %v3560_v27 = vld [vmem:[#allocation7 + $0x848] sm:$0xff] }
 0x427   : > { %5585 = vmatprep.subr.bf16.mxu1 %v8286_v14  ;;  %v5601_v63 = vpack.c.bf16 %v3560_v27, %v3559_v54  ;;  %v7860_v54 = vld [vmem:[#allocation2 + $0xc1] sm:$0xff] }
 0x429   : > { %4141 = vmatmul.mubr.f32.gmra.mrb[46].mxu1 %v7820_v13 }
 0x42a   : > { %4145 = vmatprep.mubr.f32.mxu1 %v2902_v18  ;;  %5587 = vmatpush1.bf16.msra.mxu1 %v5586_v16  ;;  %v7844_v16 = vld [vmem:[#allocation2 + $0x99] sm:$0xff] }
 0x42b   : > { %5588 = vmatprep.subr.bf16.mxu1 %v8286_v14  ;;  %v7826_v37 = vpop.f32.mrb[78].mxu0  ;;  %v3561_v18 = vld [vmem:[#allocation7 + $0x850] sm:$0xff] }
 0x42c   : > { %v7829_v15 = vpop.f32.mrb[79].mxu0 }
 0x42d   : > { %4146 = vmatmul.mubr.f32.gmra.mrb[48].mxu1 %v7824_v24 }
 0x42e   : > { %4150 = vmatprep.mubr.f32.mxu1 %v2903_v28  ;;  %5590 = vmatpush1.bf16.msra.mxu1 %v5589_v17  ;;  %v3562_v17 = vld [vmem:[#allocation7 + $0x858] sm:$0xff]  ;;  %v2907_v28 = vld [vmem:[#allocation2 + $0xb2] sm:$0xff] }
 0x42f   : > { %5591 = vmatprep.subr.bf16.mxu1 %v8286_v14  ;;  %v5604_v23 = vpack.c.bf16 %v3562_v17, %v3561_v18  ;;  %v7868_v17 = vld [vmem:[#allocation2 + $0xc9] sm:$0xff] }
 0x431   : > { %4151 = vmatmul.mubr.f32.gmra.mrb[50].mxu1 %v7832_v42 }
 0x432   : > { %4155 = vmatprep.mubr.f32.mxu1 %v2904_v30  ;;  %5593 = vmatpush1.bf16.msra.mxu1 %v5592_v45  ;;  %v3564_v30 = vld [vmem:[#allocation7 + $0x868] sm:$0xff] }
 0x433   : > { %5594 = vmatprep.subr.bf16.mxu1 %v8286_v14  ;;  %v7838_v62 = vpop.f32.mrb[80].mxu0  ;;  %v5607_v48 = vpack.c.bf16 %v3564_v30, %v3563_v56  ;;  %v7872_v56 = vld [vmem:[#allocation2 + $0xd9] sm:$0xff] }
 0x434   : > { %v7841_v41 = vpop.f32.mrb[81].mxu0 }
 0x435   : > { %4156 = vmatmul.mubr.f32.gmra.mrb[52].mxu1 %v7836_v38 }
 0x436   : > { %4160 = vmatprep.mubr.f32.mxu1 %v2905_v44  ;;  %5596 = vmatpush1.bf16.msra.mxu1 %v5595_v32  ;;  %v7856_v32 = vld [vmem:[#allocation2 + $0xb1] sm:$0xff]  ;;  %v3565_v44 = vld [vmem:[#allocation7 + $0x870] sm:$0xff] }
 0x437   : > { %5597 = vmatprep.subr.bf16.mxu1 %v8286_v14 }
 0x439   : > { %4161 = vmatmul.mubr.f32.gmra.mrb[54].mxu1 %v7844_v16 }
 0x43a   : > { %4165 = vmatprep.mubr.f32.mxu1 %v2906_v49  ;;  %5599 = vmatpush1.bf16.msra.mxu1 %v5598_v47  ;;  %v3566_v47 = vld [vmem:[#allocation7 + $0x878] sm:$0xff] }
 0x43b   : > { %5600 = vmatprep.subr.bf16.mxu1 %v8286_v14  ;;  %v7850_v11 = vpop.f32.mrb[82].mxu0  ;;  %v2909_v49 = vld [vmem:[#allocation2 + $0xca] sm:$0xff]  ;;  %v5610_v18 = vpack.c.bf16 %v3566_v47, %v3565_v44  ;;  %v7887_v47 = vld [vmem:[#allocation2 + $0xf9] sm:$0xff] }
 0x43c   : > { %v7853_v45 = vpop.f32.mrb[83].mxu0  ;;  %v7883_v44 = vld [vmem:[#allocation2 + $0xf1] sm:$0xff] }
 0x43d   : > { %4166 = vmatmul.mubr.f32.gmra.mrb[56].mxu1 %v7848_v20 }
 0x43e   : > { %4170 = vmatprep.mubr.f32.mxu1 %v2907_v28  ;;  %5602 = vmatpush1.bf16.msra.mxu1 %v5601_v63  ;;  %v2910_v28 = vld [vmem:[#allocation2 + $0xda] sm:$0xff] }
 0x43f   : > { %5603 = vmatprep.subr.bf16.mxu1 %v8286_v14 }
 0x441   : > { %4171 = vmatmul.mubr.f32.gmra.mrb[58].mxu1 %v7856_v32 }
 0x442   : > { %4175 = vmatprep.mubr.f32.mxu1 %v2908_v60  ;;  %5605 = vmatpush1.bf16.msra.mxu1 %v5604_v23  ;;  %v8292_v23 = vld [vmem:[#allocation14_spill] sm:$0xff]  ;;  %v2911_v60 = vld [vmem:[#allocation2 + $0xe2] sm:$0xff] }
 0x443   : > { %5606 = vmatprep.subr.bf16.mxu1 %v8286_v14 }
 0x444   : > { %v7862_v27 = vpop.f32.mrb[84].mxu0 }
 0x445   : > { %4176 = vmatmul.mubr.f32.gmra.mrb[60].mxu1 %v7860_v54  ;;  %v7865_v63 = vpop.f32.mrb[85].mxu0 }
 0x446   : > { %4180 = vmatprep.mubr.f32.mxu1 %v2909_v49  ;;  %5608 = vmatpush1.bf16.msra.mxu1 %v5607_v48  ;;  %v7891_v49 = vld [vmem:[#allocation2 + $0x109] sm:$0xff] }
 0x447   : > { %5609 = vmatprep.subr.bf16.mxu1 %v8286_v14  ;;  %v7879_v14 = vld [vmem:[#allocation2 + $0xe1] sm:$0xff] }
 0x449   : > { %4181 = vmatmul.mubr.f32.gmra.mrb[62].mxu1 %v7868_v17 }
 0x44a   : > { %4185 = vmatprep.mubr.f32.mxu1 %v2910_v28  ;;  %5611 = vmatpush1.bf16.msra.mxu1 %v5610_v18  ;;  %v7895_v18 = vld [vmem:[#allocation2 + $0x111] sm:$0xff] }
 0x44b   : > { %5644 = vmatprep.subr.bf16.mxu1 %v8292_v23  ;;  %v7874_v30 = vpop.f32.mrb[86].mxu0 }
 0x44c   : > { %v7877_v48 = vpop.f32.mrb[87].mxu0 }
 0x44d   : > { %4186 = vmatmul.mubr.f32.gmra.mrb[64].mxu1 %v7872_v56 }
 0x44e   : > { %4190 = vmatprep.mubr.f32.mxu1 %v2911_v60  ;;  %v7927_v60 = vld [vmem:[#allocation2 + $0x18a] sm:$0xff] }
 0x451   : > { %4191 = vmatmul.mubr.f32.gmra.mrb[66].mxu1 %v7879_v14 }
 0x452   : > { %4195 = vmatprep.mubr.f32.mxu1 %v7547_v33  ;;  %v7899_v33 = vld [vmem:[#allocation2 + $0x121] sm:$0xff] }
 0x455   : > { %4196 = vmatmul.mubr.f32.gmra.mrb[68].mxu1 %v7883_v44 }
 0x456   : > { %4200 = vmatprep.mubr.f32.mxu1 %v8287_v1  ;;  %v7903_v1 = vld [vmem:[#allocation2 + $0x129] sm:$0xff] }
 0x459   : > { %4201 = vmatmul.mubr.f32.gmra.mrb[70].mxu1 %v7887_v47 }
 0x45a   : > { %4205 = vmatprep.mubr.f32.mxu1 %v8288_v26  ;;  %v7907_v26 = vld [vmem:[#allocation2 + $0x139] sm:$0xff] }
 0x45d   : > { %4206 = vmatmul.mubr.f32.gmra.mrb[72].mxu1 %v7891_v49 }
 0x45e   : > { %4210 = vmatprep.mubr.f32.mxu1 %v8289_v55  ;;  %v7911_v55 = vld [vmem:[#allocation2 + $0x141] sm:$0xff] }
 0x461   : > { %4211 = vmatmul.mubr.f32.gmra.mrb[74].mxu1 %v7895_v18 }
 0x462   : > { %4215 = vmatprep.mubr.f32.mxu1 %v7591_v12  ;;  %v8293_v12 = vld [vmem:[#allocation55_spill] sm:$0xff] }
 0x465   : > { %4216 = vmatmul.mubr.f32.gmra.mrb[76].mxu1 %v7899_v33 }
 0x466   : > { %4220 = vmatprep.mubr.f32.mxu1 %v8290_v52  ;;  %v7922_v52 = vld [vmem:[#allocation2 + $0x182] sm:$0xff] }
 0x469   : > { %4221 = vmatmul.mubr.f32.gmra.mrb[78].mxu1 %v7903_v1 }
 0x46a   : > { %4225 = vmatprep.mubr.f32.mxu1 %v7618_v10  ;;  %v8294_v10 = vld [vmem:[#allocation60_spill] sm:$0xff] }
 0x46d   : > { %4226 = vmatmul.mubr.f32.gmra.mrb[80].mxu1 %v7907_v26 }
 0x46e   : > { %4230 = vmatprep.mubr.f32.mxu1 %v8291_v34  ;;  %v8295_v34 = vld [vmem:[#allocation61_spill] sm:$0xff] }
 0x46f   : > { %v8296_v28 = vmax.f32 %v8295_v34, 0.0  ;;  %v8299_v34 = vld [vmem:[#allocation16_spill] sm:$0xff] }
 0x471   : > { %4231 = vmatmul.mubr.f32.gmra.mrb[82].mxu1 %v7911_v55 }
 0x472   : > { %4235 = vmatprep.mubr.f32.mxu1 %v7753_v4 }
 0x475   : > { %4236 = vmatmul.mubr.f32.gmra.mrb[84].mxu1 %v8293_v12  ;;  %v8298_v12 = vld [vmem:[#allocation15_spill] sm:$0xff] }
 0x476   : > { %4240 = vmatprep.mubr.f32.mxu1 %v7761_v9 }
 0x479   : > { %4241 = vmatmul.mubr.f32.gmra.mrb[86].mxu1 %v7615_v5  ;;  %v8297_v5 = vmax.f32 %v7664_v0, 0.0  ;;  %v2960_v0 = vld [vmem:[#allocation2 + $0x48] sm:$0xff] }
 0x47a   : > { %4245 = vmatprep.mubr.f32.mxu1 %v7767_v22 }
 0x47d   : > { %4246 = vmatmul.mubr.f32.gmra.mrb[88].mxu1 %v7633_v6  ;;  %v2958_v6 = vld [vmem:[#allocation2 + $0x30] sm:$0xff] }
 0x47e   : > { %4250 = vmatprep.mubr.f32.mxu1 %v7777_v40 }
 0x481   : > { %4251 = vmatmul.mubr.f32.gmra.mrb[90].mxu1 %v8294_v10  ;;  %v2959_v10 = vld [vmem:[#allocation2 + $0x38] sm:$0xff] }
 0x482   : > { %4255 = vmatprep.mubr.f32.mxu1 %v7922_v52 }
 0x485   : > { %4256 = vmatmul.mubr.f32.gmra.mrb[92].mxu1 %v8296_v28  ;;  %v8302_v28 = vld [vmem:[#allocation19_spill] sm:$0xff] }
 0x486   : > { %4260 = vmatprep.mubr.f32.mxu1 %v7927_v60 }
 0x489   : > { %4261 = vmatmul.mubr.f32.gmra.mrb[94].mxu1 %v8297_v5  ;;  %v8303_v5 = vld [vmem:[#allocation20_spill] sm:$0xff] }
 0x48a   : > { %4330 = vmatprep.mubr.f32.mxu1 %v7788_v29  ;;  %v8300_v29 = vld [vmem:[#allocation17_spill] sm:$0xff] }
 0x48d   : > { %4331 = vmatmul.mubr.f32.vlgmr.msra.gmra.mrb[32].mxu1 %v2958_v6  ;;  %v8304_v6 = vld [vmem:[#allocation21_spill] sm:$0xff] }
 0x48e   : > { %4335 = vmatprep.mubr.f32.mxu1 %v7796_v43  ;;  %5652 = vmatpush3.bf16.msra.mxu1 %v8292_v23  ;;  %v2961_v43 = vld [vmem:[#allocation2 + $0x50] sm:$0xff] }
 0x48f   : > { %5645 = vmatprep.subr.bf16.mxu1 %v8298_v12  ;;  %v8301_v23 = vld [vmem:[#allocation18_spill] sm:$0xff] }
 0x491   : > { %4336 = vmatmul.mubr.f32.gmra.mrb[34].mxu1 %v2959_v10  ;;  %v2968_v10 = vld [vmem:[#allocation2 + $0xa8] sm:$0xff] }
 0x492   : > { %4340 = vmatprep.mubr.f32.mxu1 %v7800_v39  ;;  %5653 = vmatpush3.bf16.msra.mxu1 %v8298_v12  ;;  %v2962_v39 = vld [vmem:[#allocation2 + $0x60] sm:$0xff]  ;;  %v2966_v12 = vld [vmem:[#allocation2 + $0x90] sm:$0xff] }
 0x493   : > { %5646 = vmatprep.subr.bf16.mxu1 %v8299_v34 }
 0x495   : > { %4341 = vmatmul.mubr.f32.gmra.mrb[36].mxu1 %v2960_v0  ;;  %v3046_v0 = vld [vmem:[#allocation2 + $0x151] sm:$0xff] }
 0x496   : > { %4345 = vmatprep.mubr.f32.mxu1 %v7808_v8  ;;  %5654 = vmatpush3.bf16.msra.mxu1 %v8299_v34  ;;  %v2963_v8 = vld [vmem:[#allocation2 + $0x68] sm:$0xff]  ;;  %v2970_v34 = vld [vmem:[#allocation2 + $0xc0] sm:$0xff] }
 0x497   : > { %5647 = vmatprep.subr.bf16.mxu1 %v8300_v29 }
 0x499   : > { %4346 = vmatmul.mubr.f32.gmra.mrb[38].mxu1 %v2961_v43  ;;  %v3048_v43 = vld [vmem:[#allocation2 + $0x169] sm:$0xff] }
 0x49a   : > { %4350 = vmatprep.mubr.f32.mxu1 %v7812_v31  ;;  %5655 = vmatpush3.bf16.msra.mxu1 %v8300_v29  ;;  %v2964_v31 = vld [vmem:[#allocation2 + $0x78] sm:$0xff] }
 0x49b   : > { %5648 = vmatprep.subr.bf16.mxu1 %v8301_v23  ;;  %v3047_v29 = vld [vmem:[#allocation2 + $0x159] sm:$0xff] }
 0x49d   : > { %4351 = vmatmul.mubr.f32.gmra.mrb[40].mxu1 %v2962_v39  ;;  %v3050_v39 = vld [vmem:[#allocation2 + $0x181] sm:$0xff] }
 0x49e   : > { %4355 = vmatprep.mubr.f32.mxu1 %v7820_v13  ;;  %5656 = vmatpush3.bf16.msra.mxu1 %v8301_v23  ;;  %v2965_v13 = vld [vmem:[#allocation2 + $0x80] sm:$0xff]  ;;  %v3049_v23 = vld [vmem:[#allocation2 + $0x171] sm:$0xff] }
 0x49f   : > { %5649 = vmatprep.subr.bf16.mxu1 %v8302_v28 }
 0x4a1   : > { %4356 = vmatmul.mubr.f32.gmra.mrb[42].mxu1 %v2963_v8  ;;  %v3053_v8 = vld [vmem:[#allocation2 + $0x1a1] sm:$0xff] }
 0x4a2   : > { %4360 = vmatprep.mubr.f32.mxu1 %v7824_v24  ;;  %5657 = vmatpush3.bf16.msra.mxu1 %v8302_v28  ;;  %v2967_v24 = vld [vmem:[#allocation2 + $0x98] sm:$0xff] }
 0x4a3   : > { %5650 = vmatprep.subr.bf16.mxu1 %v8303_v5  ;;  %v3052_v28 = vld [vmem:[#allocation2 + $0x199] sm:$0xff] }
 0x4a5   : > { %4361 = vmatmul.mubr.f32.gmra.mrb[44].mxu1 %v2964_v31  ;;  %v7979_v31 = vld [vmem:[#allocation9 + $0x1] ss:$0 sm:$0xff] }
 0x4a6   : > { %4365 = vmatprep.mubr.f32.mxu1 %v7832_v42  ;;  %5658 = vmatpush3.bf16.msra.mxu1 %v8303_v5  ;;  %v2969_v42 = vld [vmem:[#allocation2 + $0xb0] sm:$0xff]  ;;  %v6246_v5 = vld [vmem:[#allocation2] sm:$0xff] }
 0x4a7   : > { %5651 = vmatprep.subr.bf16.mxu1 %v8304_v6 }
 0x4a9   : > { %4366 = vmatmul.mubr.f32.gmra.mrb[46].mxu1 %v2965_v13 }
 0x4aa   : > { %4370 = vmatprep.mubr.f32.mxu1 %v7836_v38  ;;  %5659 = vmatpush3.bf16.msra.mxu1 %v8304_v6  ;;  %v2971_v38 = vld [vmem:[#allocation2 + $0xc8] sm:$0xff] }
 0x4ad   : > { %4371 = vmatmul.mubr.f32.gmra.mrb[48].mxu1 %v2966_v12  ;;  %v8305_v12 = vld [vmem:[#allocation24_spill] sm:$0xff] }
 0x4ae   : > { %4375 = vmatprep.mubr.f32.mxu1 %v7844_v16  ;;  %v2972_v16 = vld [vmem:[#allocation2 + $0xd8] sm:$0xff] }
 0x4b1   : > { %4376 = vmatmul.mubr.f32.gmra.mrb[50].mxu1 %v2967_v24 }
 0x4b2   : > { %4380 = vmatprep.mubr.f32.mxu1 %v7848_v20  ;;  %v2973_v20 = vld [vmem:[#allocation2 + $0xe0] sm:$0xff] }
 0x4b5   : > { %4381 = vmatmul.mubr.f32.gmra.mrb[52].mxu1 %v2968_v10 }
 0x4b6   : > { %4385 = vmatprep.mubr.f32.mxu1 %v7856_v32  ;;  %v2974_v32 = vld [vmem:[#allocation2 + $0xf0] sm:$0xff] }
 0x4b9   : > { %4386 = vmatmul.mubr.f32.gmra.mrb[54].mxu1 %v2969_v42 }
 0x4ba   : > { %4390 = vmatprep.mubr.f32.mxu1 %v7860_v54  ;;  %v2975_v54 = vld [vmem:[#allocation2 + $0xf8] sm:$0xff] }
 0x4bd   : > { %4391 = vmatmul.mubr.f32.gmra.mrb[56].mxu1 %v2970_v34  ;;  %v8306_v34 = vld [vmem:[#allocation25_spill] sm:$0xff] }
 0x4be   : > { %4395 = vmatprep.mubr.f32.mxu1 %v7868_v17  ;;  %v2976_v17 = vld [vmem:[#allocation2 + $0x108] sm:$0xff] }
 0x4c1   : > { %4396 = vmatmul.mubr.f32.gmra.mrb[58].mxu1 %v2971_v38 }
 0x4c2   : > { %4400 = vmatprep.mubr.f32.mxu1 %v7872_v56  ;;  %v2977_v56 = vld [vmem:[#allocation2 + $0x110] sm:$0xff] }
 0x4c5   : > { %4401 = vmatmul.mubr.f32.gmra.mrb[60].mxu1 %v2972_v16 }
 0x4c6   : > { %4405 = vmatprep.mubr.f32.mxu1 %v7879_v14  ;;  %v2978_v14 = vld [vmem:[#allocation2 + $0x120] sm:$0xff] }
 0x4c9   : > { %4406 = vmatmul.mubr.f32.gmra.mrb[62].mxu1 %v2973_v20 }
 0x4ca   : > { %4410 = vmatprep.mubr.f32.mxu1 %v7883_v44  ;;  %v2979_v44 = vld [vmem:[#allocation2 + $0x128] sm:$0xff] }
 0x4cd   : > { %4411 = vmatmul.mubr.f32.gmra.mrb[64].mxu1 %v2974_v32 }
 0x4ce   : > { %4415 = vmatprep.mubr.f32.mxu1 %v7887_v47  ;;  %v2980_v47 = vld [vmem:[#allocation2 + $0x138] sm:$0xff] }
 0x4d1   : > { %4416 = vmatmul.mubr.f32.gmra.mrb[66].mxu1 %v2975_v54 }
 0x4d2   : > { %4420 = vmatprep.mubr.f32.mxu1 %v7891_v49  ;;  %v2981_v49 = vld [vmem:[#allocation2 + $0x140] sm:$0xff] }
 0x4d5   : > { %4421 = vmatmul.mubr.f32.gmra.mrb[68].mxu1 %v2976_v17 }
 0x4d6   : > { %4425 = vmatprep.mubr.f32.mxu1 %v7895_v18  ;;  %v2982_v18 = vld [vmem:[#allocation2 + $0x150] sm:$0xff] }
 0x4d9   : > { %4426 = vmatmul.mubr.f32.gmra.mrb[70].mxu1 %v2977_v56 }
 0x4da   : > { %4430 = vmatprep.mubr.f32.mxu1 %v7899_v33  ;;  %v2983_v33 = vld [vmem:[#allocation2 + $0x158] sm:$0xff] }
 0x4dd   : > { %4431 = vmatmul.mubr.f32.gmra.mrb[72].mxu1 %v2978_v14 }
 0x4de   : > { %4435 = vmatprep.mubr.f32.mxu1 %v7903_v1  ;;  %v2984_v1 = vld [vmem:[#allocation2 + $0x168] sm:$0xff] }
 0x4e1   : > { %4436 = vmatmul.mubr.f32.gmra.mrb[74].mxu1 %v2979_v44 }
 0x4e2   : > { %4440 = vmatprep.mubr.f32.mxu1 %v7907_v26  ;;  %v2985_v26 = vld [vmem:[#allocation2 + $0x170] sm:$0xff] }
 0x4e5   : > { %4441 = vmatmul.mubr.f32.gmra.mrb[76].mxu1 %v2980_v47 }
 0x4e6   : > { %4445 = vmatprep.mubr.f32.mxu1 %v7911_v55  ;;  %v3051_v55 = vld [vmem:[#allocation2 + $0x189] sm:$0xff] }
 0x4e9   : > { %4446 = vmatmul.mubr.f32.gmra.mrb[78].mxu1 %v2981_v49 }
 0x4ea   : > { %4450 = vmatprep.mubr.f32.mxu1 %v3046_v0  ;;  %v8308_v0 = vld [vmem:[#allocation27_spill] sm:$0xff] }
 0x4ed   : > { %4451 = vmatmul.mubr.f32.gmra.mrb[80].mxu1 %v2982_v18 }
 0x4ee   : > { %4455 = vmatprep.mubr.f32.mxu1 %v3047_v29 }
 0x4f1   : > { %4456 = vmatmul.mubr.f32.gmra.mrb[82].mxu1 %v2983_v33 }
 0x4f2   : > { %4460 = vmatprep.mubr.f32.mxu1 %v3048_v43 }
 0x4f5   : > { %4461 = vmatmul.mubr.f32.gmra.mrb[84].mxu1 %v2984_v1 }
 0x4f6   : > { %4465 = vmatprep.mubr.f32.mxu1 %v3049_v23  ;;  %v8309_v23 = vld [vmem:[#allocation28_spill] sm:$0xff] }
 0x4f9   : > { %4466 = vmatmul.mubr.f32.gmra.mrb[86].mxu1 %v2985_v26 }
 0x4fa   : > { %4470 = vmatprep.mubr.f32.mxu1 %v3050_v39 }
 0x4fd   : > { %4471 = vmatmul.mubr.f32.gmra.mrb[88].mxu1 %v7764_v51  ;;  %v3116_v51 = vld [vmem:[#allocation2 + $0x19a] sm:$0xff] }
 0x4fe   : > { %4475 = vmatprep.mubr.f32.mxu1 %v3051_v55 }
 0x501   : > { %4476 = vmatmul.mubr.f32.gmra.mrb[90].mxu1 %v7772_v46  ;;  %v3117_v46 = vld [vmem:[#allocation2 + $0x1a2] sm:$0xff] }
 0x502   : > { %4480 = vmatprep.mubr.f32.mxu1 %v3052_v28 }
 0x505   : > { %4481 = vmatmul.mubr.f32.gmra.mrb[92].mxu1 %v6246_v5 }
 0x506   : > { %4485 = vmatprep.mubr.f32.mxu1 %v3053_v8 }
 0x509   : > { %4486 = vmatmul.mubr.f32.gmra.mrb[94].mxu1 %v6246_v5  ;;  %v8310_v5 = vld [vmem:[#allocation29_spill] sm:$0xff] }
 0x50a   : > { %5184 = vmatprep.mubr.f32.mxu1 %v7753_v4 }
 0x50d   : > { %5185 = vmatmul.mubr.f32.vlgmr.msra.gmra.mrb[96].mxu1 %v7761_v9 }
 0x50e   : > { %5187 = vmatprep.mubr.f32.mxu1 %v7767_v22 }
 0x511   : > { %5188 = vmatmul.mubr.f32.gmra.mrb[98].mxu1 %v7777_v40 }
 0x512   : > { %5190 = vmatprep.mubr.f32.mxu1 %v7922_v52 }
 0x515   : > { %5191 = vmatmul.mubr.f32.gmra.mrb[100].mxu1 %v7927_v60 }
 0x516   : > { %5193 = vmatprep.mubr.f32.mxu1 %v3116_v51 }
 0x519   : > { %5194 = vmatmul.mubr.f32.gmra.mrb[102].mxu1 %v3117_v46 }
 0x560   : > { %v4332_v6 = vpop.f32.mrb[32].mxu1 }
 0x561   : > { %v5692_v4 = vadd.f32 %v7979_v31, %v4332_v6  ;;  %v4334_v13 = vpop.f32.mrb[33].mxu1 }
 0x563   : > { %v4558_v9 = vadd.f32 %v5692_v4, %v7748_v21 }
 0x564   : > { %v4337_v22 = vpop.f32.mrb[34].mxu1 }
 0x565   : > { %v4716_v40 = vadd.f32 %v8305_v12, %v4558_v9  ;;  %v5693_v52 = vadd.f32 %v7979_v31, %v4337_v22  ;;  %v4339_v24 = vpop.f32.mrb[35].mxu1  ;;  %v8311_v9 = vld [vmem:[#allocation30_spill] sm:$0xff] }
 0x567   : > { %v4748_v10 = vmax.f32 %v4716_v40, 0.0  ;;  %v4563_v60 = vadd.f32 %v5693_v52, %v7745_v35  ;;  %v8307_v35 = vld [vmem:[#allocation26_spill] sm:$0xff] }
 0x568   : > { %v4342_v42 = vpop.f32.mrb[36].mxu1 }
 0x569   : > { %4780 = vst [vmem:[%s7988_s18] sm:$0xff] %v4748_v10  ;;  %v4717_v38 = vadd.f32 %v8306_v34, %v4563_v60  ;;  %v5694_v21 = vadd.f32 %v7979_v31, %v4342_v42  ;;  %v4344_v16 = vpop.f32.mrb[37].mxu1  ;;  %v8312_v10 = vld [vmem:[#allocation31_spill] sm:$0xff] }
 0x56a   : > { %v8313_v16 = vld [vmem:[#allocation32_spill] sm:$0xff] }
 0x56b   : > { %v4749_v20 = vmax.f32 %v4717_v38, 0.0  ;;  %v4568_v32 = vadd.f32 %v5694_v21, %v7758_v19 }
 0x56c   : > { %v4347_v54 = vpop.f32.mrb[38].mxu1 }
 0x56d   : > { %4781 = vst [vmem:[%s7988_s18 + $0x8] sm:$0xff] %v4749_v20  ;;  %v4718_v17 = vadd.f32 %v8307_v35, %v4568_v32  ;;  %v5695_v56 = vadd.f32 %v7979_v31, %v4347_v54  ;;  %v4349_v14 = vpop.f32.mrb[39].mxu1 }
 0x56f   : > { %v4750_v44 = vmax.f32 %v4718_v17, 0.0  ;;  %v4573_v47 = vadd.f32 %v5695_v56, %v7755_v25  ;;  %v8314_v56 = vld [vmem:[#allocation33_spill] sm:$0xff] }
 0x570   : > { %v4352_v49 = vpop.f32.mrb[40].mxu1 }
 0x571   : > { %4782 = vst [vmem:[%s7988_s18 + $0x10] sm:$0xff] %v4750_v44  ;;  %v4719_v18 = vadd.f32 %v8308_v0, %v4573_v47  ;;  %v5696_v29 = vadd.f32 %v7979_v31, %v4352_v49  ;;  %v4354_v33 = vpop.f32.mrb[41].mxu1 }
 0x573   : > { %v4751_v19 = vmax.f32 %v4719_v18, 0.0  ;;  %v4578_v43 = vadd.f32 %v5696_v29, %v7774_v57  ;;  %v8315_v18 = vld [vmem:[#allocation34_spill] sm:$0xff] }
 0x574   : > { %v4357_v1 = vpop.f32.mrb[42].mxu1 }
 0x575   : > { %4783 = vst [vmem:[%s7988_s18 + $0x18] sm:$0xff] %v4751_v19  ;;  %v4720_v26 = vadd.f32 %v8309_v23, %v4578_v43  ;;  %v5697_v39 = vadd.f32 %v7979_v31, %v4357_v1  ;;  %v4359_v55 = vpop.f32.mrb[43].mxu1  ;;  %v8316_v23 = vld [vmem:[#allocation35_spill] sm:$0xff] }
 0x577   : > { %v4752_v25 = vmax.f32 %v4720_v26, 0.0  ;;  %v4583_v28 = vadd.f32 %v5697_v39, %v7769_v2 }
 0x578   : > { %v4362_v8 = vpop.f32.mrb[44].mxu1 }
 0x579   : > { %4784 = vst [vmem:[%s7988_s18 + $0x20] sm:$0xff] %v4752_v25  ;;  %v4721_v51 = vadd.f32 %v8310_v5, %v4583_v28  ;;  %v5698_v46 = vadd.f32 %v7979_v31, %v4362_v8  ;;  %v4364_v6 = vpop.f32.mrb[45].mxu1  ;;  %v8317_v8 = vld [vmem:[#allocation36_spill] sm:$0xff] }
 0x57b   : > { %v4753_v57 = vmax.f32 %v4721_v51, 0.0  ;;  %v4588_v4 = vadd.f32 %v5698_v46, %v7783_v58 }
 0x57c   : > { %v4367_v13 = vpop.f32.mrb[46].mxu1 }
 0x57d   : > { %4785 = vst [vmem:[%s7988_s18 + $0x28] sm:$0xff] %v4753_v57  ;;  %v4722_v22 = vadd.f32 %v8311_v9, %v4588_v4  ;;  %v5699_v12 = vadd.f32 %v7979_v31, %v4367_v13  ;;  %v4369_v40 = vpop.f32.mrb[47].mxu1  ;;  %v8318_v4 = vld [vmem:[#allocation37_spill] sm:$0xff] }
 0x57f   : > { %v4754_v2 = vmax.f32 %v4722_v22, 0.0  ;;  %v4593_v52 = vadd.f32 %v5699_v12, %v7781_v59 }
 0x580   : > { %v4372_v24 = vpop.f32.mrb[48].mxu1 }
 0x581   : > { %4786 = vst [vmem:[%s7988_s18 + $0x30] sm:$0xff] %v4754_v2  ;;  %v4723_v60 = vadd.f32 %v8312_v10, %v4593_v52  ;;  %v5700_v42 = vadd.f32 %v7979_v31, %v4372_v24  ;;  %v4374_v34 = vpop.f32.mrb[49].mxu1  ;;  %v8319_v2 = vld [vmem:[#allocation38_spill] sm:$0xff] }
 0x582   : > { %v8320_v34 = vld [vmem:[#allocation39_spill] sm:$0xff] }
 0x583   : > { %v4755_v58 = vmax.f32 %v4723_v60, 0.0  ;;  %v4598_v38 = vadd.f32 %v5700_v42, %v7793_v53 }
 0x584   : > { %v4377_v21 = vpop.f32.mrb[50].mxu1 }
 0x585   : > { %4787 = vst [vmem:[%s7988_s18 + $0x38] sm:$0xff] %v4755_v58  ;;  %v4724_v20 = vadd.f32 %v8313_v16, %v4598_v38  ;;  %v5701_v32 = vadd.f32 %v7979_v31, %v4377_v21  ;;  %v4379_v54 = vpop.f32.mrb[51].mxu1 }
 0x587   : > { %v4756_v59 = vmax.f32 %v4724_v20, 0.0  ;;  %v4603_v35 = vadd.f32 %v5701_v32, %v7790_v7  ;;  %v8321_v32 = vld [vmem:[#allocation40_spill] sm:$0xff] }
 0x588   : > { %v4382_v17 = vpop.f32.mrb[52].mxu1 }
 0x589   : > { %4788 = vst [vmem:[%s7988_s18 + $0x40] sm:$0xff] %v4756_v59  ;;  %v4725_v14 = vadd.f32 %v8314_v56, %v4603_v35  ;;  %v5702_v44 = vadd.f32 %v7979_v31, %v4382_v17  ;;  %v4384_v47 = vpop.f32.mrb[53].mxu1 }
 0x58b   : > { %v4757_v53 = vmax.f32 %v4725_v14, 0.0  ;;  %v4608_v49 = vadd.f32 %v5702_v44, %v7805_v3  ;;  %v8322_v14 = vld [vmem:[#allocation41_spill] sm:$0xff] }
 0x58c   : > { %v4387_v0 = vpop.f32.mrb[54].mxu1 }
 0x58d   : > { %4789 = vst [vmem:[%s7988_s18 + $0x48] sm:$0xff] %v4757_v53  ;;  %v4726_v29 = vadd.f32 %v8315_v18, %v4608_v49  ;;  %v5703_v33 = vadd.f32 %v7979_v31, %v4387_v0  ;;  %v4389_v19 = vpop.f32.mrb[55].mxu1  ;;  %v8323_v18 = vld [vmem:[#allocation42_spill] sm:$0xff] }
 0x58f   : > { %v4758_v7 = vmax.f32 %v4726_v29, 0.0  ;;  %v4613_v43 = vadd.f32 %v5703_v33, %v7802_v50 }
 0x590   : > { %v4392_v1 = vpop.f32.mrb[56].mxu1 }
 0x591   : > { %4790 = vst [vmem:[%s7988_s18 + $0x50] sm:$0xff] %v4758_v7  ;;  %v4727_v26 = vadd.f32 %v8316_v23, %v4613_v43  ;;  %v5704_v39 = vadd.f32 %v7979_v31, %v4392_v1  ;;  %v4394_v55 = vpop.f32.mrb[57].mxu1  ;;  %v8324_v1 = vld [vmem:[#allocation43_spill] sm:$0xff] }
 0x593   : > { %v4759_v3 = vmax.f32 %v4727_v26, 0.0  ;;  %v4618_v25 = vadd.f32 %v5704_v39, %v7817_v61 }
 0x594   : > { %v4397_v28 = vpop.f32.mrb[58].mxu1 }
 0x595   : > { %4791 = vst [vmem:[%s7988_s18 + $0x58] sm:$0xff] %v4759_v3  ;;  %v4728_v5 = vadd.f32 %v8317_v8, %v4618_v25  ;;  %v5705_v51 = vadd.f32 %v7979_v31, %v4397_v28  ;;  %v4399_v46 = vpop.f32.mrb[59].mxu1  ;;  %v8325_v25 = vld [vmem:[#allocation44_spill] sm:$0xff] }
 0x597   : > { %v4760_v50 = vmax.f32 %v4728_v5, 0.0  ;;  %v4623_v6 = vadd.f32 %v5705_v51, %v7814_v36 }
 0x598   : > { %v4402_v57 = vpop.f32.mrb[60].mxu1 }
 0x599   : > { %4792 = vst [vmem:[%s7988_s18 + $0x60] sm:$0xff] %v4760_v50  ;;  %v4729_v13 = vadd.f32 %v8318_v4, %v4623_v6  ;;  %v5706_v9 = vadd.f32 %v7979_v31, %v4402_v57  ;;  %v4404_v22 = vpop.f32.mrb[61].mxu1  ;;  %v8326_v50 = vld [vmem:[#allocation45_spill] sm:$0xff] }
 0x59a   : > { %v8327_v22 = vld [vmem:[#allocation47_spill] sm:$0xff] }
 0x59b   : > { %v4761_v61 = vmax.f32 %v4729_v13, 0.0  ;;  %v4628_v12 = vadd.f32 %v5706_v9, %v7829_v15 }
 0x59c   : > { %v4407_v40 = vpop.f32.mrb[62].mxu1 }
 0x59d   : > { %4793 = vst [vmem:[%s7988_s18 + $0x68] sm:$0xff] %v4761_v61  ;;  %v4730_v52 = vadd.f32 %v8319_v2, %v4628_v12  ;;  %v5707_v24 = vadd.f32 %v7979_v31, %v4407_v40  ;;  %v4409_v10 = vpop.f32.mrb[63].mxu1 }
 0x59f   : > { %v4762_v36 = vmax.f32 %v4730_v52, 0.0  ;;  %v4633_v60 = vadd.f32 %v5707_v24, %v7826_v37  ;;  %v8328_v24 = vld [vmem:[#allocation48_spill] sm:$0xff] }
 0x5a0   : > { %v4412_v42 = vpop.f32.mrb[64].mxu1 }
 0x5a1   : > { %4794 = vst [vmem:[%s7988_s18 + $0x70] sm:$0xff] %v4762_v36  ;;  %v4731_v58 = vadd.f32 %v8320_v34, %v4633_v60  ;;  %v5708_v38 = vadd.f32 %v7979_v31, %v4412_v42  ;;  %v4414_v21 = vpop.f32.mrb[65].mxu1 }
 0x5a3   : > { %v4763_v15 = vmax.f32 %v4731_v58, 0.0  ;;  %v4638_v16 = vadd.f32 %v5708_v38, %v7841_v41 }
 0x5a4   : > { %v4417_v20 = vpop.f32.mrb[66].mxu1 }
 0x5a5   : > { %4795 = vst [vmem:[%s7988_s18 + $0x78] sm:$0xff] %v4763_v15  ;;  %v4732_v54 = vadd.f32 %v8321_v32, %v4638_v16  ;;  %v5709_v59 = vadd.f32 %v7979_v31, %v4417_v20  ;;  %v4419_v35 = vpop.f32.mrb[67].mxu1 }
 0x5a7   : > { %v4764_v37 = vmax.f32 %v4732_v54, 0.0  ;;  %v4643_v17 = vadd.f32 %v5709_v59, %v7838_v62 }
 0x5a8   : > { %v4422_v56 = vpop.f32.mrb[68].mxu1 }
 0x5a9   : > { %4796 = vst [vmem:[%s7988_s18 + $0x80] sm:$0xff] %v4764_v37  ;;  %v4733_v44 = vadd.f32 %v8322_v14, %v4643_v17  ;;  %v5710_v47 = vadd.f32 %v7979_v31, %v4422_v56  ;;  %v4424_v53 = vpop.f32.mrb[69].mxu1 }
 0x5ab   : > { %v4765_v41 = vmax.f32 %v4733_v44, 0.0  ;;  %v4648_v49 = vadd.f32 %v5710_v47, %v7853_v45 }
 0x5ac   : > { %v4427_v0 = vpop.f32.mrb[70].mxu1 }
 0x5ad   : > { %4797 = vst [vmem:[%s7988_s18 + $0x88] sm:$0xff] %v4765_v41  ;;  %v4734_v29 = vadd.f32 %v8323_v18, %v4648_v49  ;;  %v5711_v33 = vadd.f32 %v7979_v31, %v4427_v0  ;;  %v4429_v19 = vpop.f32.mrb[71].mxu1  ;;  %v8329_v41 = vld [vmem:[#allocation52_spill] sm:$0xff]  ;;  %v8330_v18 = vld [vmem:[#allocation51_spill] sm:$0xff] }
 0x5af   : > { %v4766_v62 = vmax.f32 %v4734_v29, 0.0  ;;  %v4653_v7 = vadd.f32 %v5711_v33, %v7850_v11 }
 0x5b0   : > { %v4432_v43 = vpop.f32.mrb[72].mxu1 }
 0x5b1   : > { %4798 = vst [vmem:[%s7988_s18 + $0x90] sm:$0xff] %v4766_v62  ;;  %v4735_v23 = vadd.f32 %v8324_v1, %v4653_v7  ;;  %v5712_v26 = vadd.f32 %v7979_v31, %v4432_v43  ;;  %v4434_v39 = vpop.f32.mrb[73].mxu1 }
 0x5b3   : > { %v4767_v45 = vmax.f32 %v4735_v23, 0.0  ;;  %v4658_v55 = vadd.f32 %v5712_v26, %v7865_v63  ;;  %v8331_v26 = vld [vmem:[#allocation56_spill] sm:$0xff] }
 0x5b4   : > { %v4437_v3 = vpop.f32.mrb[74].mxu1 }
 0x5b5   : > { %4799 = vst [vmem:[%s7988_s18 + $0x98] sm:$0xff] %v4767_v45  ;;  %v4736_v28 = vadd.f32 %v8325_v25, %v4658_v55  ;;  %v5713_v8 = vadd.f32 %v7979_v31, %v4437_v3  ;;  %v4439_v5 = vpop.f32.mrb[75].mxu1  ;;  %v8332_v55 = vld [vmem:[#allocation54_spill] sm:$0xff] }
 0x5b7   : > { %v4768_v11 = vmax.f32 %v4736_v28, 0.0  ;;  %v4663_v51 = vadd.f32 %v5713_v8, %v7862_v27 }
 0x5b8   : > { %v4442_v46 = vpop.f32.mrb[76].mxu1 }
 0x5b9   : > { %4800 = vst [vmem:[%s7988_s18 + $0xa0] sm:$0xff] %v4768_v11  ;;  %v4737_v6 = vadd.f32 %v8326_v50, %v4663_v51  ;;  %v5714_v57 = vadd.f32 %v7979_v31, %v4442_v46  ;;  %v4444_v4 = vpop.f32.mrb[77].mxu1  ;;  %v8333_v50 = vld [vmem:[#allocation59_spill] sm:$0xff] }
 0x5ba   : > { %v8334_v4 = vld [vmem:[#allocation58_spill] sm:$0xff] }
 0x5bb   : > { %v4769_v63 = vmax.f32 %v4737_v6, 0.0  ;;  %v4668_v13 = vadd.f32 %v5714_v57, %v7877_v48 }
 0x5bc   : > { %v4447_v9 = vpop.f32.mrb[78].mxu1 }
 0x5bd   : > { %4801 = vst [vmem:[%s7988_s18 + $0xa8] sm:$0xff] %v4769_v63  ;;  %v4738_v61 = vadd.f32 %v8327_v22, %v4668_v13  ;;  %v5715_v12 = vadd.f32 %v7979_v31, %v4447_v9  ;;  %v4449_v40 = vpop.f32.mrb[79].mxu1 }
 0x5bf   : > { %v4770_v27 = vmax.f32 %v4738_v61, 0.0  ;;  %v4673_v2 = vadd.f32 %v5715_v12, %v7874_v30 }
 0x5c0   : > { %v4452_v52 = vpop.f32.mrb[80].mxu1 }
 0x5c1   : > { %4802 = vst [vmem:[%s7988_s18 + $0xb0] sm:$0xff] %v4770_v27  ;;  %v4739_v10 = vadd.f32 %v8328_v24, %v4673_v2  ;;  %v4454_v36 = vpop.f32.mrb[81].mxu1  ;;  %v5716_v17 = vadd.f32 %v7979_v31, %v4452_v52  ;;  %v8335_v27 = vld [vmem:[#allocation23_spill] sm:$0xff] }
 0x5c3   : > { %v4771_v60 = vmax.f32 %v4739_v10, 0.0 }
 0x5c4   : > { %v4457_v42 = vpop.f32.mrb[82].mxu1 }
 0x5c5   : > { %4803 = vst [vmem:[%s7988_s18 + $0xb8] sm:$0xff] %v4771_v60  ;;  %v4459_v34 = vpop.f32.mrb[83].mxu1  ;;  %v5717_v37 = vadd.f32 %v7979_v31, %v4457_v42 }
 0x5c8   : > { %v4462_v48 = vpop.f32.mrb[84].mxu1 }
 0x5c9   : > { %v4464_v58 = vpop.f32.mrb[85].mxu1  ;;  %v5718_v0 = vadd.f32 %v7979_v31, %v4462_v48 }
 0x5cc   : > { %v4467_v38 = vpop.f32.mrb[86].mxu1 }
 0x5cd   : > { %v4469_v21 = vpop.f32.mrb[87].mxu1  ;;  %v5719_v53 = vadd.f32 %v7979_v31, %v4467_v38 }
 0x5d0   : > { %v4472_v15 = vpop.f32.mrb[88].mxu1 }
 0x5d1   : > { %v4474_v16 = vpop.f32.mrb[89].mxu1  ;;  %v5720_v45 = vadd.f32 %v7979_v31, %v4472_v15 }
 0x5d4   : > { %v4477_v20 = vpop.f32.mrb[90].mxu1 }
 0x5d5   : > { %v4479_v32 = vpop.f32.mrb[91].mxu1  ;;  %v5721_v23 = vadd.f32 %v7979_v31, %v4477_v20 }
 0x5d8   : > { %v4482_v54 = vpop.f32.mrb[92].mxu1 }
 0x5d9   : > { %v4484_v59 = vpop.f32.mrb[93].mxu1  ;;  %v5722_v57 = vadd.f32 %v7979_v31, %v4482_v54 }
 0x5dc   : > { %v4487_v30 = vpop.f32.mrb[94].mxu1 }
 0x5dd   : > { %v4489_v35 = vpop.f32.mrb[95].mxu1  ;;  %v5723_v46 = vadd.f32 %v7979_v31, %v4487_v30  ;;  %v8336_v31 = vld [vmem:[#allocation22_spill] sm:$0xff] }
 0x5e0   : > { %v5186_v56 = vpop.f32.mrb[96].mxu1 }
 0x5e1   : > { %v4683_v14 = vadd.f32 %v5717_v37, %v5186_v56  ;;  %v4677_v44 = vpop.f32.mrb[97].mxu1 }
 0x5e2   : > { %v4678_v47 = vadd.f32 %v5716_v17, %v4677_v44 }
 0x5e3   : > { %v4741_v49 = vadd.f32 %v8329_v41, %v4683_v14 }
 0x5e4   : > { %v4740_v29 = vadd.f32 %v8330_v18, %v4678_v47  ;;  %v5189_v33 = vpop.f32.mrb[98].mxu1 }
 0x5e5   : > { %v4773_v19 = vmax.f32 %v4741_v49, 0.0  ;;  %v4693_v62 = vadd.f32 %v5719_v53, %v5189_v33  ;;  %v4687_v7 = vpop.f32.mrb[99].mxu1 }
 0x5e6   : > { %v4772_v43 = vmax.f32 %v4740_v29, 0.0  ;;  %v4688_v1 = vadd.f32 %v5718_v0, %v4687_v7 }
 0x5e7   : > { %4805 = vst [vmem:[%s7988_s18 + $0xc8] sm:$0xff] %v4773_v19  ;;  %v4743_v39 = vadd.f32 %v8331_v26, %v4693_v62 }
 0x5e8   : > { %4804 = vst [vmem:[%s7988_s18 + $0xc0] sm:$0xff] %v4772_v43  ;;  %v4742_v3 = vadd.f32 %v8332_v55, %v4688_v1  ;;  %v5192_v25 = vpop.f32.mrb[100].mxu1 }
 0x5e9   : > { %v4775_v28 = vmax.f32 %v4743_v39, 0.0  ;;  %v4703_v8 = vadd.f32 %v5721_v23, %v5192_v25  ;;  %v4697_v5 = vpop.f32.mrb[101].mxu1 }
 0x5ea   : > { %v4774_v11 = vmax.f32 %v4742_v3, 0.0  ;;  %v4698_v51 = vadd.f32 %v5720_v45, %v4697_v5 }
 0x5eb   : > { %4807 = vst [vmem:[%s7988_s18 + $0xd8] sm:$0xff] %v4775_v28  ;;  %v4745_v6 = vadd.f32 %v8333_v50, %v4703_v8 }
 0x5ec   : > { %4806 = vst [vmem:[%s7988_s18 + $0xd0] sm:$0xff] %v4774_v11  ;;  %v4744_v63 = vadd.f32 %v8334_v4, %v4698_v51  ;;  %v5195_v13 = vpop.f32.mrb[102].mxu1 }
 0x5ed   : > { %v4777_v9 = vmax.f32 %v4745_v6, 0.0  ;;  %v4713_v22 = vadd.f32 %v5723_v46, %v5195_v13  ;;  %v4707_v61 = vpop.f32.mrb[103].mxu1 }
 0x5ee   : > { %v4776_v12 = vmax.f32 %v4744_v63, 0.0  ;;  %v4708_v40 = vadd.f32 %v5722_v57, %v4707_v61 }
 0x5ef   : > { %4809 = vst [vmem:[%s7988_s18 + $0xe8] sm:$0xff] %v4777_v9  ;;  %v4747_v2 = vadd.f32 %v8335_v27, %v4713_v22 }
 0x5f0   : > { %4808 = vst [vmem:[%s7988_s18 + $0xe0] sm:$0xff] %v4776_v12  ;;  %v4746_v52 = vadd.f32 %v8336_v31, %v4708_v40 }
 0x5f1   : > { %v4779_v24 = vmax.f32 %v4747_v2, 0.0 }
 0x5f2   : > { %v4778_v10 = vmax.f32 %v4746_v52, 0.0 }
 0x5f3   : > { %4811 = vst [vmem:[%s7988_s18 + $0xf8] sm:$0xff] %v4779_v24 }
 0x5f4   : > { %4810 = vst [vmem:[%s7988_s18 + $0xf0] sm:$0xff] %v4778_v10 }
 0x5f5   : > { %6346 = shalt.err (!%p6343_p1)
}
 0x5f6   : > { %s6347_s23 = scalar_lea.hbm %s8108_s22, 4096  ;;  %s6351_s28 = scalar_lea.hbm %s8159_s3, 8192 }
 0x5f7   : > { %p6348_p13 = scmp.ne.s32.totalorder %s8108_s22, %s6347_s23  ;;  %p6352_p4 = scmp.lt.u32.totalorder %s8108_s22, %s8159_s3 }
 0x5f8   : > { %p6353_p7 = scmp.lt.u32.totalorder %s6351_s28, %s6347_s23  ;;  %p6355_p11 = scmp.lt.u32.totalorder %s6347_s23, %s8108_s22 }
 0x5f9   : > { %p6349_p6 = pnand %p6348_p13, %p8337_p0 }
 0x5fa   : > { %p6354_p8 = por %p6353_p7, %p6352_p4 }
 0x5fb   : > { %p6350_p10 = pneg %p6349_p6 }
 0x5fc   : > { %p6356_p2 = por %p6355_p11, %p6354_p8 }
 0x5fe   : > { %p6357_p3 = pnand %p6356_p2, %p6350_p10 }
 0x600   : > { %6360 = shalt.err (!%p6357_p3)
}
 0x601   : > { %s6415_s29 = smov 128   ;;  %s6416_s18 = smov 8  }
 0x602   : > { %6118 = dma.vmem_to_hbm [thread:$0]  (%p8337_p0), %s8110_s7, 4096, %s8108_s22, %s4813_s16, %s6415_s29, %s6415_s29, %s6416_s18  }
 0x603 PF: > { %s4841_s20 = sand.u32 1, %s6391_s12   ;;  %p8338_p5 = scmp.ne.s32.totalorder %s8229_s19, 0 }
 0x604   : > { %p8339_p9 = scmp.ge.s32.totalorder %s6403_s15, 2  ;;  %s4842_s8 = scalar_lea.sflag [#allocation6], %s4841_s20 }
 0x606   : > { %p6132_p12 = pnand %p8339_p9, %p8338_p5 }
 0x608   : > { %6386 = dma.done.wait (!%p6132_p12), %s4842_s8, 4096  }
 0x609   : > { %6388 = vsyncadd (!%p6132_p12), %s4842_s8, 4294963200  ;;  %p17_p1 = scmp.ge.s32.totalorder %s6550_s6, 4   ;;  %s8340_s12 = smov %s6395_s13 }
 0x60a   : > { %s8341_s13 = smov %s6399_s14  ;;  %s8342_s14 = smov %s6559_s11 }
 0x60b   : > { %s8343_s15 = smov %s6550_s6  ;;  %19 = sbr.rel (!%p17_p1) target bundleno = 6 (0x6), region = 89 }
 0x612   :  { %4847 = vsyncpa [#allocation5], 1 }
 0x613   :  { %4849 = vsyncpa [#allocation5 + $0x1], 1 }
 0x614   :  { %4850 = vsyncpa [#allocation8], 1 }
 0x615   :  { %4851 = vsyncpa [#allocation6], 1 }
 0x616   :  { %4853 = vsyncpa [#allocation6 + $0x1], 1 }

</bundles_post_ra>
